<compile_context>
chip_gen: v7x
topology: tpu7x:2x2x1
jax: 0.10.0
libtpu: 0.0.40
codegen_flags: <defaults>
</compile_context>

<pallas_src>
import functools

import jax
import jax.numpy as jnp
from jax.experimental import pallas as pl
from jax.experimental.pallas import tpu as pltpu


def _compare_object_size_kernel(segm1_ref, depth1_ref, segm2_ref, depth2_ref,
                                w_ref, sc1_ref, sc2_ref, *, depth_square):
    f32 = jnp.float32

    # Selection matrices: sel[d][p, a] = 1.0 iff a == 4*p + d   (d = 0..3).
    p_idx = jax.lax.broadcasted_iota(jnp.int32, (56, 224), 0)
    a_idx = jax.lax.broadcasted_iota(jnp.int32, (56, 224), 1)
    sel = [(a_idx == 4 * p_idx + d).astype(f32) for d in range(4)]

    w56 = w_ref[...]  # (56, 56) fc weight, row-major over the pooled map

    def score(seg_ref, dep_ref):
        seg = seg_ref[0]                                   # (224, 224)
        dep = dep_ref[0]                                   # (224, 224)
        m = seg * (dep * dep) if depth_square else seg * dep

        # Row-direction pooling: R[p, c] = max_d m[4p + d, c]   -> (56, 224)
        r = jnp.dot(sel[0], m, preferred_element_type=f32)
        for d in range(1, 4):
            r = jnp.maximum(r, jnp.dot(sel[d], m, preferred_element_type=f32))

        # Column-direction pooling: P[p, q] = max_d R[p, 4q + d] -> (56, 56)
        pool = jnp.einsum('pa,qa->pq', r, sel[0], preferred_element_type=f32)
        for d in range(1, 4):
            pool = jnp.maximum(
                pool, jnp.einsum('pa,qa->pq', r, sel[d], preferred_element_type=f32))

        # fc (Linear(3136, 1, bias=False)): weighted sum over pooled map.
        return jnp.sum(pool * w56)

    sc1_ref[...] = jnp.full((1, 8, 128), score(segm1_ref, depth1_ref), dtype=f32)
    sc2_ref[...] = jnp.full((1, 8, 128), score(segm2_ref, depth2_ref), dtype=f32)


def compare_object_size(segm1, depth1, segm2, depth2, fc_weight, depth_square):
    """segm*/depth*: (n, 224, 224) float; fc_weight: (3136,). Returns (sc1, sc2), each (n,)."""
    n, h, w = segm1.shape
    assert (h, w) == (224, 224), "CompareObjectSize expects 224x224 inputs"
    f32 = jnp.float32

    w56 = fc_weight.astype(f32).reshape(56, 56)

    kernel = functools.partial(_compare_object_size_kernel,
                               depth_square=bool(depth_square))

    img_spec = pl.BlockSpec((1, 224, 224), lambda i: (i, 0, 0))
    out_spec = pl.BlockSpec((1, 8, 128), lambda i: (i, 0, 0))

    sc1, sc2 = pl.pallas_call(
        kernel,
        grid=(n,),
        in_specs=[img_spec, img_spec, img_spec, img_spec,
                  pl.BlockSpec((56, 56), lambda i: (0, 0))],
        out_specs=[out_spec, out_spec],
        out_shape=[jax.ShapeDtypeStruct((n, 8, 128), f32),
                   jax.ShapeDtypeStruct((n, 8, 128), f32)],
        compiler_params=pltpu.CompilerParams(
            dimension_semantics=("parallel",)),
    )(segm1.astype(f32), depth1.astype(f32),
      segm2.astype(f32), depth2.astype(f32), w56)

    return sc1[:, 0, 0], sc2[:, 0, 0]


def _reference(segm, depth, fc_weight, depth_square):
    m = segm * (depth ** 2 if depth_square else depth)
    n = m.shape[0]
    mp = m.reshape(n, 56, 4, 56, 4).max(axis=(2, 4))
    return mp.reshape(n, -1) @ fc_weight


# TODO(synk): CompareObjectSize.inference() does a host-side Python loop over
# string ops ('bigger'/'smaller') to build a list of predictions; that control
# flow is not a kernel and is left to the caller.

if __name__ == "__main__":
    n = 2
    depth_square = True

    key = jax.random.PRNGKey(0)
    k1, k2, k3, k4 = jax.random.split(key, 4)
    segm1 = jax.random.bernoulli(k1, 0.4, (n, 224, 224)).astype(jnp.float32)
    depth1 = jax.random.uniform(k2, (n, 224, 224), dtype=jnp.float32)
    segm2 = jax.random.bernoulli(k3, 0.4, (n, 224, 224)).astype(jnp.float32)
    depth2 = jax.random.uniform(k4, (n, 224, 224), dtype=jnp.float32)
    # Module init: self.fc.weight.data.fill_(1 / 3136)
    fc_weight = jnp.full((3136,), 1.0 / 3136.0, dtype=jnp.float32)

    sc1, sc2 = compare_object_size(segm1, depth1, segm2, depth2, fc_weight,
                                   depth_square)
    sc1, sc2 = jax.block_until_ready((sc1, sc2))

    ref1 = _reference(segm1, depth1, fc_weight, depth_square)
    ref2 = _reference(segm2, depth2, fc_weight, depth_square)
    assert jnp.allclose(sc1, ref1, atol=1e-5, rtol=1e-5), (sc1, ref1)
    assert jnp.allclose(sc2, ref2, atol=1e-5, rtol=1e-5), (sc2, ref2)

    print("KERNEL_OK")
</pallas_src>

<mosaic_0001>
module attributes {stable_mosaic.version = 11 : i64} {
  func.func @_compare_object_size_kernel(%arg0: i32, %arg1: memref<1x224x224xf32, #tpu.memory_space<vmem>>, %arg2: memref<1x224x224xf32, #tpu.memory_space<vmem>>, %arg3: memref<1x224x224xf32, #tpu.memory_space<vmem>>, %arg4: memref<1x224x224xf32, #tpu.memory_space<vmem>>, %arg5: memref<56x56xf32, #tpu.memory_space<vmem>>, %arg6: memref<1x8x128xf32, #tpu.memory_space<vmem>>, %arg7: memref<1x8x128xf32, #tpu.memory_space<vmem>>) attributes {dimension_semantics = [#tpu.dimension_semantics<parallel>], iteration_bounds = array<i64: 2>, scalar_prefetch = 0 : i64, scratch_operands = 0 : i64, tpu.core_type = #tpu.core_type<tc>, window_params = [{transform_indices = @transform_0, window_bounds = array<i64: 1, 224, 224>}, {transform_indices = @transform_1, window_bounds = array<i64: 1, 224, 224>}, {transform_indices = @transform_2, window_bounds = array<i64: 1, 224, 224>}, {transform_indices = @transform_3, window_bounds = array<i64: 1, 224, 224>}, {pipeline_mode = #tpu.pipeline_mode<synchronous>, transform_indices = @transform_4, window_bounds = array<i64: 56, 56>}, {transform_indices = @transform_5, window_bounds = array<i64: 1, 8, 128>}, {transform_indices = @transform_6, window_bounds = array<i64: 1, 8, 128>}]} {
    %0 = tpu.iota {dimensions = array<i32: 0>} : vector<56x224xi32>
    %1 = tpu.iota {dimensions = array<i32: 1>} : vector<56x224xi32>
    %c4_i32 = arith.constant 4 : i32
    %2 = vector.broadcast %c4_i32 : i32 to vector<56x224xi32>
    %3 = arith.muli %2, %0 : vector<56x224xi32>
    %c0_i32 = arith.constant 0 : i32
    %4 = vector.broadcast %c0_i32 : i32 to vector<56x224xi32>
    %5 = arith.addi %3, %4 : vector<56x224xi32>
    %6 = arith.cmpi eq, %1, %5 : vector<56x224xi32>
    %7 = arith.extui %6 : vector<56x224xi1> to vector<56x224xi32>
    %8 = arith.sitofp %7 : vector<56x224xi32> to vector<56x224xf32>
    %c4_i32_0 = arith.constant 4 : i32
    %9 = vector.broadcast %c4_i32_0 : i32 to vector<56x224xi32>
    %10 = arith.muli %9, %0 : vector<56x224xi32>
    %c1_i32 = arith.constant 1 : i32
    %11 = vector.broadcast %c1_i32 : i32 to vector<56x224xi32>
    %12 = arith.addi %10, %11 : vector<56x224xi32>
    %13 = arith.cmpi eq, %1, %12 : vector<56x224xi32>
    %14 = arith.extui %13 : vector<56x224xi1> to vector<56x224xi32>
    %15 = arith.sitofp %14 : vector<56x224xi32> to vector<56x224xf32>
    %c4_i32_1 = arith.constant 4 : i32
    %16 = vector.broadcast %c4_i32_1 : i32 to vector<56x224xi32>
    %17 = arith.muli %16, %0 : vector<56x224xi32>
    %c2_i32 = arith.constant 2 : i32
    %18 = vector.broadcast %c2_i32 : i32 to vector<56x224xi32>
    %19 = arith.addi %17, %18 : vector<56x224xi32>
    %20 = arith.cmpi eq, %1, %19 : vector<56x224xi32>
    %21 = arith.extui %20 : vector<56x224xi1> to vector<56x224xi32>
    %22 = arith.sitofp %21 : vector<56x224xi32> to vector<56x224xf32>
    %c4_i32_2 = arith.constant 4 : i32
    %23 = vector.broadcast %c4_i32_2 : i32 to vector<56x224xi32>
    %24 = arith.muli %23, %0 : vector<56x224xi32>
    %c3_i32 = arith.constant 3 : i32
    %25 = vector.broadcast %c3_i32 : i32 to vector<56x224xi32>
    %26 = arith.addi %24, %25 : vector<56x224xi32>
    %27 = arith.cmpi eq, %1, %26 : vector<56x224xi32>
    %28 = arith.extui %27 : vector<56x224xi1> to vector<56x224xi32>
    %29 = arith.sitofp %28 : vector<56x224xi32> to vector<56x224xf32>
    %c0 = arith.constant 0 : index
    %c0_3 = arith.constant 0 : index
    %30 = vector.load %arg5[%c0, %c0_3] : memref<56x56xf32, #tpu.memory_space<vmem>>, vector<56x56xf32>
    %c0_4 = arith.constant 0 : index
    %c0_5 = arith.constant 0 : index
    %c0_6 = arith.constant 0 : index
    %31 = vector.load %arg1[%c0_4, %c0_5, %c0_6] : memref<1x224x224xf32, #tpu.memory_space<vmem>>, vector<1x224x224xf32>
    %32 = vector.shape_cast %31 : vector<1x224x224xf32> to vector<224x224xf32>
    %c0_7 = arith.constant 0 : index
    %c0_8 = arith.constant 0 : index
    %c0_9 = arith.constant 0 : index
    %33 = vector.load %arg2[%c0_7, %c0_8, %c0_9] : memref<1x224x224xf32, #tpu.memory_space<vmem>>, vector<1x224x224xf32>
    %34 = vector.shape_cast %33 : vector<1x224x224xf32> to vector<224x224xf32>
    %35 = arith.mulf %34, %34 : vector<224x224xf32>
    %36 = arith.mulf %32, %35 : vector<224x224xf32>
    %cst = arith.constant dense<0.000000e+00> : vector<56x224xf32>
    %37 = tpu.matmul %8, %36, %cst {dimension_numbers = #tpu.dot_dimension_numbers<[1], [0], [0], [1], [0, 0, 1, 1], [], []>} : vector<56x224xf32>, vector<224x224xf32>, vector<56x224xf32> -> vector<56x224xf32>
    %cst_10 = arith.constant dense<0.000000e+00> : vector<56x224xf32>
    %38 = tpu.matmul %15, %36, %cst_10 {dimension_numbers = #tpu.dot_dimension_numbers<[1], [0], [0], [1], [0, 0, 1, 1], [], []>} : vector<56x224xf32>, vector<224x224xf32>, vector<56x224xf32> -> vector<56x224xf32>
    %39 = arith.maximumf %37, %38 : vector<56x224xf32>
    %cst_11 = arith.constant dense<0.000000e+00> : vector<56x224xf32>
    %40 = tpu.matmul %22, %36, %cst_11 {dimension_numbers = #tpu.dot_dimension_numbers<[1], [0], [0], [1], [0, 0, 1, 1], [], []>} : vector<56x224xf32>, vector<224x224xf32>, vector<56x224xf32> -> vector<56x224xf32>
    %41 = arith.maximumf %39, %40 : vector<56x224xf32>
    %cst_12 = arith.constant dense<0.000000e+00> : vector<56x224xf32>
    %42 = tpu.matmul %29, %36, %cst_12 {dimension_numbers = #tpu.dot_dimension_numbers<[1], [0], [0], [1], [0, 0, 1, 1], [], []>} : vector<56x224xf32>, vector<224x224xf32>, vector<56x224xf32> -> vector<56x224xf32>
    %43 = arith.maximumf %41, %42 : vector<56x224xf32>
    "tpu.trace_start"() <{level = 10 : i32, message = "pa,qa->pq"}> : () -> ()
    %cst_13 = arith.constant dense<0.000000e+00> : vector<56x56xf32>
    %44 = tpu.matmul %43, %8, %cst_13 {dimension_numbers = #tpu.dot_dimension_numbers<[1], [1], [0], [0], [0, 0, 1, 0], [], []>} : vector<56x224xf32>, vector<56x224xf32>, vector<56x56xf32> -> vector<56x56xf32>
    %cst_14 = arith.constant dense<0.000000e+00> : vector<56x56xf32>
    %45 = tpu.matmul %43, %15, %cst_14 {dimension_numbers = #tpu.dot_dimension_numbers<[1], [1], [0], [0], [0, 0, 1, 0], [], []>} : vector<56x224xf32>, vector<56x224xf32>, vector<56x56xf32> -> vector<56x56xf32>
    "tpu.trace_stop"() : () -> ()
    %46 = arith.maximumf %44, %45 : vector<56x56xf32>
    "tpu.trace_start"() <{level = 10 : i32, message = "pa,qa->pq"}> : () -> ()
    %cst_15 = arith.constant dense<0.000000e+00> : vector<56x56xf32>
    %47 = tpu.matmul %43, %22, %cst_15 {dimension_numbers = #tpu.dot_dimension_numbers<[1], [1], [0], [0], [0, 0, 1, 0], [], []>} : vector<56x224xf32>, vector<56x224xf32>, vector<56x56xf32> -> vector<56x56xf32>
    "tpu.trace_stop"() : () -> ()
    %48 = arith.maximumf %46, %47 : vector<56x56xf32>
    "tpu.trace_start"() <{level = 10 : i32, message = "pa,qa->pq"}> : () -> ()
    %cst_16 = arith.constant dense<0.000000e+00> : vector<56x56xf32>
    %49 = tpu.matmul %43, %29, %cst_16 {dimension_numbers = #tpu.dot_dimension_numbers<[1], [1], [0], [0], [0, 0, 1, 0], [], []>} : vector<56x224xf32>, vector<56x224xf32>, vector<56x56xf32> -> vector<56x56xf32>
    "tpu.trace_stop"() : () -> ()
    %50 = arith.maximumf %48, %49 : vector<56x56xf32>
    %51 = arith.mulf %50, %30 : vector<56x56xf32>
    %52 = vector.shape_cast %51 : vector<56x56xf32> to vector<1x56x56xf32>
    %cst_17 = arith.constant dense<0.000000e+00> : vector<1xf32>
    %53 = vector.multi_reduction <add>, %52, %cst_17 [1, 2] : vector<1x56x56xf32> to vector<1xf32>
    %54 = vector.shape_cast %53 : vector<1xf32> to vector<1x1x1xf32>
    %55 = vector.extract %54[0, 0, 0] : f32 from vector<1x1x1xf32>
    %56 = vector.broadcast %55 : f32 to vector<1x8x128xf32>
    %c0_18 = arith.constant 0 : index
    %c0_19 = arith.constant 0 : index
    %c0_20 = arith.constant 0 : index
    %57 = vector.load %arg6[%c0_18, %c0_19, %c0_20] : memref<1x8x128xf32, #tpu.memory_space<vmem>>, vector<1x8x128xf32>
    tpu.vector_store %arg6[%c0_18, %c0_19, %c0_20], %56 {strides = array<i32>} : memref<1x8x128xf32, #tpu.memory_space<vmem>>, vector<1x8x128xf32>,
    %c0_21 = arith.constant 0 : index
    %c0_22 = arith.constant 0 : index
    %c0_23 = arith.constant 0 : index
    %58 = vector.load %arg3[%c0_21, %c0_22, %c0_23] : memref<1x224x224xf32, #tpu.memory_space<vmem>>, vector<1x224x224xf32>
    %59 = vector.shape_cast %58 : vector<1x224x224xf32> to vector<224x224xf32>
    %c0_24 = arith.constant 0 : index
    %c0_25 = arith.constant 0 : index
    %c0_26 = arith.constant 0 : index
    %60 = vector.load %arg4[%c0_24, %c0_25, %c0_26] : memref<1x224x224xf32, #tpu.memory_space<vmem>>, vector<1x224x224xf32>
    %61 = vector.shape_cast %60 : vector<1x224x224xf32> to vector<224x224xf32>
    %62 = arith.mulf %61, %61 : vector<224x224xf32>
    %63 = arith.mulf %59, %62 : vector<224x224xf32>
    %cst_27 = arith.constant dense<0.000000e+00> : vector<56x224xf32>
    %64 = tpu.matmul %8, %63, %cst_27 {dimension_numbers = #tpu.dot_dimension_numbers<[1], [0], [0], [1], [0, 0, 1, 1], [], []>} : vector<56x224xf32>, vector<224x224xf32>, vector<56x224xf32> -> vector<56x224xf32>
    %cst_28 = arith.constant dense<0.000000e+00> : vector<56x224xf32>
    %65 = tpu.matmul %15, %63, %cst_28 {dimension_numbers = #tpu.dot_dimension_numbers<[1], [0], [0], [1], [0, 0, 1, 1], [], []>} : vector<56x224xf32>, vector<224x224xf32>, vector<56x224xf32> -> vector<56x224xf32>
    %66 = arith.maximumf %64, %65 : vector<56x224xf32>
    %cst_29 = arith.constant dense<0.000000e+00> : vector<56x224xf32>
    %67 = tpu.matmul %22, %63, %cst_29 {dimension_numbers = #tpu.dot_dimension_numbers<[1], [0], [0], [1], [0, 0, 1, 1], [], []>} : vector<56x224xf32>, vector<224x224xf32>, vector<56x224xf32> -> vector<56x224xf32>
    %68 = arith.maximumf %66, %67 : vector<56x224xf32>
    %cst_30 = arith.constant dense<0.000000e+00> : vector<56x224xf32>
    %69 = tpu.matmul %29, %63, %cst_30 {dimension_numbers = #tpu.dot_dimension_numbers<[1], [0], [0], [1], [0, 0, 1, 1], [], []>} : vector<56x224xf32>, vector<224x224xf32>, vector<56x224xf32> -> vector<56x224xf32>
    %70 = arith.maximumf %68, %69 : vector<56x224xf32>
    "tpu.trace_start"() <{level = 10 : i32, message = "pa,qa->pq"}> : () -> ()
    %cst_31 = arith.constant dense<0.000000e+00> : vector<56x56xf32>
    %71 = tpu.matmul %70, %8, %cst_31 {dimension_numbers = #tpu.dot_dimension_numbers<[1], [1], [0], [0], [0, 0, 1, 0], [], []>} : vector<56x224xf32>, vector<56x224xf32>, vector<56x56xf32> -> vector<56x56xf32>
    %cst_32 = arith.constant dense<0.000000e+00> : vector<56x56xf32>
    %72 = tpu.matmul %70, %15, %cst_32 {dimension_numbers = #tpu.dot_dimension_numbers<[1], [1], [0], [0], [0, 0, 1, 0], [], []>} : vector<56x224xf32>, vector<56x224xf32>, vector<56x56xf32> -> vector<56x56xf32>
    "tpu.trace_stop"() : () -> ()
    %73 = arith.maximumf %71, %72 : vector<56x56xf32>
    "tpu.trace_start"() <{level = 10 : i32, message = "pa,qa->pq"}> : () -> ()
    %cst_33 = arith.constant dense<0.000000e+00> : vector<56x56xf32>
    %74 = tpu.matmul %70, %22, %cst_33 {dimension_numbers = #tpu.dot_dimension_numbers<[1], [1], [0], [0], [0, 0, 1, 0], [], []>} : vector<56x224xf32>, vector<56x224xf32>, vector<56x56xf32> -> vector<56x56xf32>
    "tpu.trace_stop"() : () -> ()
    %75 = arith.maximumf %73, %74 : vector<56x56xf32>
    "tpu.trace_start"() <{level = 10 : i32, message = "pa,qa->pq"}> : () -> ()
    %cst_34 = arith.constant dense<0.000000e+00> : vector<56x56xf32>
    %76 = tpu.matmul %70, %29, %cst_34 {dimension_numbers = #tpu.dot_dimension_numbers<[1], [1], [0], [0], [0, 0, 1, 0], [], []>} : vector<56x224xf32>, vector<56x224xf32>, vector<56x56xf32> -> vector<56x56xf32>
    "tpu.trace_stop"() : () -> ()
    %77 = arith.maximumf %75, %76 : vector<56x56xf32>
    %78 = arith.mulf %77, %30 : vector<56x56xf32>
    %79 = vector.shape_cast %78 : vector<56x56xf32> to vector<1x56x56xf32>
    %cst_35 = arith.constant dense<0.000000e+00> : vector<1xf32>
    %80 = vector.multi_reduction <add>, %79, %cst_35 [1, 2] : vector<1x56x56xf32> to vector<1xf32>
    %81 = vector.shape_cast %80 : vector<1xf32> to vector<1x1x1xf32>
    %82 = vector.extract %81[0, 0, 0] : f32 from vector<1x1x1xf32>
    %83 = vector.broadcast %82 : f32 to vector<1x8x128xf32>
    %c0_36 = arith.constant 0 : index
    %c0_37 = arith.constant 0 : index
    %c0_38 = arith.constant 0 : index
    %84 = vector.load %arg7[%c0_36, %c0_37, %c0_38] : memref<1x8x128xf32, #tpu.memory_space<vmem>>, vector<1x8x128xf32>
    tpu.vector_store %arg7[%c0_36, %c0_37, %c0_38], %83 {strides = array<i32>} : memref<1x8x128xf32, #tpu.memory_space<vmem>>, vector<1x8x128xf32>,
    return
  }
  func.func @transform_0(%arg0: i32) -> (i32, i32, i32) {
    %c0_i32 = arith.constant 0 : i32
    %c0_i32_0 = arith.constant 0 : i32
    %c0_i32_1 = arith.constant 0 : i32
    return %arg0, %c0_i32, %c0_i32_0 : i32, i32, i32
  }
  func.func @transform_1(%arg0: i32) -> (i32, i32, i32) {
    %c0_i32 = arith.constant 0 : i32
    %c0_i32_0 = arith.constant 0 : i32
    %c0_i32_1 = arith.constant 0 : i32
    return %arg0, %c0_i32, %c0_i32_0 : i32, i32, i32
  }
  func.func @transform_2(%arg0: i32) -> (i32, i32, i32) {
    %c0_i32 = arith.constant 0 : i32
    %c0_i32_0 = arith.constant 0 : i32
    %c0_i32_1 = arith.constant 0 : i32
    return %arg0, %c0_i32, %c0_i32_0 : i32, i32, i32
  }
  func.func @transform_3(%arg0: i32) -> (i32, i32, i32) {
    %c0_i32 = arith.constant 0 : i32
    %c0_i32_0 = arith.constant 0 : i32
    %c0_i32_1 = arith.constant 0 : i32
    return %arg0, %c0_i32, %c0_i32_0 : i32, i32, i32
  }
  func.func @transform_4(%arg0: i32) -> (i32, i32) {
    %c0_i32 = arith.constant 0 : i32
    %c0_i32_0 = arith.constant 0 : i32
    %c0_i32_1 = arith.constant 0 : i32
    return %c0_i32, %c0_i32_0 : i32, i32
  }
  func.func @transform_5(%arg0: i32) -> (i32, i32, i32) {
    %c0_i32 = arith.constant 0 : i32
    %c0_i32_0 = arith.constant 0 : i32
    %c0_i32_1 = arith.constant 0 : i32
    return %arg0, %c0_i32, %c0_i32_0 : i32, i32, i32
  }
  func.func @transform_6(%arg0: i32) -> (i32, i32, i32) {
    %c0_i32 = arith.constant 0 : i32
    %c0_i32_0 = arith.constant 0 : i32
    %c0_i32_1 = arith.constant 0 : i32
    return %arg0, %c0_i32, %c0_i32_0 : i32, i32, i32
  }
}

</mosaic_0001>

<bundles_post_ra>
// kernel: tpu_custom_call.1
= control target key start
LH: loop header
LB: loop body
LE: loop exit
PB: predicated region body
PF: predicated region fallthrough
CT: control target
= control target key end

     0   :  { %s6880_s0 = inlined_call_operand.hbm [shape: f32[2,224,224], index: 0, kind: input, shape index: {}]   ;;  %s6881_s1 = inlined_call_operand.hbm [shape: f32[2,224,224], index: 1, kind: input, shape index: {}]   ;;  %s6882_s2 = inlined_call_operand.hbm [shape: f32[2,224,224], index: 2, kind: input, shape index: {}]   ;;  %s6883_s3 = inlined_call_operand.hbm [shape: f32[2,224,224], index: 3, kind: input, shape index: {}]   ;;  %s6884_s4 = inlined_call_operand.hbm [shape: f32[56,56], index: 4, kind: input, shape index: {}]   ;;  %s6885_s5 = inlined_call_operand.hbm [shape: f32[2,8,128], index: 5, kind: output, shape index: {0}]   ;;  %s6886_s6 = inlined_call_operand.hbm [shape: f32[2,8,128], index: 6, kind: output, shape index: {1}]  }
   0x1   :  { %7003 = sst [smem:[#allocation87_spill]] %s6881_s1 }
   0x2   :  { %7004 = sst [smem:[#allocation88_spill]] %s6884_s4 }
   0x3   :  { %12 = vsyncpa [#allocation3], 0 }
   0x4   :  { %14 = vsyncpa [#allocation3 + $0x1], 0 }
   0x5   :  { %15 = vsyncpa [#allocation6], 0 }
   0x6   :  { %17 = vsyncpa [#allocation6 + $0x1], 0 }
   0x7   :  { %18 = vsyncpa [#allocation9], 0 }
   0x8   :  { %20 = vsyncpa [#allocation9 + $0x1], 0 }
   0x9   :  { %21 = vsyncpa [#allocation4], 0 }
   0xa   :  { %23 = vsyncpa [#allocation4 + $0x1], 0 }
   0xb   :  { %24 = vsyncpa [#allocation13], 0 }
   0xc   :  { %26 = vsyncpa [#allocation13 + $0x1], 0  ;;  %s4583_s21 = smov 0   ;;  %s4585_s22 = smov 0  }
   0xd   :  { %s4587_s23 = smov 0   ;;  %s4589_s24 = smov 0  }
   0xe LB: > { %s4604_s25 = sadd.s32 4294967295, %s4532_s24   ;;  %s3255_s26 = sadd.s32 4294967294, %s4532_s24   ;;  %s4532_s24 = sphi %s4589_s24, %s7245_s24   ;;  %s4528_s23 = sphi %s4587_s23, %s7249_s23   ;;  %s4524_s22 = sphi %s4585_s22, %s7248_s22   ;;  %s4520_s21 = sphi %s4583_s21, %s7247_s21  }
   0xf   : > { %s4608_s27 = sadd.s32 1, %s4532_s24   ;;  %s39_s28 = sadd.s32 1, %s4528_s23 }
  0x10   : > { %7005 = sst [smem:[#allocation20_spill]] %s4608_s27  ;;  %s36_s29 = ssub.s32 %s4532_s24, %s4608_s27 }
  0x11   : > { %p46_p0 = scmp.ne.s32.totalorder %s4528_s23, %s4524_s22  ;;  %p37_p1 = scmp.eq.s32.totalorder %s36_s29, 0 }
  0x12   : > { %p47_p2 = scmp.eq.s32.totalorder %s4532_s24, 0  ;;  %p52_p3 = scmp.ne.s32.totalorder %s4524_s22, %s4520_s21 }
  0x13   : > { %p6887_p4 = scmp.eq.s32.totalorder %s4604_s25, 0  ;;  %p175_p7 = scmp.eq.s32.totalorder %s4604_s25, 1 }
  0x14   : > { %s4620_s30 = scalar_select %p37_p1, %s4528_s23, %s39_s28  }
  0x15   : > { %p4622_p5 = por %p47_p2, %p46_p0  ;;  %p4628_p6 = por %p6887_p4, %p52_p3 }
  0x16   : > { %7006 = sst [smem:[#allocation21_spill]] %s4620_s30  ;;  %p181_p8 = scmp.eq.s32.totalorder %s3255_s26, 1 }
  0x17   : > { %s7007_s7 = scalar_select %p4622_p5, 1, 0 }
  0x18   : > { %s7008_s8 = scalar_select %p4628_p6, 1, 0 }
  0x19   : > { %p3256_p9 = scmp.ge.s32.totalorder %s4532_s24, 1  ;;  %p214_p10 = scmp.lt.s32.totalorder %s4532_s24, 3 }
  0x1a   : > { %p4635_p11 = por %p175_p7, %p46_p0  ;;  %p4639_p12 = por %p181_p8, %p52_p3 }
  0x1b   : > { %p4643_p13 = pnand %p3256_p9, %p214_p10  ;;  %s4534_s12 = smov [#allocation10]  }
  0x1c   : > { %s7009_s9 = scalar_select %p4635_p11, 1, 0 }
  0x1d   : > { %s7010_s10 = scalar_select %p4639_p12, 1, 0 }
  0x1e   : > { %s7011_s11 = scalar_select %p4643_p13, 1, 0 }
  0x1f   : > { %p4206_p1 = pneg %p4643_p13  ;;  %s226_s13 = sshll.u32 %s4534_s12, 4  ;;  %s227_s13 = int_to_ptr.vmem [resolvable:$true] %s226_s13 }
  0x20   : > { %s6891_s15 = sand.u32 1, %s4528_s23   ;;  %s7013_s4 = sld [smem:[#allocation88_spill]] }
  0x21   : > { %p4651_p2 = pnand %p4206_p1, %p6887_p4  ;;  %s4660_s16 = smul.u32 448, %s6891_s15 }
  0x23   : > { %p4276_p8 = pneg %p4651_p2 }
  0x26   : > { %s4274_s19 = scalar_lea.hbm %s7013_s4, 896 }
  0x27   : > { %p4275_p7 = scmp.ne.s32.totalorder %s7013_s4, %s4274_s19  ;;  %p4281_p1 = scmp.lt.u32.totalorder %s4274_s19, %s7013_s4 }
  0x29   : > { %p4277_p9 = pnand %p4276_p8, %p4275_p7 }
  0x2b   : > { %p4278_p10 = pneg %p4277_p9 }
  0x2d   : > { %p4283_p0 = pnand %p4281_p1, %p4278_p10 }
  0x2f   : > { %4286 = shalt.err (!%p4283_p0)
}
  0x30   : > { %s4287_s12 = scalar_lea.vmem %s227_s13, 896  ;;  %p4295_p11 = scmp.lt.s32.totalorder %s227_s13, %s227_s13 }
  0x31   : > { %p4288_p4 = scmp.ne.s32.totalorder %s227_s13, %s4287_s12  ;;  %p4296_p6 = scmp.lt.s32.totalorder %s4287_s12, %s4287_s12 }
  0x33   : > { %p4290_p3 = pnand %p4288_p4, %p4276_p8  ;;  %p4297_p13 = por %p4296_p6, %p4295_p11 }
  0x35   : > { %p4291_p12 = pneg %p4290_p3 }
  0x37   : > { %p4298_p5 = pnand %p4297_p13, %p4291_p12 }
  0x39   : > { %4301 = shalt.err (!%p4298_p5)
}
  0x3a   : > { %s4535_s17 = smov 128   ;;  %s4536_s18 = smov 8  }
  0x3b   : > { %4209 = dma.hbm_to_vmem [thread:$0]  (!%p4651_p2), %s7013_s4, 896, %s227_s13, [#allocation9], %s4535_s17, %s4535_s17, %s4536_s18  }
  0x3c   : > { %s4679_s26 = smul.u32 7168, %s4532_s24  ;;  %p7014_p4 = scmp.ne.s32.totalorder %s7007_s7, 0 }
  0x3d   : > { %p7015_p6 = scmp.lt.s32.totalorder %s4532_s24, 2  ;;  %s6892_s29 = sand.u32 1, %s4532_s24  }
  0x3e   : > { %s7017_s1 = sld [smem:[#allocation87_spill]]  ;;  %s265_s13 = scalar_lea.vmem [#allocation5], %s4660_s16 }
  0x3f   : > { %p4685_p5 = pnand %p7015_p6, %p7014_p4  ;;  %s272_s14 = sshll.u32 %s265_s13, 4  ;;  %s4697_s14 = int_to_ptr.vmem [resolvable:$true] %s272_s14 }
  0x40   : > { %s4701_s7 = scalar_lea.sflag [#allocation6], %s6892_s29 }
  0x41   : > { %p4707_p12 = pneg %p4685_p5 }
  0x44   : > { %s4694_s30 = scalar_lea.hbm %s7017_s1, %s4679_s26  ;;  %s4307_s20 = scalar_lea.hbm %s7017_s1, 14336 }
  0x45   : > { %s4302_s17 = scalar_lea.hbm %s4694_s30, 7168  ;;  %p4308_p0 = scmp.lt.u32.totalorder %s4694_s30, %s7017_s1 }
  0x46   : > { %p4303_p11 = scmp.ne.s32.totalorder %s4694_s30, %s4302_s17  ;;  %p4309_p3 = scmp.lt.u32.totalorder %s4307_s20, %s4302_s17 }
  0x47   : > { %p4311_p8 = scmp.lt.u32.totalorder %s4302_s17, %s4694_s30 }
  0x48   : > { %p4305_p13 = pnand %p4707_p12, %p4303_p11  ;;  %p4310_p7 = por %p4309_p3, %p4308_p0 }
  0x4a   : > { %p4306_p2 = pneg %p4305_p13  ;;  %p4312_p9 = por %p4311_p8, %p4310_p7 }
  0x4c   : > { %p4313_p10 = pnand %p4312_p9, %p4306_p2 }
  0x4e   : > { %4316 = shalt.err (!%p4313_p10)
}
  0x4f   : > { %s4317_s29 = scalar_lea.vmem %s4697_s14, 7168  ;;  %s4537_s15 = smov [#allocation5]  }
  0x50   : > { %p4318_p1 = scmp.ne.s32.totalorder %s4697_s14, %s4317_s29  ;;  %s4322_s19 = sshll.u32 %s4537_s15, 4  ;;  %s4323_s19 = int_to_ptr.vmem [resolvable:$false] %s4322_s19 }
  0x51   : > { %s4324_s12 = scalar_lea.vmem %s4323_s19, 14336  ;;  %p4325_p11 = scmp.lt.s32.totalorder %s4697_s14, %s4323_s19 }
  0x52   : > { %p4320_p4 = pnand %p4318_p1, %p4707_p12  ;;  %p4326_p13 = scmp.lt.s32.totalorder %s4324_s12, %s4317_s29 }
  0x54   : > { %p4321_p6 = pneg %p4320_p4  ;;  %p4327_p0 = por %p4326_p13, %p4325_p11 }
  0x56   : > { %p4328_p3 = pnand %p4327_p0, %p4321_p6 }
  0x58   : > { %4331 = shalt.err (!%p4328_p3)
}
  0x59   : > { %s6895_s17 = smov 256   ;;  %s4539_s20 = smov 16  }
  0x5a   : > { %4216 = dma.hbm_to_vmem [thread:$0]  (!%p4685_p5), %s4694_s30, 7168, %s4697_s14, %s4701_s7, %s6895_s17, %s6895_s17, %s4539_s20  }
  0x5b   : > { %s4738_s15 = scalar_lea.hbm %s6880_s0, %s4679_s26  ;;  %s244_s19 = scalar_lea.vmem [#allocation2], %s4660_s16 }
  0x5c   : > { %s251_s12 = sshll.u32 %s244_s19, 4  ;;  %s7019_s1 = sand.u32 1, %s4528_s23   ;;  %s4741_s12 = int_to_ptr.vmem [resolvable:$true] %s251_s12 }
  0x5d   : > { %s4745_s4 = scalar_lea.sflag [#allocation3], %s7019_s1  ;;  %s4332_s27 = scalar_lea.hbm %s4738_s15, 7168 }
  0x5e   : > { %p4333_p2 = scmp.ne.s32.totalorder %s4738_s15, %s4332_s27  ;;  %s4337_s13 = scalar_lea.hbm %s6880_s0, 14336 }
  0x5f   : > { %p4338_p9 = scmp.lt.u32.totalorder %s4738_s15, %s6880_s0  ;;  %p4339_p10 = scmp.lt.u32.totalorder %s4337_s13, %s4332_s27 }
  0x60   : > { %p4335_p7 = pnand %p4333_p2, %p4707_p12  ;;  %p4341_p4 = scmp.lt.u32.totalorder %s4332_s27, %s4738_s15 }
  0x61   : > { %p4340_p1 = por %p4339_p10, %p4338_p9 }
  0x62   : > { %p4336_p8 = pneg %p4335_p7 }
  0x63   : > { %p4342_p6 = por %p4341_p4, %p4340_p1 }
  0x65   : > { %p4343_p11 = pnand %p4342_p6, %p4336_p8 }
  0x67   : > { %4346 = shalt.err (!%p4343_p11)
}
  0x68   : > { %s4347_s1 = scalar_lea.vmem %s4741_s12, 7168  ;;  %s4540_s19 = smov [#allocation2]  }
  0x69   : > { %p4348_p13 = scmp.ne.s32.totalorder %s4741_s12, %s4347_s1  ;;  %s4352_s30 = sshll.u32 %s4540_s19, 4  ;;  %s4353_s30 = int_to_ptr.vmem [resolvable:$false] %s4352_s30 }
  0x6a   : > { %s4354_s17 = scalar_lea.vmem %s4353_s30, 14336  ;;  %p4355_p2 = scmp.lt.s32.totalorder %s4741_s12, %s4353_s30 }
  0x6b   : > { %p4350_p0 = pnand %p4348_p13, %p4707_p12  ;;  %p4356_p7 = scmp.lt.s32.totalorder %s4354_s17, %s4347_s1 }
  0x6d   : > { %p4351_p3 = pneg %p4350_p0  ;;  %p4357_p9 = por %p4356_p7, %p4355_p2 }
  0x6f   : > { %p4358_p10 = pnand %p4357_p9, %p4351_p3 }
  0x71   : > { %4361 = shalt.err (!%p4358_p10)
}
  0x72   : > { %s7020_s27 = smov 256   ;;  %s4776_s29 = scalar_lea.hbm %s6882_s2, %s4679_s26 }
  0x73   : > { %4213 = dma.hbm_to_vmem [thread:$0]  (!%p4685_p5), %s4738_s15, 7168, %s4741_s12, %s4745_s4, %s7020_s27, %s7020_s27, %s4539_s20  }
  0x74   : > { %s286_s1 = scalar_lea.vmem [#allocation7], %s4660_s16  ;;  %s4362_s30 = scalar_lea.hbm %s4776_s29, 7168 }
  0x75   : > { %s293_s19 = sshll.u32 %s286_s1, 4  ;;  %p4363_p8 = scmp.ne.s32.totalorder %s4776_s29, %s4362_s30  ;;  %s4779_s19 = int_to_ptr.vmem [resolvable:$true] %s293_s19 }
  0x76   : > { %s4367_s15 = scalar_lea.hbm %s6882_s2, 14336  ;;  %p4368_p6 = scmp.lt.u32.totalorder %s4776_s29, %s6882_s2 }
  0x77   : > { %p4365_p1 = pnand %p4363_p8, %p4707_p12  ;;  %p4369_p11 = scmp.lt.u32.totalorder %s4367_s15, %s4362_s30 }
  0x78   : > { %p4371_p0 = scmp.lt.u32.totalorder %s4362_s30, %s4776_s29 }
  0x79   : > { %p4366_p4 = pneg %p4365_p1  ;;  %p4370_p13 = por %p4369_p11, %p4368_p6 }
  0x7b   : > { %p4372_p3 = por %p4371_p0, %p4370_p13 }
  0x7d   : > { %p4373_p2 = pnand %p4372_p3, %p4366_p4 }
  0x7f   : > { %4376 = shalt.err (!%p4373_p2)
}
  0x80   : > { %s4377_s13 = scalar_lea.vmem %s4779_s19, 7168  ;;  %s4541_s1 = smov [#allocation7]  }
  0x81   : > { %p4378_p7 = scmp.ne.s32.totalorder %s4779_s19, %s4377_s13  ;;  %s4382_s17 = sshll.u32 %s4541_s1, 4  ;;  %s4383_s17 = int_to_ptr.vmem [resolvable:$false] %s4382_s17 }
  0x82   : > { %s4384_s4 = scalar_lea.vmem %s4383_s17, 14336  ;;  %p4385_p8 = scmp.lt.s32.totalorder %s4779_s19, %s4383_s17 }
  0x83   : > { %p4380_p9 = pnand %p4378_p7, %p4707_p12  ;;  %p4386_p1 = scmp.lt.s32.totalorder %s4384_s4, %s4377_s13 }
  0x85   : > { %p4381_p10 = pneg %p4380_p9  ;;  %p4387_p6 = por %p4386_p1, %p4385_p8 }
  0x87   : > { %p4388_p11 = pnand %p4387_p6, %p4381_p10 }
  0x89   : > { %4391 = shalt.err (!%p4388_p11)
}
  0x8a   : > { %4219 = dma.hbm_to_vmem [thread:$0]  (!%p4685_p5), %s4776_s29, 7168, %s4779_s19, %s4701_s7, %s7020_s27, %s7020_s27, %s4539_s20  }
  0x8b   : > { %s4810_s12 = scalar_lea.hbm %s6883_s3, %s4679_s26  ;;  %s307_s14 = scalar_lea.vmem [#allocation8], %s4660_s16 }
  0x8c   : > { %s314_s13 = sshll.u32 %s307_s14, 4  ;;  %s7021_s1 = sand.u32 1, %s4532_s24   ;;  %s4813_s13 = int_to_ptr.vmem [resolvable:$true] %s314_s13 }
  0x8d   : > { %s4817_s17 = scalar_lea.sflag [#allocation9], %s7021_s1  ;;  %s4392_s4 = scalar_lea.hbm %s4810_s12, 7168 }
  0x8e   : > { %p4393_p4 = scmp.ne.s32.totalorder %s4810_s12, %s4392_s4  ;;  %s4397_s26 = scalar_lea.hbm %s6883_s3, 14336 }
  0x8f   : > { %p4398_p3 = scmp.lt.u32.totalorder %s4810_s12, %s6883_s3  ;;  %p4399_p2 = scmp.lt.u32.totalorder %s4397_s26, %s4392_s4 }
  0x90   : > { %p4395_p13 = pnand %p4393_p4, %p4707_p12  ;;  %p4401_p9 = scmp.lt.u32.totalorder %s4392_s4, %s4810_s12 }
  0x91   : > { %p4400_p7 = por %p4399_p2, %p4398_p3 }
  0x92   : > { %p4396_p0 = pneg %p4395_p13 }
  0x93   : > { %p4402_p10 = por %p4401_p9, %p4400_p7 }
  0x95   : > { %p4403_p8 = pnand %p4402_p10, %p4396_p0 }
  0x97   : > { %4406 = shalt.err (!%p4403_p8)
}
  0x98   : > { %s4407_s16 = scalar_lea.vmem %s4813_s13, 7168  ;;  %s4542_s15 = smov [#allocation8]  }
  0x99   : > { %p4408_p1 = scmp.ne.s32.totalorder %s4813_s13, %s4407_s16  ;;  %s4412_s14 = sshll.u32 %s4542_s15, 4  ;;  %s4413_s14 = int_to_ptr.vmem [resolvable:$false] %s4412_s14 }
  0x9a   : > { %s4414_s1 = scalar_lea.vmem %s4413_s14, 14336  ;;  %p4415_p4 = scmp.lt.s32.totalorder %s4813_s13, %s4413_s14 }
  0x9b   : > { %p4410_p6 = pnand %p4408_p1, %p4707_p12  ;;  %p4416_p13 = scmp.lt.s32.totalorder %s4414_s1, %s4407_s16 }
  0x9d   : > { %p4411_p11 = pneg %p4410_p6  ;;  %p4417_p3 = por %p4416_p13, %p4415_p4 }
  0x9f   : > { %p4418_p2 = pnand %p4417_p3, %p4411_p11 }
  0xa1   : > { %4421 = shalt.err (!%p4418_p2)
}
  0xa2   : > { %4222 = dma.hbm_to_vmem [thread:$0]  (!%p4685_p5), %s4810_s12, 7168, %s4813_s13, %s4817_s17, %s7020_s27, %s7020_s27, %s4539_s20  }
  0xa3   : > { %p7022_p12 = scmp.ne.s32.totalorder %s7011_s11, 0 }
  0xa5   : > { %326 = sbr.rel (%p7022_p12) target bundleno = 1375 (0x55f), region = 40 }
  0xac   : > { %s4847_s18 = sand.u32 1, %s4524_s22   ;;  %p7023_p0 = scmp.ne.s32.totalorder %s7008_s8, 0 }
  0xad   : > { %s4185_s4 = smul.u32 448, %s4847_s18  ;;  %s329_s7 = scalar_lea.sflag [#allocation3], %s4847_s18 }
  0xaf   : > { %s4851_s29 = scalar_lea.vmem [#allocation2], %s4185_s4 }
  0xb0   : > { %4495 = dma.done.wait (%p7023_p0), %s329_s7, 7168  }
  0xb1   : > { %4497 = vsyncadd (%p7023_p0), %s329_s7, 4294960128  ;;  %s337_s28 = sand.u32 1, %s4604_s25   ;;  %s4858_s20 = scalar_lea.vmem [#allocation5], %s4185_s4 }
  0xb2   : > { %s338_s11 = scalar_lea.sflag [#allocation6], %s337_s28 }
  0xb3   : > { %4499 = dma.done.wait (%p7023_p0), %s338_s11, 14336  }
  0xb4   : > { %4501 = vsyncadd (%p7023_p0), %s338_s11, 4294952960  ;;  %s4864_s27 = scalar_lea.vmem [#allocation7], %s4185_s4  ;;  %s356_s12 = scalar_lea.sflag [#allocation9], %s337_s28 }
  0xb5   : > { %s4866_s13 = scalar_lea.vmem [#allocation8], %s4185_s4 }
  0xb6   : > { %4503 = dma.done.wait (%p7023_p0), %s356_s12, 7168  }
  0xb7   : > { %4505 = vsyncadd (%p7023_p0), %s356_s12, 4294960128  ;;  %p7024_p5 = scmp.eq.s32.totalorder %s4604_s25, 0 }
  0xb9   : > { %4507 = dma.done.wait (%p7024_p5), [#allocation9], 896   ;;  %p7025_p7 = pmov %p7024_p5 }
  0xba   : > { %v412_v0 = vlaneseq  ;;  %vm850_vm0 = vcmask 785408   ;;  %v627_v6 = vld [vmem:[%s4851_s29 + $0x8] sm:$0xff]  ;;  %v629_v7 = vld [vmem:[%s4851_s29 + $0x18] sm:$0xff]  ;;  %v4543_v9 = vmov 0.0   ;;  %v626_v13 = vld [vmem:[%s4851_s29] sm:$0xff]  ;;  %s3265_s8 = sshll.u32 %s4847_s18, 3 }
  0xbb   : > { %4509 = vsyncadd (%p7025_p7), [#allocation9], 4294966400  ;;  %v683_v8 = vld [vmem:[%s4858_s20 + $0x8] sm:$0xff]  ;;  %v685_v11 = vld [vmem:[%s4858_s20 + $0x18] sm:$0xff]  ;;  %s6785_s26 = scalar_lea.vmem [#allocation11], %s3265_s8  ;;  %s3605_s19 = sshll.u32 %s4604_s25, 7 }
  0xbc   : > { %v4876_v1 = vshrl.u32 %v412_v0, 7  ;;  %v4878_v2 = vand.u32 127, %v412_v0  ;;  %v739_v12 = vmul.f32 %v683_v8, %v683_v8  ;;  %v628_v14 = vld [vmem:[%s4851_s29 + $0x10] sm:$0xff]  ;;  %v741_v15 = vmul.f32 %v685_v11, %v685_v11  ;;  %v682_v16 = vld [vmem:[%s4858_s20] sm:$0xff]  ;;  %v631_v18 = vld [vmem:[%s4851_s29 + $0x28] sm:$0xff]  ;;  %s6808_s15 = scalar_lea.hbm %s6885_s5, %s3605_s19  ;;  %s3065_s14 = sshll.u32 %s6785_s26, 4  ;;  %s3066_s14 = int_to_ptr.vmem [resolvable:$true] %s3065_s14 }
  0xbd   : > { %v684_v17 = vld [vmem:[%s4858_s20 + $0x10] sm:$0xff]  ;;  %v738_v21 = vmul.f32 %v682_v16, %v682_v16  ;;  %v633_v23 = vld [vmem:[%s4851_s29 + $0x38] sm:$0xff]  ;;  %v687_v24 = vld [vmem:[%s4858_s20 + $0x28] sm:$0xff]  ;;  %s3047_s1 = scalar_lea.sflag [#allocation4], %s4847_s18  ;;  %s4422_s4 = scalar_lea.vmem %s3066_s14, 128 }
  0xbe   : > { %v4881_v3 = vadd.s32 128, %v4878_v2  ;;  %v4884_v4 = vmul.u32 4, %v4876_v1  ;;  %v795_v20 = vmul.f32 %v739_v12, %v627_v6  ;;  %v740_v22 = vmul.f32 %v684_v17, %v684_v17  ;;  %v689_v25 = vld [vmem:[%s4858_s20 + $0x38] sm:$0xff]  ;;  %v630_v29 = vld [vmem:[%s4851_s29 + $0x20] sm:$0xff]  ;;  %v632_v30 = vld [vmem:[%s4851_s29 + $0x30] sm:$0xff]  ;;  %p4423_p9 = scmp.ne.s32.totalorder %s3066_s14, %s4422_s4  ;;  %p7242_p10 = scmp.ne.s32.totalorder %s7009_s9, 0 }
  0xbf   : > { %v797_v26 = vmul.f32 %v741_v15, %v629_v7  ;;  %v743_v27 = vmul.f32 %v687_v24, %v687_v24  ;;  %v745_v28 = vmul.f32 %v689_v25, %v689_v25  ;;  %v686_v31 = vld [vmem:[%s4858_s20 + $0x20] sm:$0xff]  ;;  %v794_v32 = vmul.f32 %v738_v21, %v626_v13  ;;  %v688_v34 = vld [vmem:[%s4858_s20 + $0x30] sm:$0xff]  ;;  %v635_v36 = vld [vmem:[%s4851_s29 + $0x48] sm:$0xff]  ;;  %s4546_s7 = smov [#allocation11]  }
  0xc0   : > { %7026 = vst [vmem:[#allocation22_spill] sm:$0xff] %v4884_v4  ;;  %vm431_vm1 = vcmp.eq.s32.totalorder %v4881_v3, %v4884_v4  ;;  %v4889_v5 = vadd.s32 1, %v4884_v4  ;;  %v796_v33 = vmul.f32 %v740_v22, %v628_v14  ;;  %v742_v35 = vmul.f32 %v686_v31, %v686_v31  ;;  %v637_v37 = vld [vmem:[%s4851_s29 + $0x58] sm:$0xff]  ;;  %v691_v42 = vld [vmem:[%s4858_s20 + $0x48] sm:$0xff]  ;;  %v634_v44 = vld [vmem:[%s4851_s29 + $0x40] sm:$0xff]  ;;  %p4424_p8 = pnand %p4423_p9, %p7242_p10 }
  0xc1   : > { %v4895_v10 = vsel %vm431_vm1, 1.0, %v4543_v9  ;;  %v4921_v38 = vpack.c.bf16 %v797_v26, %v795_v20  ;;  %v799_v39 = vmul.f32 %v743_v27, %v631_v18  ;;  %v801_v40 = vmul.f32 %v745_v28, %v633_v23  ;;  %v693_v43 = vld [vmem:[%s4858_s20 + $0x58] sm:$0xff]  ;;  %v636_v49 = vld [vmem:[%s4851_s29 + $0x50] sm:$0xff]  ;;  %v690_v50 = vld [vmem:[%s4858_s20 + $0x40] sm:$0xff] }
  0xc2   : > { %7027 = vst [vmem:[#allocation23_spill] sm:$0xff] %v4889_v5  ;;  %3323 = vmatprep.mubr.msk.f32.mxu0 %vm850_vm0, %v4895_v10  ;;  %vm480_vm2 = vcmp.eq.s32.totalorder %v4881_v3, %v4889_v5  ;;  %v744_v41 = vmul.f32 %v688_v34, %v688_v34  ;;  %v4926_v45 = vpack.c.bf16 %v796_v33, %v794_v32  ;;  %v692_v51 = vld [vmem:[%s4858_s20 + $0x50] sm:$0xff]  ;;  %v639_v55 = vld [vmem:[%s4851_s29 + $0x68] sm:$0xff]  ;;  %v641_v56 = vld [vmem:[%s4851_s29 + $0x78] sm:$0xff]  ;;  %p4425_p1 = pneg %p4424_p8 }
  0xc3   : > { %v4908_v19 = vsel %vm480_vm2, 1.0, %v4543_v9  ;;  %v798_v46 = vmul.f32 %v742_v35, %v630_v29  ;;  %v747_v47 = vmul.f32 %v691_v42, %v691_v42  ;;  %v749_v48 = vmul.f32 %v693_v43, %v693_v43  ;;  %3610 = vmatprep.subr.bf16.mxu0 %v4921_v38  ;;  %3666 = vmatprep.subr.bf16.mxu1 %v4921_v38  ;;  %v695_v57 = vld [vmem:[%s4858_s20 + $0x68] sm:$0xff]  ;;  %v697_v61 = vld [vmem:[%s4858_s20 + $0x78] sm:$0xff]  ;;  %v638_v62 = vld [vmem:[%s4851_s29 + $0x60] sm:$0xff] }
  0xc4   : > { %3337 = vmatprep.mubr.msk.f32.mxu1 %vm850_vm0, %v4908_v19  ;;  %v4933_v52 = vpack.c.bf16 %v801_v40, %v799_v39  ;;  %v800_v53 = vmul.f32 %v744_v41, %v632_v30  ;;  %v746_v54 = vmul.f32 %v690_v50, %v690_v50  ;;  %3612 = vmatpush1.bf16.msra.mxu0 %v4926_v45  ;;  %v640_v63 = vld [vmem:[%s4851_s29 + $0x70] sm:$0xff]  ;;  %v694_v8 = vld [vmem:[%s4858_s20 + $0x60] sm:$0xff]  ;;  %v643_v12 = vld [vmem:[%s4851_s29 + $0x88] sm:$0xff] }
  0xc5   : > { %3668 = vmatpush1.bf16.msra.mxu1 %v4926_v45  ;;  %v803_v58 = vmul.f32 %v747_v47, %v635_v36  ;;  %v805_v59 = vmul.f32 %v749_v48, %v637_v37  ;;  %v748_v60 = vmul.f32 %v692_v51, %v692_v51  ;;  %v751_v7 = vmul.f32 %v695_v57, %v695_v57  ;;  %v696_v11 = vld [vmem:[%s4858_s20 + $0x70] sm:$0xff]  ;;  %v645_v17 = vld [vmem:[%s4851_s29 + $0x98] sm:$0xff]  ;;  %v699_v18 = vld [vmem:[%s4858_s20 + $0x88] sm:$0xff] }
  0xc6   : > { %3614 = vmatprep.subr.bf16.mxu0 %v4933_v52  ;;  %3670 = vmatprep.subr.bf16.mxu1 %v4933_v52  ;;  %v4945_v0 = vpack.c.bf16 %v800_v53, %v798_v46  ;;  %v802_v6 = vmul.f32 %v746_v54, %v634_v44  ;;  %v753_v15 = vmul.f32 %v697_v61, %v697_v61  ;;  %v701_v20 = vld [vmem:[%s4858_s20 + $0x98] sm:$0xff]  ;;  %v698_v25 = vld [vmem:[%s4858_s20 + $0x80] sm:$0xff]  ;;  %v644_v30 = vld [vmem:[%s4851_s29 + $0x90] sm:$0xff] }
  0xc7   : > { %v4950_v13 = vpack.c.bf16 %v805_v59, %v803_v58  ;;  %v804_v14 = vmul.f32 %v748_v60, %v636_v49  ;;  %v750_v16 = vmul.f32 %v694_v8, %v694_v8  ;;  %v807_v21 = vmul.f32 %v751_v7, %v639_v55  ;;  %v642_v29 = vld [vmem:[%s4851_s29 + $0x80] sm:$0xff]  ;;  %v700_v31 = vld [vmem:[%s4858_s20 + $0x90] sm:$0xff]  ;;  %v647_v35 = vld [vmem:[%s4851_s29 + $0xa8] sm:$0xff] }
  0xc8   : > { %v752_v22 = vmul.f32 %v696_v11, %v696_v11  ;;  %v755_v23 = vmul.f32 %v699_v18, %v699_v18  ;;  %v757_v24 = vmul.f32 %v701_v20, %v701_v20  ;;  %3616 = vmatpush1.bf16.msra.mxu0 %v4945_v0  ;;  %v809_v27 = vmul.f32 %v753_v15, %v641_v56  ;;  %v703_v36 = vld [vmem:[%s4858_s20 + $0xa8] sm:$0xff]  ;;  %v705_v37 = vld [vmem:[%s4858_s20 + $0xb8] sm:$0xff]  ;;  %v702_v44 = vld [vmem:[%s4858_s20 + $0xa0] sm:$0xff] }
  0xc9   : > { %3672 = vmatpush1.bf16.msra.mxu1 %v4945_v0  ;;  %v4958_v26 = vpack.c.bf16 %v804_v14, %v802_v6  ;;  %v806_v28 = vmul.f32 %v750_v16, %v638_v62  ;;  %3618 = vmatprep.subr.bf16.mxu0 %v4950_v13  ;;  %v754_v40 = vmul.f32 %v698_v25, %v698_v25  ;;  %v649_v42 = vld [vmem:[%s4851_s29 + $0xb8] sm:$0xff]  ;;  %v704_v46 = vld [vmem:[%s4858_s20 + $0xb0] sm:$0xff]  ;;  %v707_v50 = vld [vmem:[%s4858_s20 + $0xc8] sm:$0xff] }
  0xca   : > { %3674 = vmatprep.subr.bf16.mxu1 %v4950_v13  ;;  %v808_v32 = vmul.f32 %v752_v22, %v640_v63  ;;  %v811_v33 = vmul.f32 %v755_v23, %v643_v12  ;;  %v813_v34 = vmul.f32 %v757_v24, %v645_v17  ;;  %v4968_v39 = vpack.c.bf16 %v809_v27, %v807_v21  ;;  %v646_v55 = vld [vmem:[%s4851_s29 + $0xa0] sm:$0xff]  ;;  %v648_v56 = vld [vmem:[%s4851_s29 + $0xb0] sm:$0xff]  ;;  %v709_v57 = vld [vmem:[%s4858_s20 + $0xd8] sm:$0xff] }
  0xcb   : > { %v756_v41 = vmul.f32 %v700_v31, %v700_v31  ;;  %v759_v43 = vmul.f32 %v703_v36, %v703_v36  ;;  %v761_v48 = vmul.f32 %v705_v37, %v705_v37  ;;  %v758_v49 = vmul.f32 %v702_v44, %v702_v44  ;;  %v651_v61 = vld [vmem:[%s4851_s29 + $0xc8] sm:$0xff]  ;;  %v706_v62 = vld [vmem:[%s4858_s20 + $0xc0] sm:$0xff]  ;;  %v708_v63 = vld [vmem:[%s4858_s20 + $0xd0] sm:$0xff] }
  0xcc   : > { %v4973_v47 = vpack.c.bf16 %v808_v32, %v806_v28  ;;  %3620 = vmatpush1.bf16.msra.mxu0 %v4958_v26  ;;  %v810_v51 = vmul.f32 %v754_v40, %v642_v29  ;;  %v4983_v58 = vpack.c.bf16 %v813_v34, %v811_v33  ;;  %v760_v60 = vmul.f32 %v704_v46, %v704_v46  ;;  %v653_v6 = vld [vmem:[%s4851_s29 + $0xd8] sm:$0xff]  ;;  %v711_v12 = vld [vmem:[%s4858_s20 + $0xe8] sm:$0xff]  ;;  %v650_v17 = vld [vmem:[%s4851_s29 + $0xc0] sm:$0xff] }
  0xcd   : > { %3676 = vmatpush1.bf16.msra.mxu1 %v4958_v26  ;;  %v812_v53 = vmul.f32 %v756_v41, %v644_v30  ;;  %v815_v54 = vmul.f32 %v759_v43, %v647_v35  ;;  %3622 = vmatprep.subr.bf16.mxu0 %v4968_v39  ;;  %v817_v59 = vmul.f32 %v761_v48, %v649_v42  ;;  %v713_v14 = vld [vmem:[%s4858_s20 + $0xf8] sm:$0xff]  ;;  %v652_v18 = vld [vmem:[%s4851_s29 + $0xd0] sm:$0xff]  ;;  %v710_v24 = vld [vmem:[%s4858_s20 + $0xe0] sm:$0xff] }
  0xce   : > { %3678 = vmatprep.subr.bf16.mxu1 %v4968_v39  ;;  %v763_v7 = vmul.f32 %v707_v50, %v707_v50  ;;  %v765_v8 = vmul.f32 %v709_v57, %v709_v57  ;;  %v762_v11 = vmul.f32 %v706_v62, %v706_v62  ;;  %v814_v16 = vmul.f32 %v758_v49, %v646_v55  ;;  %v712_v25 = vld [vmem:[%s4858_s20 + $0xf0] sm:$0xff]  ;;  %v715_v30 = vld [vmem:[%s4858_s20 + $0x108] sm:$0xff]  ;;  %v717_v31 = vld [vmem:[%s4858_s20 + $0x118] sm:$0xff] }
  0xcf   : > { %v4991_v15 = vpack.c.bf16 %v812_v53, %v810_v51  ;;  %v764_v20 = vmul.f32 %v708_v63, %v708_v63  ;;  %v4997_v21 = vpack.c.bf16 %v817_v59, %v815_v54  ;;  %v816_v22 = vmul.f32 %v760_v60, %v648_v56  ;;  %v655_v34 = vld [vmem:[%s4851_s29 + $0xe8] sm:$0xff]  ;;  %v657_v35 = vld [vmem:[%s4851_s29 + $0xf8] sm:$0xff]  ;;  %v654_v36 = vld [vmem:[%s4851_s29 + $0xe0] sm:$0xff] }
  0xd0   : > { %3624 = vmatpush1.bf16.msra.mxu0 %v4973_v47  ;;  %v767_v23 = vmul.f32 %v711_v12, %v711_v12  ;;  %v819_v27 = vmul.f32 %v763_v7, %v651_v61  ;;  %v821_v28 = vmul.f32 %v765_v8, %v653_v6  ;;  %v769_v29 = vmul.f32 %v713_v14, %v713_v14  ;;  %v656_v43 = vld [vmem:[%s4851_s29 + $0xf0] sm:$0xff]  ;;  %v659_v44 = vld [vmem:[%s4851_s29 + $0x108] sm:$0xff]  ;;  %v714_v48 = vld [vmem:[%s4858_s20 + $0x100] sm:$0xff] }
  0xd1   : > { %3680 = vmatpush1.bf16.msra.mxu1 %v4973_v47  ;;  %3626 = vmatprep.subr.bf16.mxu0 %v4983_v58  ;;  %v818_v32 = vmul.f32 %v762_v11, %v650_v17  ;;  %v820_v33 = vmul.f32 %v764_v20, %v652_v18  ;;  %v766_v37 = vmul.f32 %v710_v24, %v710_v24  ;;  %v661_v53 = vld [vmem:[%s4851_s29 + $0x118] sm:$0xff]  ;;  %v716_v54 = vld [vmem:[%s4858_s20 + $0x110] sm:$0xff]  ;;  %v719_v55 = vld [vmem:[%s4858_s20 + $0x128] sm:$0xff] }
  0xd2   : > { %3682 = vmatprep.subr.bf16.mxu1 %v4983_v58  ;;  %v768_v40 = vmul.f32 %v712_v25, %v712_v25  ;;  %v771_v41 = vmul.f32 %v715_v30, %v715_v30  ;;  %v5010_v42 = vpack.c.bf16 %v816_v22, %v814_v16  ;;  %v773_v46 = vmul.f32 %v717_v31, %v717_v31  ;;  %v721_v57 = vld [vmem:[%s4858_s20 + $0x138] sm:$0xff]  ;;  %v718_v63 = vld [vmem:[%s4858_s20 + $0x120] sm:$0xff]  ;;  %v720_v6 = vld [vmem:[%s4858_s20 + $0x130] sm:$0xff] }
  0xd3   : > { %v5017_v49 = vpack.c.bf16 %v821_v28, %v819_v27  ;;  %v823_v50 = vmul.f32 %v767_v23, %v655_v34  ;;  %v825_v51 = vmul.f32 %v769_v29, %v657_v35  ;;  %v5022_v56 = vpack.c.bf16 %v820_v33, %v818_v32  ;;  %v658_v8 = vld [vmem:[%s4851_s29 + $0x100] sm:$0xff]  ;;  %v660_v16 = vld [vmem:[%s4851_s29 + $0x110] sm:$0xff]  ;;  %v663_v17 = vld [vmem:[%s4851_s29 + $0x128] sm:$0xff] }
  0xd4   : > { %3628 = vmatpush1.bf16.msra.mxu0 %v4991_v15  ;;  %v822_v59 = vmul.f32 %v766_v37, %v654_v36  ;;  %v824_v60 = vmul.f32 %v768_v40, %v656_v43  ;;  %v827_v61 = vmul.f32 %v771_v41, %v659_v44  ;;  %v770_v62 = vmul.f32 %v714_v48, %v714_v48  ;;  %v665_v20 = vld [vmem:[%s4851_s29 + $0x138] sm:$0xff]  ;;  %v723_v24 = vld [vmem:[%s4858_s20 + $0x148] sm:$0xff]  ;;  %v662_v29 = vld [vmem:[%s4851_s29 + $0x120] sm:$0xff] }
  0xd5   : > { %3684 = vmatpush1.bf16.msra.mxu1 %v4991_v15  ;;  %3630 = vmatprep.subr.bf16.mxu0 %v4997_v21  ;;  %v829_v7 = vmul.f32 %v773_v46, %v661_v53  ;;  %v772_v11 = vmul.f32 %v716_v54, %v716_v54  ;;  %v775_v12 = vmul.f32 %v719_v55, %v719_v55  ;;  %v725_v25 = vld [vmem:[%s4858_s20 + $0x158] sm:$0xff]  ;;  %v664_v30 = vld [vmem:[%s4851_s29 + $0x130] sm:$0xff]  ;;  %v722_v34 = vld [vmem:[%s4858_s20 + $0x140] sm:$0xff] }
  0xd6   : > { %3686 = vmatprep.subr.bf16.mxu1 %v4997_v21  ;;  %v5032_v14 = vpack.c.bf16 %v825_v51, %v823_v50  ;;  %v777_v18 = vmul.f32 %v721_v57, %v721_v57  ;;  %v774_v22 = vmul.f32 %v718_v63, %v718_v63  ;;  %v776_v23 = vmul.f32 %v720_v6, %v720_v6  ;;  %v724_v35 = vld [vmem:[%s4858_s20 + $0x150] sm:$0xff]  ;;  %v727_v41 = vld [vmem:[%s4858_s20 + $0x168] sm:$0xff]  ;;  %v729_v43 = vld [vmem:[%s4858_s20 + $0x178] sm:$0xff] }
  0xd7   : > { %v5039_v27 = vpack.c.bf16 %v824_v60, %v822_v59  ;;  %v826_v28 = vmul.f32 %v770_v62, %v658_v8  ;;  %v5045_v31 = vpack.c.bf16 %v829_v7, %v827_v61  ;;  %v828_v32 = vmul.f32 %v772_v11, %v660_v16  ;;  %v667_v48 = vld [vmem:[%s4851_s29 + $0x148] sm:$0xff]  ;;  %v669_v50 = vld [vmem:[%s4851_s29 + $0x158] sm:$0xff]  ;;  %v666_v51 = vld [vmem:[%s4851_s29 + $0x140] sm:$0xff] }
  0xd8   : > { %3632 = vmatpush1.bf16.msra.mxu0 %v5010_v42  ;;  %v831_v33 = vmul.f32 %v775_v12, %v663_v17  ;;  %v833_v36 = vmul.f32 %v777_v18, %v665_v20  ;;  %v779_v37 = vmul.f32 %v723_v24, %v723_v24  ;;  %v781_v40 = vmul.f32 %v725_v25, %v725_v25  ;;  %v668_v57 = vld [vmem:[%s4851_s29 + $0x150] sm:$0xff]  ;;  %v726_v61 = vld [vmem:[%s4858_s20 + $0x160] sm:$0xff]  ;;  %v671_v8 = vld [vmem:[%s4851_s29 + $0x168] sm:$0xff] }
  0xd9   : > { %3688 = vmatpush1.bf16.msra.mxu1 %v5010_v42  ;;  %3634 = vmatprep.subr.bf16.mxu0 %v5017_v49  ;;  %v830_v44 = vmul.f32 %v774_v22, %v662_v29  ;;  %v832_v46 = vmul.f32 %v776_v23, %v664_v30  ;;  %v778_v53 = vmul.f32 %v722_v34, %v722_v34  ;;  %v728_v62 = vld [vmem:[%s4858_s20 + $0x170] sm:$0xff]  ;;  %v673_v11 = vld [vmem:[%s4851_s29 + $0x178] sm:$0xff]  ;;  %v731_v12 = vld [vmem:[%s4858_s20 + $0x188] sm:$0xff] }
  0xda   : > { %3690 = vmatprep.subr.bf16.mxu1 %v5017_v49  ;;  %v780_v54 = vmul.f32 %v724_v35, %v724_v35  ;;  %v5058_v55 = vpack.c.bf16 %v828_v32, %v826_v28  ;;  %v783_v59 = vmul.f32 %v727_v41, %v727_v41  ;;  %v785_v60 = vmul.f32 %v729_v43, %v729_v43  ;;  %v733_v17 = vld [vmem:[%s4858_s20 + $0x198] sm:$0xff]  ;;  %v670_v28 = vld [vmem:[%s4851_s29 + $0x160] sm:$0xff]  ;;  %v672_v29 = vld [vmem:[%s4851_s29 + $0x170] sm:$0xff] }
  0xdb   : > { %v5065_v63 = vpack.c.bf16 %v833_v36, %v831_v33  ;;  %v835_v6 = vmul.f32 %v779_v37, %v667_v48  ;;  %v837_v7 = vmul.f32 %v781_v40, %v669_v50  ;;  %v5070_v16 = vpack.c.bf16 %v832_v46, %v830_v44  ;;  %v730_v32 = vld [vmem:[%s4858_s20 + $0x180] sm:$0xff]  ;;  %v675_v34 = vld [vmem:[%s4851_s29 + $0x188] sm:$0xff]  ;;  %v732_v36 = vld [vmem:[%s4858_s20 + $0x190] sm:$0xff] }
  0xdc   : > { %3636 = vmatpush1.bf16.msra.mxu0 %v5022_v56  ;;  %v834_v18 = vmul.f32 %v778_v53, %v666_v51  ;;  %v836_v20 = vmul.f32 %v780_v54, %v668_v57  ;;  %v782_v22 = vmul.f32 %v726_v61, %v726_v61  ;;  %v784_v23 = vmul.f32 %v728_v62, %v728_v62  ;;  %v677_v37 = vld [vmem:[%s4851_s29 + $0x198] sm:$0xff]  ;;  %v735_v40 = vld [vmem:[%s4858_s20 + $0x1a8] sm:$0xff]  ;;  %v674_v53 = vld [vmem:[%s4851_s29 + $0x180] sm:$0xff] }
  0xdd   : > { %3692 = vmatpush1.bf16.msra.mxu1 %v5022_v56  ;;  %3638 = vmatprep.subr.bf16.mxu0 %v5032_v14  ;;  %v839_v24 = vmul.f32 %v783_v59, %v671_v8  ;;  %v841_v25 = vmul.f32 %v785_v60, %v673_v11  ;;  %v787_v30 = vmul.f32 %v731_v12, %v731_v12  ;;  %v737_v41 = vld [vmem:[%s4858_s20 + $0x1b8] sm:$0xff]  ;;  %v676_v59 = vld [vmem:[%s4851_s29 + $0x190] sm:$0xff]  ;;  %v734_v62 = vld [vmem:[%s4858_s20 + $0x1a0] sm:$0xff] }
  0xde   : > { %3694 = vmatprep.subr.bf16.mxu1 %v5032_v14  ;;  %v5080_v33 = vpack.c.bf16 %v837_v7, %v835_v6  ;;  %v789_v35 = vmul.f32 %v733_v17, %v733_v17  ;;  %v5087_v43 = vpack.c.bf16 %v836_v20, %v834_v18  ;;  %v838_v44 = vmul.f32 %v782_v22, %v670_v28  ;;  %v736_v6 = vld [vmem:[%s4858_s20 + $0x1b0] sm:$0xff]  ;;  %v679_v7 = vld [vmem:[%s4851_s29 + $0x1a8] sm:$0xff]  ;;  %v681_v8 = vld [vmem:[%s4851_s29 + $0x1b8] sm:$0xff] }
  0xdf   : > { %v840_v46 = vmul.f32 %v784_v23, %v672_v29  ;;  %v786_v48 = vmul.f32 %v730_v32, %v730_v32  ;;  %v5091_v50 = vpack.c.bf16 %v841_v25, %v839_v24  ;;  %v843_v51 = vmul.f32 %v787_v30, %v675_v34  ;;  %v678_v28 = vld [vmem:[%s4851_s29 + $0x1a0] sm:$0xff]  ;;  %v680_v29 = vld [vmem:[%s4851_s29 + $0x1b0] sm:$0xff]  ;;  %s4426_s29 = sshll.u32 %s4546_s7, 4  ;;  %s4427_s29 = int_to_ptr.vmem [resolvable:$false] %s4426_s29 }
  0xe0   : > { %3640 = vmatpush1.bf16.msra.mxu0 %v5039_v27  ;;  %v788_v54 = vmul.f32 %v732_v36, %v732_v36  ;;  %v845_v57 = vmul.f32 %v789_v35, %v677_v37  ;;  %v791_v60 = vmul.f32 %v735_v40, %v735_v40  ;;  %v793_v61 = vmul.f32 %v737_v41, %v737_v41  ;;  %s4428_s28 = scalar_lea.vmem %s4427_s29, 256  ;;  %p4429_p6 = scmp.lt.s32.totalorder %s3066_s14, %s4427_s29 }
  0xe1   : > { %3696 = vmatpush1.bf16.msra.mxu1 %v5039_v27  ;;  %3642 = vmatprep.subr.bf16.mxu0 %v5045_v31  ;;  %v5101_v11 = vpack.c.bf16 %v840_v46, %v838_v44  ;;  %v842_v12 = vmul.f32 %v786_v48, %v674_v53  ;;  %v790_v18 = vmul.f32 %v734_v62, %v734_v62  ;;  %v414_v22 = vadd.s32 8, %v4876_v1  ;;  %p4430_p11 = scmp.lt.s32.totalorder %s4428_s28, %s4422_s4 }
  0xe2   : > { %3698 = vmatprep.subr.bf16.mxu1 %v5045_v31  ;;  %v844_v17 = vmul.f32 %v788_v54, %v676_v59  ;;  %v792_v20 = vmul.f32 %v736_v6, %v736_v6  ;;  %v5108_v23 = vpack.c.bf16 %v845_v57, %v843_v51  ;;  %v847_v24 = vmul.f32 %v791_v60, %v679_v7 }
  0xe3   : > { %v849_v25 = vmul.f32 %v793_v61, %v681_v8  ;;  %v415_v30 = vadd.s32 16, %v4876_v1  ;;  %v846_v34 = vmul.f32 %v790_v18, %v678_v28  ;;  %v5117_v36 = vmul.u32 4, %v414_v22  ;;  %p4431_p4 = por %p4430_p11, %p4429_p6 }
  0xe4   : > { %3644 = vmatpush1.bf16.msra.mxu0 %v5058_v55  ;;  %v5115_v32 = vpack.c.bf16 %v844_v17, %v842_v12  ;;  %v848_v35 = vmul.f32 %v792_v20, %v680_v29  ;;  %v416_v40 = vadd.s32 24, %v4876_v1  ;;  %vm6973_vm3 = vcmp.eq.s32.totalorder %v4878_v2, %v4884_v4 }
  0xe5   : > { %3700 = vmatpush1.bf16.msra.mxu1 %v5058_v55  ;;  %3646 = vmatprep.subr.bf16.mxu0 %v5065_v63  ;;  %7028 = vst [vmem:[#allocation24_spill] sm:$0xff] %v5117_v36  ;;  %v5121_v37 = vpack.c.bf16 %v849_v25, %v847_v24  ;;  %v5129_v44 = vadd.s32 1, %v5117_v36  ;;  %v5131_v46 = vmul.u32 4, %v415_v30  ;;  %v417_v51 = vadd.s32 32, %v4876_v1  ;;  %p4432_p13 = pnand %p4431_p4, %p4425_p1 }
  0xe6   : > { %3702 = vmatprep.subr.bf16.mxu1 %v5065_v63  ;;  %v5126_v41 = vpack.c.bf16 %v848_v35, %v846_v34  ;;  %v5137_v48 = vmul.u32 4, %v416_v40  ;;  %vm6929_vm4 = vcmp.eq.s32.totalorder %v4878_v2, %v4889_v5  ;;  %vm433_vm5 = vcmp.eq.s32.totalorder %v4881_v3, %v5117_v36 }
  0xe7   : > { %7029 = vst [vmem:[#allocation25_spill] sm:$0xff] %v5129_v44  ;;  %7030 = vst [vmem:[#allocation26_spill] sm:$0xff] %v5131_v46  ;;  %vm482_vm6 = vcmp.eq.s32.totalorder %v4881_v3, %v5129_v44  ;;  %v5149_v53 = vadd.s32 1, %v5131_v46  ;;  %v418_v54 = vadd.s32 40, %v4876_v1  ;;  %v6912_v57 = vmov 1.0  }
  0xe8   : > { %3648 = vmatpush1.bf16.msra.mxu0 %v5070_v16  ;;  %7031 = vst [vmem:[#allocation27_spill] sm:$0xff] %v5137_v48  ;;  %v5163_v59 = vsel %vm433_vm5, 1.0, %v4543_v9  ;;  %v5166_v60 = vsel %vm482_vm6, 1.0, %v4543_v9  ;;  %vm6922_vm7 = vcmp.eq.s32.totalorder %v4878_v2, %v5117_v36  ;;  %vm6918_vm8 = vcmp.eq.s32.totalorder %v4878_v2, %v5129_v44 }
  0xe9   : > { %3704 = vmatpush1.bf16.msra.mxu1 %v5070_v16  ;;  %3650 = vmatprep.subr.bf16.mxu0 %v5080_v33  ;;  %7032 = vst [vmem:[#allocation28_spill] sm:$0xff] %v5149_v53  ;;  %7033 = vst [vmem:[#allocation29_spill] sm:$0xff] %v5163_v59  ;;  %vm435_vm9 = vcmp.eq.s32.totalorder %v4881_v3, %v5131_v46  ;;  %vm484_vm10 = vcmp.eq.s32.totalorder %v4881_v3, %v5149_v53  ;;  %v5181_v61 = vmul.u32 4, %v417_v51 }
  0xea   : > { %3706 = vmatprep.subr.bf16.mxu1 %v5080_v33  ;;  %7034 = vst [vmem:[#allocation30_spill] sm:$0xff] %v5166_v60  ;;  %v5202_v62 = vsel %vm484_vm10, 1.0, %v4543_v9  ;;  %vm6928_vm11 = vcmp.eq.s32.totalorder %v4878_v2, %v5131_v46  ;;  %vm6927_vm12 = vcmp.eq.s32.totalorder %v4878_v2, %v5149_v53  ;;  %vm437_vm13 = vcmp.eq.s32.totalorder %v4881_v3, %v5137_v48 }
  0xeb   : > { %7036 = vst [vmem:[#allocation32_spill] sm:$0xff] %v5181_v61  ;;  %7038 = vst [vmem:[#allocation34_spill] sm:$0xff] %v5202_v62  ;;  %v5217_v6 = vadd.s32 1, %v5181_v61  ;;  %vm6925_vm15 = vcmp.eq.s32.totalorder %v4878_v2, %v5137_v48  ;;  %vm439_vm2 = vcmp.eq.s32.totalorder %v4881_v3, %v5181_v61  ;;  %vm6972_vm6 = vcmp.eq.s32.totalorder %v4878_v2, %v5181_v61 }
  0xec   : > { %3652 = vmatpush1.bf16.msra.mxu0 %v5087_v43  ;;  %v5310_v17 = vadd.s32 2, %v4884_v4  ;;  %v5321_v18 = vadd.s32 3, %v4884_v4  ;;  %v5473_v20 = vadd.s32 3, %v5181_v61  ;;  %v5617_v40 = vpack.c.bf16 %v5166_v60, %v4908_v19 }
  0xed   : > { %3708 = vmatpush1.bf16.msra.mxu1 %v5087_v43  ;;  %3654 = vmatprep.subr.bf16.mxu0 %v5091_v50  ;;  %7040 = vst [vmem:[#allocation36_spill] sm:$0xff] %v5217_v6  ;;  %vm488_vm5 = vcmp.eq.s32.totalorder %v4881_v3, %v5217_v6 }
  0xee   : > { %3710 = vmatprep.subr.bf16.mxu1 %v5091_v50  ;;  %7057 = vst [vmem:[#allocation53_spill] sm:$0xff] %v5473_v20  ;;  %7068 = vst [vmem:[#allocation64_spill] sm:$0xff] %v5617_v40 }
  0xf0   : > { %3656 = vmatpush1.bf16.msra.mxu0 %v5101_v11 }
  0xf1   : > { %3712 = vmatpush1.bf16.msra.mxu1 %v5101_v11  ;;  %3658 = vmatprep.subr.bf16.mxu0 %v5108_v23 }
  0xf2   : > { %3714 = vmatprep.subr.bf16.mxu1 %v5108_v23 }
  0xf4   : > { %3660 = vmatpush1.bf16.msra.mxu0 %v5115_v32 }
  0xf5   : > { %3716 = vmatpush1.bf16.msra.mxu1 %v5115_v32  ;;  %3662 = vmatprep.subr.bf16.mxu0 %v5121_v37 }
  0xf6   : > { %3718 = vmatprep.subr.bf16.mxu1 %v5121_v37 }
  0xf8   : > { %3664 = vmatpush1.bf16.msra.mxu0 %v5126_v41 }
  0xf9   : > { %3720 = vmatpush1.bf16.msra.mxu1 %v5126_v41  ;;  %3722 = vmatprep.subr.bf16.mxu0 %v4921_v38 }
  0xfa   : > { %3778 = vmatprep.subr.bf16.mxu1 %v4921_v38  ;;  %v5171_v38 = vadd.s32 1, %v5137_v48 }
  0xfb   : > { %3324 = vmatmul.mubr.msk.f32.vlgmr.msra.gmra.mrb[0].mxu0 %vm6973_vm3, %v6912_v57 }
  0xfc   : > { %3338 = vmatmul.mubr.msk.f32.vlgmr.msra.gmra.mrb[0].mxu1 %vm6929_vm4, %v6912_v57  ;;  %7035 = vst [vmem:[#allocation31_spill] sm:$0xff] %v5171_v38  ;;  %3724 = vmatpush1.bf16.msra.mxu0 %v4926_v45  ;;  %vm486_vm14 = vcmp.eq.s32.totalorder %v4881_v3, %v5171_v38  ;;  %vm6924_vm1 = vcmp.eq.s32.totalorder %v4878_v2, %v5171_v38 }
  0xfd   : > { %3780 = vmatpush1.bf16.msra.mxu1 %v4926_v45  ;;  %3726 = vmatprep.subr.bf16.mxu0 %v4933_v52  ;;  %v419_v45 = vadd.s32 48, %v4876_v1  ;;  %v5206_v1 = vmul.u32 4, %v418_v54 }
  0xfe   : > { %3782 = vmatprep.subr.bf16.mxu1 %v4933_v52  ;;  %3325 = vmatprep.mubr.msk.f32.mxu0 %vm850_vm0, %v5163_v59  ;;  %v5199_v52 = vsel %vm435_vm9, 1.0, %v4543_v9  ;;  %vm6897_vm9 = vcmp.eq.s32.totalorder %v4878_v2, %v5217_v6 }
  0xff   : > { %3339 = vmatprep.mubr.msk.f32.mxu1 %vm850_vm0, %v5166_v60  ;;  %3326 = vmatmul.mubr.msk.f32.gmra.mrb[2].mxu0 %vm6922_vm7, %v6912_v57  ;;  %7037 = vst [vmem:[#allocation33_spill] sm:$0xff] %v5199_v52  ;;  %7039 = vst [vmem:[#allocation35_spill] sm:$0xff] %v5206_v1  ;;  %v5242_v7 = vadd.s32 1, %v5206_v1  ;;  %v5252_v8 = vmul.u32 4, %v419_v45  ;;  %vm441_vm10 = vcmp.eq.s32.totalorder %v4881_v3, %v5206_v1  ;;  %v5502_v24 = vadd.s32 2, %v5206_v1 }
 0x100   : > { %3340 = vmatmul.mubr.msk.f32.gmra.mrb[2].mxu1 %vm6918_vm8, %v6912_v57  ;;  %3728 = vmatpush1.bf16.msra.mxu0 %v4945_v0  ;;  %v5505_v25 = vadd.s32 3, %v5206_v1  ;;  %v7073_v45 = vmov 0 }
 0x101   : > { %3784 = vmatpush1.bf16.msra.mxu1 %v4945_v0  ;;  %3730 = vmatprep.subr.bf16.mxu0 %v4950_v13  ;;  %v5234_v0 = vsel %vm437_vm13, 1.0, %v4543_v9  ;;  %7043 = vst [vmem:[#allocation39_spill] sm:$0xff] %v5242_v7  ;;  %7044 = vst [vmem:[#allocation40_spill] sm:$0xff] %v5252_v8  ;;  %vm490_vm13 = vcmp.eq.s32.totalorder %v4881_v3, %v5242_v7  ;;  %v5285_v12 = vadd.s32 1, %v5252_v8  ;;  %v5534_v30 = vadd.s32 2, %v5252_v8 }
 0x102   : > { %3786 = vmatprep.subr.bf16.mxu1 %v4950_v13  ;;  %3327 = vmatprep.mubr.msk.f32.mxu0 %vm850_vm0, %v5199_v52  ;;  %7041 = vst [vmem:[#allocation37_spill] sm:$0xff] %v5234_v0  ;;  %v5237_v13 = vsel %vm486_vm14, 1.0, %v4543_v9  ;;  %vm6898_vm14 = vcmp.eq.s32.totalorder %v4878_v2, %v5206_v1  ;;  %7058 = vst [vmem:[#allocation54_spill] sm:$0xff] %v5502_v24  ;;  %v5627_v51 = vpack.c.bf16 %v5234_v0, %v5199_v52 }
 0x103   : > { %3341 = vmatprep.mubr.msk.f32.mxu1 %vm850_vm0, %v5202_v62  ;;  %3328 = vmatmul.mubr.msk.f32.gmra.mrb[4].mxu0 %vm6928_vm11, %v6912_v57  ;;  %7042 = vst [vmem:[#allocation38_spill] sm:$0xff] %v5237_v13  ;;  %7047 = vst [vmem:[#allocation43_spill] sm:$0xff] %v5285_v12  ;;  %v5637_v54 = vpack.c.bf16 %v5237_v13, %v5202_v62 }
 0x104   : > { %3342 = vmatmul.mubr.msk.f32.gmra.mrb[4].mxu1 %vm6927_vm12, %v6912_v57  ;;  %3732 = vmatpush1.bf16.msra.mxu0 %v4958_v26  ;;  %7059 = vst [vmem:[#allocation55_spill] sm:$0xff] %v5505_v25  ;;  %7061 = vst [vmem:[#allocation57_spill] sm:$0xff] %v5534_v30 }
 0x105   : > { %3788 = vmatpush1.bf16.msra.mxu1 %v4958_v26  ;;  %3734 = vmatprep.subr.bf16.mxu0 %v4968_v39  ;;  %v5269_v26 = vsel %vm439_vm2, 1.0, %v4543_v9  ;;  %vm6901_vm2 = vcmp.eq.s32.totalorder %v4878_v2, %v5242_v7  ;;  %7071 = vst [vmem:[#allocation65_spill] sm:$0xff] %v5627_v51  ;;  %7072 = vst [vmem:[#allocation66_spill] sm:$0xff] %v5637_v54 }
 0x106   : > { %3790 = vmatprep.subr.bf16.mxu1 %v4968_v39  ;;  %3329 = vmatprep.mubr.msk.f32.mxu0 %vm850_vm0, %v5234_v0  ;;  %7045 = vst [vmem:[#allocation41_spill] sm:$0xff] %v5269_v26  ;;  %v5272_v39 = vsel %vm488_vm5, 1.0, %v4543_v9  ;;  %vm443_vm5 = vcmp.eq.s32.totalorder %v4881_v3, %v5252_v8 }
 0x107   : > { %3343 = vmatprep.mubr.msk.f32.mxu1 %vm850_vm0, %v5237_v13  ;;  %3330 = vmatmul.mubr.msk.f32.gmra.mrb[6].mxu0 %vm6925_vm15, %v6912_v57  ;;  %7046 = vst [vmem:[#allocation42_spill] sm:$0xff] %v5272_v39 }
 0x108   : > { %3344 = vmatmul.mubr.msk.f32.gmra.mrb[6].mxu1 %vm6924_vm1, %v6912_v57  ;;  %3736 = vmatpush1.bf16.msra.mxu0 %v4973_v47 }
 0x109   : > { %3792 = vmatpush1.bf16.msra.mxu1 %v4973_v47  ;;  %3738 = vmatprep.subr.bf16.mxu0 %v4983_v58  ;;  %v5302_v47 = vsel %vm441_vm10, 1.0, %v4543_v9  ;;  %vm492_vm10 = vcmp.eq.s32.totalorder %v4881_v3, %v5285_v12 }
 0x10a   : > { %3794 = vmatprep.subr.bf16.mxu1 %v4983_v58  ;;  %3331 = vmatprep.mubr.msk.f32.mxu0 %vm850_vm0, %v5269_v26  ;;  %7048 = vst [vmem:[#allocation44_spill] sm:$0xff] %v5302_v47  ;;  %v5305_v58 = vsel %vm490_vm13, 1.0, %v4543_v9  ;;  %vm6900_vm13 = vcmp.eq.s32.totalorder %v4878_v2, %v5252_v8 }
 0x10b   : > { %3345 = vmatprep.mubr.msk.f32.mxu1 %vm850_vm0, %v5272_v39  ;;  %3332 = vmatmul.mubr.msk.f32.gmra.mrb[8].mxu0 %vm6972_vm6, %v6912_v57  ;;  %7049 = vst [vmem:[#allocation45_spill] sm:$0xff] %v5305_v58 }
 0x10c   : > { %3346 = vmatmul.mubr.msk.f32.gmra.mrb[8].mxu1 %vm6897_vm9, %v6912_v57  ;;  %3740 = vmatpush1.bf16.msra.mxu0 %v4991_v15  ;;  %vm6899_vm9 = vcmp.eq.s32.totalorder %v4878_v2, %v5285_v12 }
 0x10d   : > { %3796 = vmatpush1.bf16.msra.mxu1 %v4991_v15  ;;  %3742 = vmatprep.subr.bf16.mxu0 %v4997_v21  ;;  %v5338_v15 = vsel %vm443_vm5, 1.0, %v4543_v9  ;;  %vm578_vm5 = vcmp.eq.s32.totalorder %v4881_v3, %v5321_v18 }
 0x10e   : > { %3798 = vmatprep.subr.bf16.mxu1 %v4997_v21  ;;  %3333 = vmatprep.mubr.msk.f32.mxu0 %vm850_vm0, %v5302_v47  ;;  %7050 = vst [vmem:[#allocation46_spill] sm:$0xff] %v5338_v15  ;;  %v5341_v21 = vsel %vm492_vm10, 1.0, %v4543_v9 }
 0x10f   : > { %3347 = vmatprep.mubr.msk.f32.mxu1 %vm850_vm0, %v5305_v58  ;;  %3334 = vmatmul.mubr.msk.f32.gmra.mrb[10].mxu0 %vm6898_vm14, %v6912_v57  ;;  %7051 = vst [vmem:[#allocation47_spill] sm:$0xff] %v5341_v21  ;;  %vm529_vm14 = vcmp.eq.s32.totalorder %v4881_v3, %v5310_v17 }
 0x110   : > { %3348 = vmatmul.mubr.msk.f32.gmra.mrb[10].mxu1 %vm6901_vm2, %v6912_v57  ;;  %3744 = vmatpush1.bf16.msra.mxu0 %v5010_v42 }
 0x111   : > { %3800 = vmatpush1.bf16.msra.mxu1 %v5010_v42  ;;  %3746 = vmatprep.subr.bf16.mxu0 %v5017_v49  ;;  %v5368_v42 = vsel %vm529_vm14, 1.0, %v4543_v9 }
 0x112   : > { %3802 = vmatprep.subr.bf16.mxu1 %v5017_v49  ;;  %3335 = vmatprep.mubr.msk.f32.mxu0 %vm850_vm0, %v5338_v15  ;;  %7052 = vst [vmem:[#allocation48_spill] sm:$0xff] %v5368_v42  ;;  %v5371_v49 = vsel %vm578_vm5, 1.0, %v4543_v9  ;;  %vm6903_vm5 = vcmp.eq.s32.totalorder %v4878_v2, %v5310_v17 }
 0x113   : > { %3349 = vmatprep.mubr.msk.f32.mxu1 %vm850_vm0, %v5341_v21  ;;  %3336 = vmatmul.mubr.msk.f32.gmra.mrb[12].mxu0 %vm6900_vm13, %v6912_v57  ;;  %7053 = vst [vmem:[#allocation49_spill] sm:$0xff] %v5371_v49 }
 0x114   : > { %3350 = vmatmul.mubr.msk.f32.gmra.mrb[12].mxu1 %vm6899_vm9, %v6912_v57  ;;  %3748 = vmatpush1.bf16.msra.mxu0 %v5022_v56  ;;  %vm6902_vm9 = vcmp.eq.s32.totalorder %v4878_v2, %v5321_v18 }
 0x115   : > { %3804 = vmatpush1.bf16.msra.mxu1 %v5022_v56  ;;  %3750 = vmatprep.subr.bf16.mxu0 %v5032_v14  ;;  %v5402_v56 = vadd.s32 2, %v5117_v36 }
 0x116   : > { %3806 = vmatprep.subr.bf16.mxu1 %v5032_v14  ;;  %3351 = vmatprep.mubr.msk.f32.mxu0 %vm850_vm0, %v5368_v42  ;;  %v5405_v14 = vadd.s32 3, %v5117_v36 }
 0x117   : > { %3365 = vmatprep.mubr.msk.f32.mxu1 %vm850_vm0, %v5371_v49  ;;  %vm531_vm14 = vcmp.eq.s32.totalorder %v4881_v3, %v5402_v56 }
 0x118   : > { %3752 = vmatpush1.bf16.msra.mxu0 %v5039_v27  ;;  %vm580_vm10 = vcmp.eq.s32.totalorder %v4881_v3, %v5405_v14 }
 0x119   : > { %3808 = vmatpush1.bf16.msra.mxu1 %v5039_v27  ;;  %3754 = vmatprep.subr.bf16.mxu0 %v5045_v31  ;;  %v5416_v27 = vadd.s32 2, %v5131_v46 }
 0x11a   : > { %3810 = vmatprep.subr.bf16.mxu1 %v5045_v31  ;;  %v5419_v31 = vadd.s32 3, %v5131_v46 }
 0x11b   : > { %vm533_vm13 = vcmp.eq.s32.totalorder %v4881_v3, %v5416_v27 }
 0x11c   : > { %3756 = vmatpush1.bf16.msra.mxu0 %v5058_v55  ;;  %vm582_vm2 = vcmp.eq.s32.totalorder %v4881_v3, %v5419_v31 }
 0x11d   : > { %3812 = vmatpush1.bf16.msra.mxu1 %v5058_v55  ;;  %3758 = vmatprep.subr.bf16.mxu0 %v5065_v63  ;;  %v5428_v55 = vsel %vm531_vm14, 1.0, %v4543_v9  ;;  %vm6905_vm14 = vcmp.eq.s32.totalorder %v4878_v2, %v5402_v56 }
 0x11e   : > { %3814 = vmatprep.subr.bf16.mxu1 %v5065_v63  ;;  %7054 = vst [vmem:[#allocation50_spill] sm:$0xff] %v5428_v55  ;;  %v5431_v63 = vsel %vm580_vm10, 1.0, %v4543_v9  ;;  %vm6904_vm10 = vcmp.eq.s32.totalorder %v4878_v2, %v5405_v14 }
 0x11f   : > { %7055 = vst [vmem:[#allocation51_spill] sm:$0xff] %v5431_v63 }
 0x120   : > { %3760 = vmatpush1.bf16.msra.mxu0 %v5070_v16 }
 0x121   : > { %3816 = vmatpush1.bf16.msra.mxu1 %v5070_v16  ;;  %3762 = vmatprep.subr.bf16.mxu0 %v5080_v33  ;;  %v5438_v16 = vadd.s32 2, %v5137_v48 }
 0x122   : > { %3818 = vmatprep.subr.bf16.mxu1 %v5080_v33  ;;  %v5441_v33 = vadd.s32 3, %v5137_v48 }
 0x124   : > { %3764 = vmatpush1.bf16.msra.mxu0 %v5087_v43 }
 0x125   : > { %3820 = vmatpush1.bf16.msra.mxu1 %v5087_v43  ;;  %3766 = vmatprep.subr.bf16.mxu0 %v5091_v50  ;;  %v5460_v43 = vsel %vm533_vm13, 1.0, %v4543_v9  ;;  %vm6906_vm13 = vcmp.eq.s32.totalorder %v4878_v2, %v5419_v31 }
 0x126   : > { %3822 = vmatprep.subr.bf16.mxu1 %v5091_v50  ;;  %v5463_v50 = vsel %vm582_vm2, 1.0, %v4543_v9  ;;  %vm6907_vm2 = vcmp.eq.s32.totalorder %v4878_v2, %v5416_v27 }
 0x128   : > { %3768 = vmatpush1.bf16.msra.mxu0 %v5101_v11 }
 0x129   : > { %3824 = vmatpush1.bf16.msra.mxu1 %v5101_v11  ;;  %3770 = vmatprep.subr.bf16.mxu0 %v5108_v23  ;;  %v5470_v11 = vadd.s32 2, %v5181_v61 }
 0x12a   : > { %3826 = vmatprep.subr.bf16.mxu1 %v5108_v23 }
 0x12b   : > { %7056 = vst [vmem:[#allocation52_spill] sm:$0xff] %v5470_v11 }
 0x12c   : > { %3772 = vmatpush1.bf16.msra.mxu0 %v5115_v32 }
 0x12d   : > { %3828 = vmatpush1.bf16.msra.mxu1 %v5115_v32  ;;  %3774 = vmatprep.subr.bf16.mxu0 %v5121_v37  ;;  %v5537_v32 = vadd.s32 3, %v5252_v8 }
 0x12e   : > { %3830 = vmatprep.subr.bf16.mxu1 %v5121_v37 }
 0x12f   : > { %7062 = vst [vmem:[#allocation58_spill] sm:$0xff] %v5537_v32 }
 0x130   : > { %3776 = vmatpush1.bf16.msra.mxu0 %v5126_v41 }
 0x131   : > { %3832 = vmatpush1.bf16.msra.mxu1 %v5126_v41 }
 0x133   : > { %3352 = vmatmul.mubr.msk.f32.vlgmr.msra.gmra.mrb[14].mxu0 %vm6903_vm5, %v6912_v57  ;;  %vm584_vm5 = vcmp.eq.s32.totalorder %v4881_v3, %v5441_v33 }
 0x134   : > { %3366 = vmatmul.mubr.msk.f32.vlgmr.msra.gmra.mrb[14].mxu1 %vm6902_vm9, %v6912_v57  ;;  %3353 = vmatprep.mubr.msk.f32.mxu0 %vm850_vm0, %v5428_v55  ;;  %vm535_vm9 = vcmp.eq.s32.totalorder %v4881_v3, %v5438_v16  ;;  %v5495_v23 = vsel %vm584_vm5, 1.0, %v4543_v9  ;;  %vm6908_vm5 = vcmp.eq.s32.totalorder %v4878_v2, %v5441_v33 }
 0x135   : > { %3367 = vmatprep.mubr.msk.f32.mxu1 %vm850_vm0, %v5431_v63  ;;  %v5492_v22 = vsel %vm535_vm9, 1.0, %v4543_v9  ;;  %vm6909_vm9 = vcmp.eq.s32.totalorder %v4878_v2, %v5438_v16 }
 0x137   : > { %3354 = vmatmul.mubr.msk.f32.gmra.mrb[16].mxu0 %vm6905_vm14, %v6912_v57  ;;  %vm586_vm14 = vcmp.eq.s32.totalorder %v4881_v3, %v5473_v20 }
 0x138   : > { %3368 = vmatmul.mubr.msk.f32.gmra.mrb[16].mxu1 %vm6904_vm10, %v6912_v57  ;;  %3355 = vmatprep.mubr.msk.f32.mxu0 %vm850_vm0, %v5460_v43  ;;  %vm537_vm10 = vcmp.eq.s32.totalorder %v4881_v3, %v5470_v11  ;;  %v5527_v29 = vsel %vm586_vm14, 1.0, %v4543_v9  ;;  %vm6982_vm14 = vcmp.eq.s32.totalorder %v4878_v2, %v5470_v11 }
 0x139   : > { %3369 = vmatprep.mubr.msk.f32.mxu1 %vm850_vm0, %v5463_v50  ;;  %v5524_v28 = vsel %vm537_vm10, 1.0, %v4543_v9  ;;  %7060 = vst [vmem:[#allocation56_spill] sm:$0xff] %v5527_v29  ;;  %vm6975_vm10 = vcmp.eq.s32.totalorder %v4878_v2, %v5473_v20 }
 0x13b   : > { %3356 = vmatmul.mubr.msk.f32.gmra.mrb[18].mxu0 %vm6907_vm2, %v6912_v57  ;;  %vm588_vm2 = vcmp.eq.s32.totalorder %v4881_v3, %v5505_v25 }
 0x13c   : > { %3370 = vmatmul.mubr.msk.f32.gmra.mrb[18].mxu1 %vm6906_vm13, %v6912_v57  ;;  %3357 = vmatprep.mubr.msk.f32.mxu0 %vm850_vm0, %v5492_v22  ;;  %vm539_vm13 = vcmp.eq.s32.totalorder %v4881_v3, %v5502_v24  ;;  %v5559_v35 = vsel %vm588_vm2, 1.0, %v4543_v9  ;;  %vm6981_vm2 = vcmp.eq.s32.totalorder %v4878_v2, %v5502_v24  ;;  %v1942_v24 = vld [vmem:[%s4866_s13 + $0x38] sm:$0xff] }
 0x13d   : > { %3371 = vmatprep.mubr.msk.f32.mxu1 %vm850_vm0, %v5495_v23  ;;  %v5556_v34 = vsel %vm539_vm13, 1.0, %v4543_v9  ;;  %7064 = vst [vmem:[#allocation60_spill] sm:$0xff] %v5559_v35  ;;  %vm6910_vm13 = vcmp.eq.s32.totalorder %v4878_v2, %v5505_v25 }
 0x13e   : > { %7063 = vst [vmem:[#allocation59_spill] sm:$0xff] %v5556_v34 }
 0x13f   : > { %3358 = vmatmul.mubr.msk.f32.gmra.mrb[20].mxu0 %vm6909_vm9, %v6912_v57  ;;  %vm590_vm9 = vcmp.eq.s32.totalorder %v4881_v3, %v5537_v32 }
 0x140   : > { %3372 = vmatmul.mubr.msk.f32.gmra.mrb[20].mxu1 %vm6908_vm5, %v6912_v57  ;;  %3359 = vmatprep.mubr.msk.f32.mxu0 %vm850_vm0, %v5524_v28  ;;  %vm541_vm5 = vcmp.eq.s32.totalorder %v4881_v3, %v5534_v30  ;;  %v5585_v37 = vsel %vm590_vm9, 1.0, %v4543_v9  ;;  %vm6911_vm9 = vcmp.eq.s32.totalorder %v4878_v2, %v5537_v32 }
 0x141   : > { %3373 = vmatprep.mubr.msk.f32.mxu1 %vm850_vm0, %v5527_v29  ;;  %v5582_v3 = vsel %vm541_vm5, 1.0, %v4543_v9  ;;  %7066 = vst [vmem:[#allocation62_spill] sm:$0xff] %v5585_v37  ;;  %vm6914_vm5 = vcmp.eq.s32.totalorder %v4878_v2, %v5534_v30  ;;  %v5613_v9 = vpack.c.bf16 %v5163_v59, %v4895_v10 }
 0x142   : > { %7065 = vst [vmem:[#allocation61_spill] sm:$0xff] %v5582_v3 }
 0x143   : > { %3360 = vmatmul.mubr.msk.f32.gmra.mrb[22].mxu0 %vm6982_vm14, %v6912_v57  ;;  %7067 = vst [vmem:[#allocation63_spill] sm:$0xff] %v5613_v9 }
 0x144   : > { %3374 = vmatmul.mubr.msk.f32.gmra.mrb[22].mxu1 %vm6975_vm10, %v6912_v57  ;;  %3361 = vmatprep.mubr.msk.f32.mxu0 %vm850_vm0, %v5556_v34 }
 0x145   : > { %3375 = vmatprep.mubr.msk.f32.mxu1 %vm850_vm0, %v5559_v35 }
 0x147   : > { %3362 = vmatmul.mubr.msk.f32.gmra.mrb[24].mxu0 %vm6981_vm2, %v6912_v57 }
 0x148   : > { %3376 = vmatmul.mubr.msk.f32.gmra.mrb[24].mxu1 %vm6910_vm13, %v6912_v57  ;;  %3363 = vmatprep.mubr.msk.f32.mxu0 %vm850_vm0, %v5582_v3  ;;  %vm5621_vm13 = vmpackc.low %vm850_vm0, %vm850_vm0 }
 0x149   : > { %3377 = vmatprep.mubr.msk.f32.mxu1 %vm850_vm0, %v5585_v37  ;;  %3835 = vmatprep.subr.msk.bf16.mxu0 %vm5621_vm13, %v5613_v9  ;;  %v5677_v9 = vpack.c.bf16 %v5305_v58, %v5272_v39 }
 0x14a   : > { %3850 = vmatprep.subr.msk.bf16.mxu1 %vm5621_vm13, %v5617_v40  ;;  %v7076_v40 = vmov 0 }
 0x14b   : > { %3364 = vmatmul.mubr.msk.f32.gmra.mrb[26].mxu0 %vm6914_vm5, %v6912_v57  ;;  %vm5658_vm5 = vmpackc.low %vm6918_vm8, %vm6929_vm4  ;;  %7080 = vst [vmem:[#allocation70_spill] sm:$0xff] %v5677_v9 }
 0x14c   : > { %3378 = vmatmul.mubr.msk.f32.gmra.mrb[26].mxu1 %vm6911_vm9, %v6912_v57  ;;  %vm5645_vm9 = vmpackc.low %vm6922_vm7, %vm6973_vm3  ;;  %v6919_v57 = vmov 1.0|1.0   ;;  %v7077_v40 = vsel %vm5658_vm5, 4294967295, %v7076_v40 }
 0x14d   : > { %v7074_v45 = vsel %vm5645_vm9, 4294967295, %v7073_v45  ;;  %3837 = vmatpush1.bf16.xpose.msk.msra.mxu0 %vm5645_vm9, %v6919_v57  ;;  %7078 = vst [vmem:[#allocation68_spill] sm:$0xff] %v7077_v40  ;;  %3852 = vmatpush1.bf16.xpose.msk.msra.mxu1 %vm5658_vm5, %v6919_v57  ;;  %vm5685_vm8 = vmpackc.low %vm6925_vm15, %vm6928_vm11  ;;  %v7081_v57 = vmov 0  ;;  %vm7093_vm11 = vcmp.eq.s32.totalorder %v4878_v2, %v5242_v7 }
 0x14e   : > { %7075 = vst [vmem:[#allocation67_spill] sm:$0xff] %v7074_v45  ;;  %3840 = vmatprep.subr.msk.bf16.mxu0 %vm5621_vm13, %v5627_v51  ;;  %3855 = vmatprep.subr.msk.bf16.mxu1 %vm5621_vm13, %v5637_v54  ;;  %v5673_v45 = vpack.c.bf16 %v5302_v47, %v5269_v26  ;;  %v7082_v57 = vsel %vm5685_vm8, 4294967295, %v7081_v57  ;;  %v7084_v51 = vmov 1.0|1.0   ;;  %vm5698_vm7 = vmpackc.low %vm6924_vm1, %vm6927_vm12  ;;  %v7085_v54 = vmov 0 }
 0x14f   : > { %7083 = vst [vmem:[#allocation71_spill] sm:$0xff] %v7082_v57  ;;  %v7086_v54 = vsel %vm5698_vm7, 4294967295, %v7085_v54  ;;  %vm7088_vm1 = vcmp.eq.s32.totalorder %v4878_v2, %v5206_v1  ;;  %v7089_v57 = vmov 0  ;;  %vm7092_vm12 = vcmp.eq.s32.totalorder %v4878_v2, %v5217_v6 }
 0x150   : > { %7079 = vst [vmem:[#allocation69_spill] sm:$0xff] %v5673_v45  ;;  %7087 = vst [vmem:[#allocation72_spill] sm:$0xff] %v7086_v54  ;;  %v7099_v54 = vmov 1.0  }
 0x151   : > { %vm5717_vm15 = vmpackc.low %vm7088_vm1, %vm6972_vm6  ;;  %vm7102_vm1 = vcmp.eq.s32.totalorder %v4878_v2, %v5310_v17  ;;  %vm7109_vm6 = vcmp.eq.s32.totalorder %v4878_v2, %v5321_v18 }
 0x152   : > { %v7090_v57 = vsel %vm5717_vm15, 4294967295, %v7089_v57  ;;  %vm5730_vm4 = vmpackc.low %vm7093_vm11, %vm7092_vm12  ;;  %vm7100_vm11 = vcmp.eq.s32.totalorder %v4878_v2, %v5252_v8  ;;  %vm7101_vm12 = vcmp.eq.s32.totalorder %v4878_v2, %v5285_v12 }
 0x153   : > { %7091 = vst [vmem:[#allocation73_spill] sm:$0xff] %v7090_v57  ;;  %v5743_v57 = vpack.c.bf16 %v5428_v55, %v5368_v42 }
 0x155   : > { %3842 = vmatpush1.bf16.xpose.msk.msra.mxu0 %vm5685_vm8, %v7084_v51  ;;  %3857 = vmatpush1.bf16.xpose.msk.msra.mxu1 %vm5698_vm7, %v7084_v51  ;;  %7097 = vst [vmem:[#allocation75_spill] sm:$0xff] %v5743_v57 }
 0x156   : > { %3845 = vmatprep.subr.msk.bf16.mxu0 %vm5621_vm13, %v5673_v45  ;;  %3860 = vmatprep.subr.msk.bf16.mxu1 %vm5621_vm13, %v5677_v9  ;;  %v7094_v9 = vmov 0  ;;  %v5747_v45 = vpack.c.bf16 %v5431_v63, %v5371_v49 }
 0x157   : > { %v7095_v9 = vsel %vm5730_vm4, 4294967295, %v7094_v9 }
 0x158   : > { %7096 = vst [vmem:[#allocation74_spill] sm:$0xff] %v7095_v9  ;;  %7098 = vst [vmem:[#allocation76_spill] sm:$0xff] %v5747_v45 }
 0x15d   : > { %3847 = vmatpush1.bf16.xpose.msk.msra.mxu0 %vm5717_vm15, %v7084_v51  ;;  %3862 = vmatpush1.bf16.xpose.msk.msra.mxu1 %vm5730_vm4, %v7084_v51 }
 0x15e   : > { %3391 = vmatprep.subr.msk.mxu0 %vm850_vm0, %v5338_v15  ;;  %3412 = vmatprep.subr.msk.mxu1 %vm850_vm0, %v5341_v21 }
 0x165   : > { %3392 = vmatpush1.xpose.msk.msra.mxu0 %vm7100_vm11, %v7099_v54  ;;  %3413 = vmatpush1.xpose.msk.msra.mxu1 %vm7101_vm12, %v7099_v54  ;;  %vm7103_vm11 = vcmp.eq.s32.totalorder %v4878_v2, %v5402_v56 }
 0x166   : > { %3865 = vmatprep.subr.msk.bf16.mxu0 %vm5621_vm13, %v5743_v57  ;;  %3880 = vmatprep.subr.msk.bf16.mxu1 %vm5621_vm13, %v5747_v45  ;;  %vm5821_vm12 = vmpackc.low %vm7103_vm11, %vm7102_vm1  ;;  %vm7110_vm1 = vcmp.eq.s32.totalorder %v4878_v2, %v5405_v14 }
 0x167   : > { %vm5839_vm11 = vmpackc.low %vm7110_vm1, %vm7109_vm6  ;;  %vm7114_vm6 = vcmp.eq.s32.totalorder %v4878_v2, %v5416_v27  ;;  %vm7115_vm1 = vcmp.eq.s32.totalorder %v4878_v2, %v5438_v16 }
 0x168   : > { %vm5881_vm3 = vmpackc.low %vm7115_vm1, %vm7114_vm6  ;;  %vm7122_vm6 = vcmp.eq.s32.totalorder %v4878_v2, %v5419_v31  ;;  %vm7123_vm1 = vcmp.eq.s32.totalorder %v4878_v2, %v5441_v33 }
 0x169   : > { %vm5902_vm10 = vmpackc.low %vm7123_vm1, %vm7122_vm6  ;;  %vm7134_vm1 = vcmp.eq.s32.totalorder %v4878_v2, %v5473_v20 }
 0x16a   : > { %vm5957_vm6 = vmpackc.low %vm6981_vm2, %vm6982_vm14  ;;  %vm7135_vm2 = vcmp.eq.s32.totalorder %v4878_v2, %v5505_v25 }
 0x16b   : > { %vm5971_vm14 = vmpackc.low %vm7135_vm2, %vm7134_vm1  ;;  %vm7142_vm2 = vcmp.eq.s32.totalorder %v4878_v2, %v5534_v30  ;;  %vm7143_vm1 = vcmp.eq.s32.totalorder %v4878_v2, %v5537_v32  ;;  %v1953_v32 = vld [vmem:[%s4866_s13 + $0x90] sm:$0xff] }
 0x1ce   : > { %v938_v9 = vpop.f32.mrb[0].mxu0 }
 0x1cf   : > { %v1066_v40 = vpop.f32.mrb[0].mxu1  ;;  %v940_v55 = vpop.f32.mrb[1].mxu0 }
 0x1d0   : > { %v1107_v63 = vmax.f32 %v938_v9, %v1066_v40  ;;  %v1068_v49 = vpop.f32.mrb[1].mxu1 }
 0x1d1   : > { %v1108_v42 = vmax.f32 %v940_v55, %v1068_v49 }
 0x1d2   : > { %v944_v8 = vpop.f32.mrb[2].mxu0 }
 0x1d3   : > { %v1072_v21 = vpop.f32.mrb[2].mxu1  ;;  %v946_v7 = vpop.f32.mrb[3].mxu0 }
 0x1d4   : > { %v1109_v15 = vmax.f32 %v944_v8, %v1072_v21  ;;  %v1074_v12 = vpop.f32.mrb[3].mxu1 }
 0x1d5   : > { %v1110_v1 = vmax.f32 %v946_v7, %v1074_v12  ;;  %v7104_v7 = vmov 0 }
 0x1d6   : > { %v950_v58 = vpop.f32.mrb[4].mxu0  ;;  %v7105_v7 = vsel %vm5821_vm12, 4294967295, %v7104_v7 }
 0x1d7   : > { %v1078_v47 = vpop.f32.mrb[4].mxu1  ;;  %v952_v57 = vpop.f32.mrb[5].mxu0  ;;  %7106 = vst [vmem:[#allocation77_spill] sm:$0xff] %v7105_v7 }
 0x1d8   : > { %v1111_v6 = vmax.f32 %v950_v58, %v1078_v47  ;;  %v1080_v61 = vpop.f32.mrb[5].mxu1 }
 0x1d9   : > { %v1112_v39 = vmax.f32 %v952_v57, %v1080_v61 }
 0x1da   : > { %v5763_v26 = vpop.f32.mrb[6].mxu0 }
 0x1db   : > { %v5765_v45 = vpop.f32.mrb[6].mxu1  ;;  %v5769_v49 = vpop.f32.mrb[7].mxu0 }
 0x1dc   : > { %v5771_v55 = vpop.f32.mrb[7].mxu1 }
 0x1de   : > { %v5775_v8 = vpop.f32.mrb[8].mxu0 }
 0x1df   : > { %v5777_v12 = vpop.f32.mrb[8].mxu1  ;;  %v5781_v61 = vpop.f32.mrb[9].mxu0 }
 0x1e0   : > { %v5783_v47 = vpop.f32.mrb[9].mxu1 }
 0x1e2   : > { %v5787_v21 = vpop.f32.mrb[10].mxu0 }
 0x1e3   : > { %v5789_v40 = vpop.f32.mrb[10].mxu1  ;;  %v5793_v9 = vpop.f32.mrb[11].mxu0 }
 0x1e4   : > { %v5795_v38 = vpop.f32.mrb[11].mxu1 }
 0x1e6   : > { %v5799_v48 = vpop.f32.mrb[12].mxu0 }
 0x1e7   : > { %v5801_v13 = vpop.f32.mrb[12].mxu1  ;;  %v5805_v0 = vpop.f32.mrb[13].mxu0 }
 0x1e8   : > { %v5807_v53 = vpop.f32.mrb[13].mxu1 }
 0x206   : > { %v1208_v46 = vpop.f32.mrb[14].mxu0 }
 0x207   : > { %v1350_v62 = vpop.f32.mrb[14].mxu1  ;;  %v1249_v52 = vmax.f32 %v1107_v63, %v1208_v46  ;;  %v1210_v44 = vpop.f32.mrb[15].mxu0  ;;  %v5827_v46 = vpack.c.bf16 %v5492_v22, %v5460_v43 }
 0x208   : > { %v1352_v36 = vpop.f32.mrb[15].mxu1  ;;  %v1250_v57 = vmax.f32 %v1108_v42, %v1210_v44  ;;  %v7111_v42 = vmov 0 }
 0x209   : > { %v5811_v60 = vmax.f32 %v1249_v52, %v1350_v62  ;;  %7107 = vst [vmem:[#allocation78_spill] sm:$0xff] %v5827_v46  ;;  %v7112_v42 = vsel %vm5839_vm11, 4294967295, %v7111_v42 }
 0x20a   : > { %v5813_v59 = vmax.f32 %v1250_v57, %v1352_v36  ;;  %v1214_v5 = vpop.f32.mrb[16].mxu0  ;;  %v5831_v36 = vpack.c.bf16 %v5495_v23, %v5463_v50  ;;  %7113 = vst [vmem:[#allocation80_spill] sm:$0xff] %v7112_v42  ;;  %v7127_v42 = vmax.f32 %v5769_v49, %v5771_v55 }
 0x20b   : > { %v1356_v4 = vpop.f32.mrb[16].mxu1  ;;  %v1251_v44 = vmax.f32 %v1109_v15, %v1214_v5  ;;  %v1216_v52 = vpop.f32.mrb[17].mxu0 }
 0x20c   : > { %7108 = vst [vmem:[#allocation79_spill] sm:$0xff] %v5831_v36  ;;  %v1358_v62 = vpop.f32.mrb[17].mxu1  ;;  %v1252_v63 = vmax.f32 %v1110_v1, %v1216_v52  ;;  %3393 = vmatprep.mubr.msk.f32.mxu0 %vm850_vm0, %v5813_v59  ;;  %3414 = vmatprep.mubr.msk.f32.mxu1 %vm850_vm0, %v5813_v59 }
 0x20d   : > { %v5847_v5 = vmax.f32 %v1251_v44, %v1356_v4  ;;  %1491 = vmatmul.mubr.f32.vlgmr.msra.gmra.mrb[28].mxu0 %v5811_v60  ;;  %1591 = vmatmul.mubr.f32.vlgmr.msra.gmra.mrb[28].mxu1 %v5811_v60 }
 0x20e   : > { %v5851_v15 = vmax.f32 %v1252_v63, %v1358_v62  ;;  %3867 = vmatpush1.bf16.xpose.msk.msra.mxu0 %vm5821_vm12, %v7084_v51  ;;  %3882 = vmatpush1.bf16.xpose.msk.msra.mxu1 %vm5839_vm11, %v7084_v51  ;;  %v1220_v1 = vpop.f32.mrb[18].mxu0 }
 0x20f   : > { %v1362_v57 = vpop.f32.mrb[18].mxu1  ;;  %v1253_v52 = vmax.f32 %v1111_v6, %v1220_v1  ;;  %v1222_v58 = vpop.f32.mrb[19].mxu0  ;;  %3870 = vmatprep.subr.msk.bf16.mxu0 %vm5621_vm13, %v5827_v46  ;;  %3885 = vmatprep.subr.msk.bf16.mxu1 %vm5621_vm13, %v5831_v36  ;;  %v7124_v46 = vmov 0 }
 0x210   : > { %v1364_v4 = vpop.f32.mrb[19].mxu1  ;;  %v1254_v44 = vmax.f32 %v1112_v39, %v1222_v58  ;;  %3394 = vmatprep.mubr.msk.f32.mxu0 %vm850_vm0, %v5851_v15  ;;  %3415 = vmatprep.mubr.msk.f32.mxu1 %vm850_vm0, %v5851_v15  ;;  %v7116_v39 = vmov 0  ;;  %v5887_v58 = vpack.c.bf16 %v5556_v34, %v5524_v28  ;;  %v7125_v46 = vsel %vm5902_vm10, 4294967295, %v7124_v46  ;;  %v1948_v34 = vld [vmem:[%s4866_s13 + $0x68] sm:$0xff] }
 0x211   : > { %v5869_v62 = vmax.f32 %v1253_v52, %v1362_v57  ;;  %1496 = vmatmul.mubr.f32.gmra.mrb[30].mxu0 %v5847_v5  ;;  %1596 = vmatmul.mubr.f32.gmra.mrb[30].mxu1 %v5847_v5  ;;  %v7117_v39 = vsel %vm5881_vm3, 4294967295, %v7116_v39  ;;  %v5891_v57 = vpack.c.bf16 %v5559_v35, %v5527_v29  ;;  %v7121_v52 = vmax.f32 %v5763_v26, %v5765_v45  ;;  %v1939_v35 = vld [vmem:[%s4866_s13 + $0x20] sm:$0xff] }
 0x212   : > { %v5873_v6 = vmax.f32 %v1254_v44, %v1364_v4  ;;  %v1226_v63 = vpop.f32.mrb[20].mxu0  ;;  %7118 = vst [vmem:[#allocation81_spill] sm:$0xff] %v7117_v39  ;;  %7119 = vst [vmem:[#allocation82_spill] sm:$0xff] %v5887_v58 }
 0x213   : > { %v1368_v1 = vpop.f32.mrb[20].mxu1  ;;  %7120 = vst [vmem:[#allocation83_spill] sm:$0xff] %v5891_v57  ;;  %v1255_v4 = vmax.f32 %v7121_v52, %v1226_v63  ;;  %v1228_v44 = vpop.f32.mrb[21].mxu0  ;;  %7126 = vst [vmem:[#allocation84_spill] sm:$0xff] %v7125_v46  ;;  %v7128_v63 = vmax.f32 %v5775_v8, %v5777_v12  ;;  %v1937_v8 = vld [vmem:[%s4866_s13 + $0x10] sm:$0xff] }
 0x214   : > { %v1370_v36 = vpop.f32.mrb[21].mxu1  ;;  %v1256_v7 = vmax.f32 %v7127_v42, %v1228_v44  ;;  %3395 = vmatprep.mubr.msk.f32.mxu0 %vm850_vm0, %v5873_v6  ;;  %3416 = vmatprep.mubr.msk.f32.mxu1 %vm850_vm0, %v5873_v6  ;;  %v1936_v42 = vld [vmem:[%s4866_s13 + $0x8] sm:$0xff]  ;;  %v7129_v44 = vmax.f32 %v5781_v61, %v5783_v47  ;;  %v1993_v39 = vmul.f32 %v1937_v8, %v1937_v8 }
 0x215   : > { %v5913_v26 = vmax.f32 %v1255_v4, %v1368_v1  ;;  %1501 = vmatmul.mubr.f32.gmra.mrb[32].mxu0 %v5869_v62  ;;  %1601 = vmatmul.mubr.f32.gmra.mrb[32].mxu1 %v5869_v62 }
 0x216   : > { %v5917_v45 = vmax.f32 %v1256_v7, %v1370_v36  ;;  %3872 = vmatpush1.bf16.xpose.msk.msra.mxu0 %vm5881_vm3, %v7084_v51  ;;  %3887 = vmatpush1.bf16.xpose.msk.msra.mxu1 %vm5902_vm10, %v7084_v51  ;;  %v1232_v49 = vpop.f32.mrb[22].mxu0  ;;  %v1938_v7 = vld [vmem:[%s4866_s13 + $0x18] sm:$0xff]  ;;  %v1935_v36 = vld [vmem:[%s4866_s13] sm:$0xff] }
 0x217   : > { %v1374_v55 = vpop.f32.mrb[22].mxu1  ;;  %v1257_v1 = vmax.f32 %v7128_v63, %v1232_v49  ;;  %v1234_v52 = vpop.f32.mrb[23].mxu0  ;;  %3875 = vmatprep.subr.msk.bf16.mxu0 %vm5621_vm13, %v5887_v58  ;;  %3890 = vmatprep.subr.msk.bf16.mxu1 %vm5621_vm13, %v5891_v57  ;;  %v1992_v49 = vmul.f32 %v1936_v42, %v1936_v42  ;;  %v7136_v58 = vmov 0 }
 0x218   : > { %v1376_v4 = vpop.f32.mrb[23].mxu1  ;;  %v1258_v46 = vmax.f32 %v7129_v44, %v1234_v52  ;;  %3396 = vmatprep.mubr.msk.f32.mxu0 %vm850_vm0, %v5917_v45  ;;  %3417 = vmatprep.mubr.msk.f32.mxu1 %vm850_vm0, %v5917_v45  ;;  %v1994_v52 = vmul.f32 %v1938_v7, %v1938_v7  ;;  %v1991_v44 = vmul.f32 %v1935_v36, %v1935_v36  ;;  %v7137_v58 = vsel %vm5971_vm14, 4294967295, %v7136_v58  ;;  %v1882_v7 = vld [vmem:[%s4864_s27 + $0x18] sm:$0xff]  ;;  %v1879_v36 = vld [vmem:[%s4864_s27] sm:$0xff] }
 0x219   : > { %v5945_v12 = vmax.f32 %v1257_v1, %v1374_v55  ;;  %1506 = vmatmul.mubr.f32.gmra.mrb[34].mxu0 %v5913_v26  ;;  %1606 = vmatmul.mubr.f32.gmra.mrb[34].mxu1 %v5913_v26  ;;  %v7130_v55 = vmov 0  ;;  %v1880_v1 = vld [vmem:[%s4864_s27 + $0x8] sm:$0xff]  ;;  %7138 = vst [vmem:[#allocation86_spill] sm:$0xff] %v7137_v58 }
 0x21a   : > { %v5949_v63 = vmax.f32 %v1258_v46, %v1376_v4  ;;  %v1238_v61 = vpop.f32.mrb[24].mxu0  ;;  %v7131_v55 = vsel %vm5957_vm6, 4294967295, %v7130_v55  ;;  %v7133_v46 = vmax.f32 %v5787_v21, %v5789_v40  ;;  %v7139_v21 = vmax.f32 %v5793_v9, %v5795_v38 }
 0x21b   : > { %v1380_v47 = vpop.f32.mrb[24].mxu1  ;;  %7132 = vst [vmem:[#allocation85_spill] sm:$0xff] %v7131_v55  ;;  %v1240_v4 = vpop.f32.mrb[25].mxu0  ;;  %v2048_v8 = vmul.f32 %v1992_v49, %v1880_v1  ;;  %v7140_v49 = vmax.f32 %v5799_v48, %v5801_v13  ;;  %v7141_v48 = vmax.f32 %v5805_v0, %v5807_v53  ;;  %v1884_v53 = vld [vmem:[%s4864_s27 + $0x28] sm:$0xff]  ;;  %v1886_v0 = vld [vmem:[%s4864_s27 + $0x38] sm:$0xff] }
 0x21c   : > { %v1259_v42 = vmax.f32 %v7133_v46, %v1238_v61  ;;  %v1382_v57 = vpop.f32.mrb[25].mxu1  ;;  %v1260_v40 = vmax.f32 %v7139_v21, %v1240_v4  ;;  %3397 = vmatprep.mubr.msk.f32.mxu0 %vm850_vm0, %v5949_v63  ;;  %3418 = vmatprep.mubr.msk.f32.mxu1 %vm850_vm0, %v5949_v63  ;;  %v1881_v61 = vld [vmem:[%s4864_s27 + $0x10] sm:$0xff]  ;;  %v1940_v46 = vld [vmem:[%s4866_s13 + $0x28] sm:$0xff]  ;;  %v2047_v4 = vmul.f32 %v1991_v44, %v1879_v36  ;;  %v1946_v44 = vld [vmem:[%s4866_s13 + $0x58] sm:$0xff] }
 0x21d   : > { %1511 = vmatmul.mubr.f32.gmra.mrb[36].mxu0 %v5945_v12  ;;  %1611 = vmatmul.mubr.f32.gmra.mrb[36].mxu1 %v5945_v12  ;;  %v1941_v21 = vld [vmem:[%s4866_s13 + $0x30] sm:$0xff]  ;;  %v2049_v58 = vmul.f32 %v1993_v39, %v1881_v61  ;;  %v1996_v55 = vmul.f32 %v1940_v46, %v1940_v46  ;;  %v1995_v36 = vmul.f32 %v1939_v35, %v1939_v35  ;;  %v1883_v61 = vld [vmem:[%s4864_s27 + $0x20] sm:$0xff] }
 0x21e   : > { %v5986_v25 = vmax.f32 %v1259_v42, %v1380_v47  ;;  %v5992_v38 = vmax.f32 %v1260_v40, %v1382_v57  ;;  %3877 = vmatpush1.bf16.xpose.msk.msra.mxu0 %vm5957_vm6, %v7084_v51  ;;  %3892 = vmatpush1.bf16.xpose.msk.msra.mxu1 %vm5971_vm14, %v7084_v51  ;;  %v1244_v9 = vpop.f32.mrb[26].mxu0  ;;  %v2050_v42 = vmul.f32 %v1994_v52, %v1882_v7  ;;  %v1944_v52 = vld [vmem:[%s4866_s13 + $0x48] sm:$0xff] }
 0x21f   : > { %v1386_v47 = vpop.f32.mrb[26].mxu1  ;;  %v1261_v1 = vmax.f32 %v7140_v49, %v1244_v9  ;;  %v1246_v57 = vpop.f32.mrb[27].mxu0  ;;  %3433 = vmatprep.subr.msk.mxu0 %vm850_vm0, %v5582_v3  ;;  %3454 = vmatprep.subr.msk.mxu1 %vm850_vm0, %v5585_v37  ;;  %v1998_v7 = vmul.f32 %v1942_v24, %v1942_v24  ;;  %v1997_v46 = vmul.f32 %v1941_v21, %v1941_v21  ;;  %v1885_v49 = vld [vmem:[%s4864_s27 + $0x30] sm:$0xff]  ;;  %v1888_v37 = vld [vmem:[%s4864_s27 + $0x48] sm:$0xff]  ;;  %v1890_v3 = vld [vmem:[%s4864_s27 + $0x58] sm:$0xff] }
 0x220   : > { %v1388_v40 = vpop.f32.mrb[27].mxu1  ;;  %v1262_v13 = vmax.f32 %v7141_v48, %v1246_v57  ;;  %3398 = vmatprep.mubr.msk.f32.mxu0 %vm850_vm0, %v5992_v38  ;;  %3419 = vmatprep.mubr.msk.f32.mxu1 %vm850_vm0, %v5992_v38  ;;  %v2000_v24 = vmul.f32 %v1944_v52, %v1944_v52  ;;  %v2002_v35 = vmul.f32 %v1946_v44, %v1946_v44  ;;  %v1950_v44 = vld [vmem:[%s4866_s13 + $0x78] sm:$0xff] }
 0x221   : > { %v6017_v39 = vmax.f32 %v1261_v1, %v1386_v47  ;;  %1516 = vmatmul.mubr.f32.gmra.mrb[38].mxu0 %v5986_v25  ;;  %1616 = vmatmul.mubr.f32.gmra.mrb[38].mxu1 %v5986_v25  ;;  %v1943_v47 = vld [vmem:[%s4866_s13 + $0x40] sm:$0xff]  ;;  %v1945_v1 = vld [vmem:[%s4866_s13 + $0x50] sm:$0xff]  ;;  %v6029_v57 = vpack.c.bf16 %v2050_v42, %v2048_v8  ;;  %v6031_v48 = vpack.c.bf16 %v2049_v58, %v2047_v4 }
 0x222   : > { %v6024_v9 = vmax.f32 %v1262_v13, %v1388_v40  ;;  %v2052_v21 = vmul.f32 %v1996_v55, %v1884_v53  ;;  %v2054_v40 = vmul.f32 %v1998_v7, %v1886_v0  ;;  %v2051_v52 = vmul.f32 %v1995_v36, %v1883_v61  ;;  %v1947_v13 = vld [vmem:[%s4866_s13 + $0x60] sm:$0xff]  ;;  %v1949_v8 = vld [vmem:[%s4866_s13 + $0x70] sm:$0xff]  ;;  %v1892_v61 = vld [vmem:[%s4864_s27 + $0x68] sm:$0xff] }
 0x223   : > { %v2053_v58 = vmul.f32 %v1997_v46, %v1885_v49  ;;  %v1999_v42 = vmul.f32 %v1943_v47, %v1943_v47  ;;  %v2001_v4 = vmul.f32 %v1945_v1, %v1945_v1  ;;  %v2056_v55 = vmul.f32 %v2000_v24, %v1888_v37  ;;  %v1887_v36 = vld [vmem:[%s4864_s27 + $0x40] sm:$0xff]  ;;  %v1889_v0 = vld [vmem:[%s4864_s27 + $0x50] sm:$0xff]  ;;  %v1952_v1 = vld [vmem:[%s4866_s13 + $0x88] sm:$0xff] }
 0x224   : > { %3399 = vmatprep.mubr.msk.f32.mxu0 %vm850_vm0, %v6024_v9  ;;  %3420 = vmatprep.mubr.msk.f32.mxu1 %vm850_vm0, %v6024_v9  ;;  %v2058_v7 = vmul.f32 %v2002_v35, %v1890_v3  ;;  %v2004_v53 = vmul.f32 %v1948_v34, %v1948_v34  ;;  %v2006_v46 = vmul.f32 %v1950_v44, %v1950_v44  ;;  %v1894_v34 = vld [vmem:[%s4864_s27 + $0x78] sm:$0xff]  ;;  %v1891_v37 = vld [vmem:[%s4864_s27 + $0x60] sm:$0xff]  ;;  %v1893_v24 = vld [vmem:[%s4864_s27 + $0x70] sm:$0xff] }
 0x225   : > { %1521 = vmatmul.mubr.f32.gmra.mrb[40].mxu0 %v6017_v39  ;;  %1621 = vmatmul.mubr.f32.gmra.mrb[40].mxu1 %v6017_v39  ;;  %v2003_v49 = vmul.f32 %v1947_v13, %v1947_v13  ;;  %v2005_v47 = vmul.f32 %v1949_v8, %v1949_v8  ;;  %v6062_v3 = vpack.c.bf16 %v2054_v40, %v2052_v21  ;;  %v1954_v44 = vld [vmem:[%s4866_s13 + $0x98] sm:$0xff]  ;;  %v1951_v13 = vld [vmem:[%s4866_s13 + $0x80] sm:$0xff] }
 0x226   : > { %3434 = vmatpush1.xpose.msk.msra.mxu0 %vm7142_vm2, %v7099_v54  ;;  %3455 = vmatpush1.xpose.msk.msra.mxu1 %vm7143_vm1, %v7099_v54  ;;  %v2055_v35 = vmul.f32 %v1999_v42, %v1887_v36  ;;  %v6076_v21 = vpack.c.bf16 %v2058_v7, %v2056_v55  ;;  %v2057_v40 = vmul.f32 %v2001_v4, %v1889_v0  ;;  %v1956_v42 = vld [vmem:[%s4866_s13 + $0xa8] sm:$0xff]  ;;  %v1958_v36 = vld [vmem:[%s4866_s13 + $0xb8] sm:$0xff]  ;;  %v1895_v0 = vld [vmem:[%s4864_s27 + $0x80] sm:$0xff] }
 0x227   : > { %3435 = vmatprep.mubr.msk.f32.mxu0 %vm850_vm0, %v5813_v59  ;;  %3456 = vmatprep.mubr.msk.f32.mxu1 %vm850_vm0, %v5813_v59  ;;  %v6069_v59 = vpack.c.bf16 %v2053_v58, %v2051_v52  ;;  %v2060_v8 = vmul.f32 %v2004_v53, %v1892_v61  ;;  %v2059_v52 = vmul.f32 %v2003_v49, %v1891_v37  ;;  %v1898_v53 = vld [vmem:[%s4864_s27 + $0x98] sm:$0xff]  ;;  %v1897_v49 = vld [vmem:[%s4864_s27 + $0x90] sm:$0xff]  ;;  %v1955_v37 = vld [vmem:[%s4866_s13 + $0xa0] sm:$0xff] }
 0x228   : > { %3894 = vmatprep.subr.bf16.mxu0 %v6029_v57  ;;  %3950 = vmatprep.subr.bf16.mxu1 %v6029_v57  ;;  %v2061_v58 = vmul.f32 %v2005_v47, %v1893_v24  ;;  %v2008_v4 = vmul.f32 %v1952_v1, %v1952_v1  ;;  %v2010_v55 = vmul.f32 %v1954_v44, %v1954_v44  ;;  %v1957_v24 = vld [vmem:[%s4866_s13 + $0xb0] sm:$0xff]  ;;  %v1902_v1 = vld [vmem:[%s4864_s27 + $0xb8] sm:$0xff]  ;;  %v1960_v44 = vld [vmem:[%s4866_s13 + $0xc8] sm:$0xff] }
 0x229   : > { %1698 = vmatmul.mubr.f32.vlgmr.msra.gmra.mrb[42].mxu0 %v5811_v60  ;;  %1805 = vmatmul.mubr.f32.vlgmr.msra.gmra.mrb[42].mxu1 %v5811_v60  ;;  %v2062_v60 = vmul.f32 %v2006_v46, %v1894_v34  ;;  %v2007_v7 = vmul.f32 %v1951_v13, %v1951_v13  ;;  %v2009_v61 = vmul.f32 %v1953_v32, %v1953_v32 }
 0x22a   : > { %3896 = vmatpush1.bf16.msra.mxu0 %v6031_v48  ;;  %3952 = vmatpush1.bf16.msra.mxu1 %v6031_v48  ;;  %v6094_v46 = vpack.c.bf16 %v2057_v40, %v2055_v35  ;;  %v2012_v47 = vmul.f32 %v1956_v42, %v1956_v42  ;;  %v2014_v34 = vmul.f32 %v1958_v36, %v1958_v36  ;;  %v1900_v35 = vld [vmem:[%s4864_s27 + $0xa8] sm:$0xff]  ;;  %v1962_v36 = vld [vmem:[%s4866_s13 + $0xd8] sm:$0xff] }
 0x22b   : > { %3436 = vmatprep.mubr.msk.f32.mxu0 %vm850_vm0, %v5851_v15  ;;  %3457 = vmatprep.mubr.msk.f32.mxu1 %vm850_vm0, %v5851_v15  ;;  %v1896_v15 = vld [vmem:[%s4864_s27 + $0x88] sm:$0xff]  ;;  %v6105_v32 = vpack.c.bf16 %v2061_v58, %v2059_v52  ;;  %v2066_v40 = vmul.f32 %v2010_v55, %v1898_v53  ;;  %v2063_v42 = vmul.f32 %v2007_v7, %v1895_v0  ;;  %v1959_v52 = vld [vmem:[%s4866_s13 + $0xc0] sm:$0xff]  ;;  %v1961_v58 = vld [vmem:[%s4866_s13 + $0xd0] sm:$0xff] }
 0x22c   : > { %3898 = vmatprep.subr.bf16.mxu0 %v6062_v3  ;;  %3954 = vmatprep.subr.bf16.mxu1 %v6062_v3  ;;  %v2064_v13 = vmul.f32 %v2008_v4, %v1896_v15  ;;  %v2068_v4 = vmul.f32 %v2012_v47, %v1900_v35  ;;  %v2070_v55 = vmul.f32 %v2014_v34, %v1902_v1  ;;  %v1899_v7 = vld [vmem:[%s4864_s27 + $0xa0] sm:$0xff]  ;;  %v1904_v53 = vld [vmem:[%s4864_s27 + $0xc8] sm:$0xff] }
 0x22d   : > { %1703 = vmatmul.mubr.f32.gmra.mrb[44].mxu0 %v5847_v5  ;;  %1810 = vmatmul.mubr.f32.gmra.mrb[44].mxu1 %v5847_v5  ;;  %v6103_v5 = vpack.c.bf16 %v2062_v60, %v2060_v8  ;;  %v2011_v8 = vmul.f32 %v1955_v37, %v1955_v37  ;;  %v2013_v60 = vmul.f32 %v1957_v24, %v1957_v24  ;;  %v1964_v37 = vld [vmem:[%s4866_s13 + $0xe8] sm:$0xff]  ;;  %v1966_v24 = vld [vmem:[%s4866_s13 + $0xf8] sm:$0xff]  ;;  %v1903_v1 = vld [vmem:[%s4864_s27 + $0xc0] sm:$0xff] }
 0x22e   : > { %3900 = vmatpush1.bf16.msra.mxu0 %v6069_v59  ;;  %3956 = vmatpush1.bf16.msra.mxu1 %v6069_v59  ;;  %v2016_v15 = vmul.f32 %v1960_v44, %v1960_v44  ;;  %v2018_v0 = vmul.f32 %v1962_v36, %v1962_v36  ;;  %v2015_v47 = vmul.f32 %v1959_v52, %v1959_v52  ;;  %v1905_v44 = vld [vmem:[%s4864_s27 + $0xd0] sm:$0xff]  ;;  %v1963_v36 = vld [vmem:[%s4866_s13 + $0xe0] sm:$0xff] }
 0x22f   : > { %3437 = vmatprep.mubr.msk.f32.mxu0 %vm850_vm0, %v5873_v6  ;;  %3458 = vmatprep.mubr.msk.f32.mxu1 %vm850_vm0, %v5873_v6  ;;  %v2065_v6 = vmul.f32 %v2009_v61, %v1897_v49  ;;  %v6128_v61 = vpack.c.bf16 %v2066_v40, %v2064_v13  ;;  %v1906_v49 = vld [vmem:[%s4864_s27 + $0xd8] sm:$0xff]  ;;  %v2017_v34 = vmul.f32 %v1961_v58, %v1961_v58  ;;  %v1965_v58 = vld [vmem:[%s4866_s13 + $0xf0] sm:$0xff] }
 0x230   : > { %3902 = vmatprep.subr.bf16.mxu0 %v6076_v21  ;;  %3958 = vmatprep.subr.bf16.mxu1 %v6076_v21  ;;  %v2067_v35 = vmul.f32 %v2011_v8, %v1899_v7  ;;  %v6142_v13 = vpack.c.bf16 %v2070_v55, %v2068_v4  ;;  %v2072_v52 = vmul.f32 %v2016_v15, %v1904_v53  ;;  %v1968_v8 = vld [vmem:[%s4866_s13 + $0x108] sm:$0xff]  ;;  %v1970_v7 = vld [vmem:[%s4866_s13 + $0x118] sm:$0xff] }
 0x231   : > { %1708 = vmatmul.mubr.f32.gmra.mrb[46].mxu0 %v5869_v62  ;;  %1815 = vmatmul.mubr.f32.gmra.mrb[46].mxu1 %v5869_v62  ;;  %v1901_v62 = vld [vmem:[%s4864_s27 + $0xb0] sm:$0xff]  ;;  %v2073_v4 = vmul.f32 %v2017_v34, %v1905_v44  ;;  %v1908_v55 = vld [vmem:[%s4864_s27 + $0xe8] sm:$0xff]  ;;  %v1910_v15 = vld [vmem:[%s4864_s27 + $0xf8] sm:$0xff]  ;;  %v2021_v53 = vmul.f32 %v1965_v58, %v1965_v58  ;;  %v2026_v34 = vmul.f32 %v1970_v7, %v1970_v7 }
 0x232   : > { %3904 = vmatpush1.bf16.msra.mxu0 %v6094_v46  ;;  %3960 = vmatpush1.bf16.msra.mxu1 %v6094_v46  ;;  %v2069_v40 = vmul.f32 %v2013_v60, %v1901_v62  ;;  %v2071_v60 = vmul.f32 %v2015_v47, %v1903_v1  ;;  %v2019_v62 = vmul.f32 %v1963_v36, %v1963_v36  ;;  %v1912_v44 = vld [vmem:[%s4864_s27 + $0x108] sm:$0xff]  ;;  %v1914_v36 = vld [vmem:[%s4864_s27 + $0x118] sm:$0xff] }
 0x233   : > { %3438 = vmatprep.mubr.msk.f32.mxu0 %vm850_vm0, %v5917_v45  ;;  %3459 = vmatprep.mubr.msk.f32.mxu1 %vm850_vm0, %v5917_v45  ;;  %v6135_v45 = vpack.c.bf16 %v2065_v6, %v2063_v42  ;;  %v2020_v42 = vmul.f32 %v1964_v37, %v1964_v37  ;;  %v2022_v6 = vmul.f32 %v1966_v24, %v1966_v24  ;;  %v1967_v37 = vld [vmem:[%s4866_s13 + $0x100] sm:$0xff]  ;;  %v1969_v24 = vld [vmem:[%s4866_s13 + $0x110] sm:$0xff]  ;;  %v1974_v7 = vld [vmem:[%s4866_s13 + $0x138] sm:$0xff] }
 0x234   : > { %3906 = vmatprep.subr.bf16.mxu0 %v6103_v5  ;;  %3962 = vmatprep.subr.bf16.mxu1 %v6103_v5  ;;  %v2024_v47 = vmul.f32 %v1968_v8, %v1968_v8  ;;  %v6176_v58 = vpack.c.bf16 %v2073_v4, %v2071_v60  ;;  %v1911_v60 = vld [vmem:[%s4864_s27 + $0x100] sm:$0xff]  ;;  %vm7192_vm14 = vcmp.eq.s32.totalorder %v4878_v2, %v5402_v56  ;;  %v7196_v56 = vld [vmem:[#allocation65_spill] sm:$0xff] }
 0x235   : > { %1713 = vmatmul.mubr.f32.gmra.mrb[48].mxu0 %v5913_v26  ;;  %1820 = vmatmul.mubr.f32.gmra.mrb[48].mxu1 %v5913_v26  ;;  %v2074_v26 = vmul.f32 %v2018_v0, %v1906_v49  ;;  %v6160_v0 = vpack.c.bf16 %v2069_v40, %v2067_v35  ;;  %v1909_v49 = vld [vmem:[%s4864_s27 + $0xf0] sm:$0xff]  ;;  %v2078_v1 = vmul.f32 %v2022_v6, %v1910_v15  ;;  %v1972_v35 = vld [vmem:[%s4866_s13 + $0x128] sm:$0xff] }
 0x236   : > { %3908 = vmatpush1.bf16.msra.mxu0 %v6105_v32  ;;  %3964 = vmatpush1.bf16.msra.mxu1 %v6105_v32  ;;  %v2025_v6 = vmul.f32 %v1969_v24, %v1969_v24  ;;  %v1973_v15 = vld [vmem:[%s4866_s13 + $0x130] sm:$0xff]  ;;  %v2028_v4 = vmul.f32 %v1972_v35, %v1972_v35  ;;  %v1978_v24 = vld [vmem:[%s4866_s13 + $0x158] sm:$0xff] }
 0x237   : > { %3439 = vmatprep.mubr.msk.f32.mxu0 %vm850_vm0, %v5949_v63  ;;  %3460 = vmatprep.mubr.msk.f32.mxu1 %vm850_vm0, %v5949_v63  ;;  %v1907_v63 = vld [vmem:[%s4864_s27 + $0xe0] sm:$0xff]  ;;  %v6174_v40 = vpack.c.bf16 %v2074_v26, %v2072_v52  ;;  %v2080_v52 = vmul.f32 %v2024_v47, %v1912_v44  ;;  %v2082_v26 = vmul.f32 %v2026_v34, %v1914_v36  ;;  %v1917_v44 = vld [vmem:[%s4864_s27 + $0x130] sm:$0xff] }
 0x238   : > { %3910 = vmatprep.subr.bf16.mxu0 %v6128_v61  ;;  %3966 = vmatprep.subr.bf16.mxu1 %v6128_v61  ;;  %v2075_v8 = vmul.f32 %v2019_v62, %v1907_v63  ;;  %v1913_v62 = vld [vmem:[%s4864_s27 + $0x110] sm:$0xff]  ;;  %v1916_v63 = vld [vmem:[%s4864_s27 + $0x128] sm:$0xff]  ;;  %v2029_v34 = vmul.f32 %v1973_v15, %v1973_v15 }
 0x239   : > { %1718 = vmatmul.mubr.f32.gmra.mrb[50].mxu0 %v5945_v12  ;;  %1825 = vmatmul.mubr.f32.gmra.mrb[50].mxu1 %v5945_v12  ;;  %v2076_v12 = vmul.f32 %v2020_v42, %v1908_v55  ;;  %v2023_v42 = vmul.f32 %v1967_v37, %v1967_v37  ;;  %v1971_v55 = vld [vmem:[%s4866_s13 + $0x120] sm:$0xff]  ;;  %v1976_v37 = vld [vmem:[%s4866_s13 + $0x148] sm:$0xff]  ;;  %v6207_v36 = vpack.c.bf16 %v2082_v26, %v2080_v52 }
 0x23a   : > { %3912 = vmatpush1.bf16.msra.mxu0 %v6135_v45  ;;  %3968 = vmatpush1.bf16.msra.mxu1 %v6135_v45  ;;  %v2027_v47 = vmul.f32 %v1971_v55, %v1971_v55  ;;  %v2081_v35 = vmul.f32 %v2025_v6, %v1913_v62  ;;  %v1975_v55 = vld [vmem:[%s4866_s13 + $0x140] sm:$0xff]  ;;  %v1980_v15 = vld [vmem:[%s4866_s13 + $0x168] sm:$0xff]  ;;  %v2085_v52 = vmul.f32 %v2029_v34, %v1917_v44  ;;  %v1922_v6 = vld [vmem:[%s4864_s27 + $0x158] sm:$0xff] }
 0x23b   : > { %3440 = vmatprep.mubr.msk.f32.mxu0 %vm850_vm0, %v5992_v38  ;;  %3461 = vmatprep.mubr.msk.f32.mxu1 %vm850_vm0, %v5992_v38  ;;  %v2077_v38 = vmul.f32 %v2021_v53, %v1909_v49  ;;  %v2030_v53 = vmul.f32 %v1974_v7, %v1974_v7  ;;  %v1918_v49 = vld [vmem:[%s4864_s27 + $0x138] sm:$0xff]  ;;  %v2084_v7 = vmul.f32 %v2028_v4, %v1916_v63  ;;  %v1920_v26 = vld [vmem:[%s4864_s27 + $0x148] sm:$0xff]  ;;  %v1919_v4 = vld [vmem:[%s4864_s27 + $0x140] sm:$0xff] }
 0x23c   : > { %3914 = vmatprep.subr.bf16.mxu0 %v6142_v13  ;;  %3970 = vmatprep.subr.bf16.mxu1 %v6142_v13  ;;  %v2031_v62 = vmul.f32 %v1975_v55, %v1975_v55  ;;  %v1924_v44 = vld [vmem:[%s4864_s27 + $0x168] sm:$0xff]  ;;  %v1926_v55 = vld [vmem:[%s4864_s27 + $0x178] sm:$0xff] }
 0x23d   : > { %1723 = vmatmul.mubr.f32.gmra.mrb[52].mxu0 %v5986_v25  ;;  %1830 = vmatmul.mubr.f32.gmra.mrb[52].mxu1 %v5986_v25  ;;  %v6190_v25 = vpack.c.bf16 %v2078_v1, %v2076_v12  ;;  %v2079_v12 = vmul.f32 %v2023_v42, %v1911_v60  ;;  %v1915_v1 = vld [vmem:[%s4864_s27 + $0x120] sm:$0xff]  ;;  %v2034_v42 = vmul.f32 %v1978_v24, %v1978_v24  ;;  %v1982_v60 = vld [vmem:[%s4866_s13 + $0x178] sm:$0xff] }
 0x23e   : > { %3916 = vmatpush1.bf16.msra.mxu0 %v6160_v0  ;;  %3972 = vmatpush1.bf16.msra.mxu1 %v6160_v0  ;;  %v2083_v30 = vmul.f32 %v2027_v47, %v1915_v1  ;;  %v2036_v47 = vmul.f32 %v1980_v15, %v1980_v15  ;;  %v2038_v34 = vmul.f32 %v1982_v60, %v1982_v60 }
 0x23f   : > { %3441 = vmatprep.mubr.msk.f32.mxu0 %vm850_vm0, %v6024_v9  ;;  %3462 = vmatprep.mubr.msk.f32.mxu1 %vm850_vm0, %v6024_v9  ;;  %v6201_v9 = vpack.c.bf16 %v2077_v38, %v2075_v8  ;;  %v2086_v8 = vmul.f32 %v2030_v53, %v1918_v49  ;;  %v2032_v38 = vmul.f32 %v1976_v37, %v1976_v37  ;;  %v1921_v49 = vld [vmem:[%s4864_s27 + $0x150] sm:$0xff] }
 0x240   : > { %3918 = vmatprep.subr.bf16.mxu0 %v6174_v40  ;;  %3974 = vmatprep.subr.bf16.mxu1 %v6174_v40  ;;  %v6224_v53 = vpack.c.bf16 %v2081_v35, %v2079_v12  ;;  %v1981_v37 = vld [vmem:[%s4866_s13 + $0x170] sm:$0xff]  ;;  %v2090_v1 = vmul.f32 %v2034_v42, %v1922_v6  ;;  %v1984_v12 = vld [vmem:[%s4866_s13 + $0x188] sm:$0xff]  ;;  %v6236_v35 = vpack.c.bf16 %v2085_v52, %v2083_v30  ;;  %v1983_v52 = vld [vmem:[%s4866_s13 + $0x180] sm:$0xff] }
 0x241   : > { %1728 = vmatmul.mubr.f32.gmra.mrb[54].mxu0 %v6017_v39  ;;  %1835 = vmatmul.mubr.f32.gmra.mrb[54].mxu1 %v6017_v39  ;;  %v1977_v39 = vld [vmem:[%s4866_s13 + $0x150] sm:$0xff]  ;;  %v2088_v24 = vmul.f32 %v2032_v38, %v1920_v26  ;;  %v2087_v15 = vmul.f32 %v2031_v62, %v1919_v4  ;;  %v2037_v11 = vmul.f32 %v1981_v37, %v1981_v37  ;;  %v1923_v38 = vld [vmem:[%s4864_s27 + $0x160] sm:$0xff]  ;;  %v1928_v6 = vld [vmem:[%s4864_s27 + $0x188] sm:$0xff] }
 0x242   : > { %3920 = vmatpush1.bf16.msra.mxu0 %v6176_v58  ;;  %3976 = vmatpush1.bf16.msra.mxu1 %v6176_v58  ;;  %v2033_v63 = vmul.f32 %v1977_v39, %v1977_v39  ;;  %v1986_v39 = vld [vmem:[%s4866_s13 + $0x198] sm:$0xff]  ;;  %v1925_v42 = vld [vmem:[%s4864_s27 + $0x170] sm:$0xff]  ;;  %v2040_v30 = vmul.f32 %v1984_v12, %v1984_v12 }
 0x243   : > { %3922 = vmatprep.subr.bf16.mxu0 %v6190_v25  ;;  %3978 = vmatprep.subr.bf16.mxu1 %v6190_v25  ;;  %v6246_v26 = vpack.c.bf16 %v2090_v1, %v2088_v24  ;;  %v2042_v4 = vmul.f32 %v1986_v39, %v1986_v39  ;;  %v1985_v62 = vld [vmem:[%s4866_s13 + $0x190] sm:$0xff]  ;;  %v2093_v37 = vmul.f32 %v2037_v11, %v1925_v42  ;;  %v1932_v42 = vld [vmem:[%s4864_s27 + $0x1a8] sm:$0xff] }
 0x244   : > { %3463 = vmatprep.mubr.msk.f32.mxu0 %vm850_vm0, %v4895_v10  ;;  %3477 = vmatprep.mubr.msk.f32.mxu1 %vm850_vm0, %v4908_v19  ;;  %v1979_v10 = vld [vmem:[%s4866_s13 + $0x160] sm:$0xff]  ;;  %v6231_v19 = vpack.c.bf16 %v2086_v8, %v2084_v7  ;;  %v2089_v60 = vmul.f32 %v2033_v63, %v1921_v49  ;;  %v2092_v7 = vmul.f32 %v2036_v47, %v1924_v44  ;;  %v1930_v63 = vld [vmem:[%s4864_s27 + $0x198] sm:$0xff]  ;;  %v1988_v49 = vld [vmem:[%s4866_s13 + $0x1a8] sm:$0xff] }
 0x245   : > { %v2035_v20 = vmul.f32 %v1979_v10, %v1979_v10  ;;  %v2094_v8 = vmul.f32 %v2038_v34, %v1926_v55  ;;  %v1990_v10 = vld [vmem:[%s4866_s13 + $0x1b8] sm:$0xff]  ;;  %v2039_v44 = vmul.f32 %v1983_v52, %v1983_v52  ;;  %v2096_v1 = vmul.f32 %v2040_v30, %v1928_v6  ;;  %v1927_v55 = vld [vmem:[%s4864_s27 + $0x180] sm:$0xff] }
 0x246   : > { %3924 = vmatpush1.bf16.msra.mxu0 %v6201_v9  ;;  %3980 = vmatpush1.bf16.msra.mxu1 %v6201_v9  ;;  %v6253_v47 = vpack.c.bf16 %v2089_v60, %v2087_v15  ;;  %v2041_v12 = vmul.f32 %v1985_v62, %v1985_v62  ;;  %v2098_v39 = vmul.f32 %v2042_v4, %v1930_v63  ;;  %v1987_v60 = vld [vmem:[%s4866_s13 + $0x1a0] sm:$0xff]  ;;  %v1934_v52 = vld [vmem:[%s4864_s27 + $0x1b8] sm:$0xff] }
 0x247   : > { %3926 = vmatprep.subr.bf16.mxu0 %v6207_v36  ;;  %3982 = vmatprep.subr.bf16.mxu1 %v6207_v36  ;;  %v2091_v34 = vmul.f32 %v2035_v20, %v1923_v38  ;;  %v6257_v24 = vpack.c.bf16 %v2094_v8, %v2092_v7  ;;  %v1929_v20 = vld [vmem:[%s4864_s27 + $0x190] sm:$0xff]  ;;  %v2044_v15 = vmul.f32 %v1988_v49, %v1988_v49  ;;  %v1931_v49 = vld [vmem:[%s4864_s27 + $0x1a0] sm:$0xff] }
 0x248   : > { %v2046_v11 = vmul.f32 %v1990_v10, %v1990_v10  ;;  %v1989_v38 = vld [vmem:[%s4866_s13 + $0x1b0] sm:$0xff]  ;;  %v2095_v7 = vmul.f32 %v2039_v44, %v1927_v55  ;;  %v2097_v8 = vmul.f32 %v2041_v12, %v1929_v20  ;;  %v2043_v30 = vmul.f32 %v1987_v60, %v1987_v60  ;;  %v7144_v12 = vld [vmem:[#allocation22_spill] sm:$0xff] }
 0x249   : > { %v6267_v29 = vpack.c.bf16 %v2093_v37, %v2091_v34  ;;  %v2045_v6 = vmul.f32 %v1989_v38, %v1989_v38  ;;  %v6273_v4 = vpack.c.bf16 %v2098_v39, %v2096_v1  ;;  %v2100_v62 = vmul.f32 %v2044_v15, %v1932_v42  ;;  %v1933_v10 = vld [vmem:[%s4864_s27 + $0x1b0] sm:$0xff]  ;;  %v7146_v39 = vld [vmem:[#allocation23_spill] sm:$0xff]  ;;  %v7150_v15 = vld [vmem:[#allocation24_spill] sm:$0xff] }
 0x24a   : > { %3928 = vmatpush1.bf16.msra.mxu0 %v6224_v53  ;;  %3984 = vmatpush1.bf16.msra.mxu1 %v6224_v53  ;;  %v2102_v63 = vmul.f32 %v2046_v11, %v1934_v52  ;;  %v6279_v34 = vpack.c.bf16 %v2097_v8, %v2095_v7  ;;  %v2099_v37 = vmul.f32 %v2043_v30, %v1931_v49  ;;  %v7148_v20 = vld [vmem:[#allocation29_spill] sm:$0xff]  ;;  %v7156_v60 = vld [vmem:[#allocation26_spill] sm:$0xff]  ;;  %v7158_v38 = vld [vmem:[#allocation28_spill] sm:$0xff] }
 0x24b   : > { %3930 = vmatprep.subr.bf16.mxu0 %v6231_v19  ;;  %3986 = vmatprep.subr.bf16.mxu1 %v6231_v19  ;;  %v2101_v44 = vmul.f32 %v2045_v6, %v1933_v10  ;;  %vm7145_vm2 = vcmp.eq.s32.totalorder %v4878_v2, %v7144_v12  ;;  %vm7147_vm1 = vcmp.eq.s32.totalorder %v4878_v2, %v7146_v39  ;;  %v7152_v11 = vld [vmem:[#allocation25_spill] sm:$0xff]  ;;  %v7162_v42 = vld [vmem:[#allocation27_spill] sm:$0xff]  ;;  %v7168_v7 = vld [vmem:[#allocation32_spill] sm:$0xff] }
 0x24c   : > { %v6283_v55 = vpack.c.bf16 %v2102_v63, %v2100_v62  ;;  %v7164_v52 = vld [vmem:[#allocation31_spill] sm:$0xff]  ;;  %v7170_v8 = vld [vmem:[#allocation36_spill] sm:$0xff] }
 0x24d   : > { %v6287_v1 = vpack.c.bf16 %v2101_v44, %v2099_v37  ;;  %v7174_v30 = vld [vmem:[#allocation35_spill] sm:$0xff]  ;;  %v7180_v62 = vld [vmem:[#allocation40_spill] sm:$0xff] }
 0x24e   : > { %3932 = vmatpush1.bf16.msra.mxu0 %v6236_v35  ;;  %3988 = vmatpush1.bf16.msra.mxu1 %v6236_v35  ;;  %v7176_v6 = vld [vmem:[#allocation39_spill] sm:$0xff]  ;;  %v7228_v10 = vld [vmem:[#allocation76_spill] sm:$0xff] }
 0x24f   : > { %3934 = vmatprep.subr.bf16.mxu0 %v6246_v26  ;;  %3990 = vmatprep.subr.bf16.mxu1 %v6246_v26  ;;  %v7182_v63 = vld [vmem:[#allocation43_spill] sm:$0xff] }
 0x250   : > { %v7227_v49 = vld [vmem:[#allocation75_spill] sm:$0xff] }
 0x252   : > { %3936 = vmatpush1.bf16.msra.mxu0 %v6253_v47  ;;  %3992 = vmatpush1.bf16.msra.mxu1 %v6253_v47 }
 0x253   : > { %3938 = vmatprep.subr.bf16.mxu0 %v6257_v24  ;;  %3994 = vmatprep.subr.bf16.mxu1 %v6257_v24 }
 0x256   : > { %3940 = vmatpush1.bf16.msra.mxu0 %v6267_v29  ;;  %3996 = vmatpush1.bf16.msra.mxu1 %v6267_v29 }
 0x257   : > { %3942 = vmatprep.subr.bf16.mxu0 %v6273_v4  ;;  %3998 = vmatprep.subr.bf16.mxu1 %v6273_v4 }
 0x25a   : > { %3944 = vmatpush1.bf16.msra.mxu0 %v6279_v34  ;;  %4000 = vmatpush1.bf16.msra.mxu1 %v6279_v34 }
 0x25b   : > { %3946 = vmatprep.subr.bf16.mxu0 %v6283_v55  ;;  %4002 = vmatprep.subr.bf16.mxu1 %v6283_v55 }
 0x25e   : > { %3948 = vmatpush1.bf16.msra.mxu0 %v6287_v1  ;;  %4004 = vmatpush1.bf16.msra.mxu1 %v6287_v1 }
 0x25f   : > { %4006 = vmatprep.subr.bf16.mxu0 %v6029_v57  ;;  %4062 = vmatprep.subr.bf16.mxu1 %v6029_v57  ;;  %v7149_v57 = vld [vmem:[#allocation30_spill] sm:$0xff] }
 0x261   : > { %3464 = vmatmul.mubr.msk.f32.vlgmr.msra.gmra.mrb[56].mxu0 %vm7145_vm2, %v7099_v54  ;;  %3478 = vmatmul.mubr.msk.f32.vlgmr.msra.gmra.mrb[56].mxu1 %vm7147_vm1, %v7099_v54  ;;  %vm7151_vm2 = vcmp.eq.s32.totalorder %v4878_v2, %v7150_v15  ;;  %vm7153_vm1 = vcmp.eq.s32.totalorder %v4878_v2, %v7152_v11 }
 0x262   : > { %4008 = vmatpush1.bf16.msra.mxu0 %v6031_v48  ;;  %4064 = vmatpush1.bf16.msra.mxu1 %v6031_v48  ;;  %v7154_v48 = vld [vmem:[#allocation33_spill] sm:$0xff] }
 0x263   : > { %4010 = vmatprep.subr.bf16.mxu0 %v6062_v3  ;;  %4066 = vmatprep.subr.bf16.mxu1 %v6062_v3  ;;  %v7155_v3 = vld [vmem:[#allocation34_spill] sm:$0xff] }
 0x264   : > { %3465 = vmatprep.mubr.msk.f32.mxu0 %vm850_vm0, %v7148_v20  ;;  %3479 = vmatprep.mubr.msk.f32.mxu1 %vm850_vm0, %v7149_v57 }
 0x265   : > { %3466 = vmatmul.mubr.msk.f32.gmra.mrb[58].mxu0 %vm7151_vm2, %v7099_v54  ;;  %3480 = vmatmul.mubr.msk.f32.gmra.mrb[58].mxu1 %vm7153_vm1, %v7099_v54  ;;  %vm7157_vm2 = vcmp.eq.s32.totalorder %v4878_v2, %v7156_v60  ;;  %vm7159_vm1 = vcmp.eq.s32.totalorder %v4878_v2, %v7158_v38 }
 0x266   : > { %4012 = vmatpush1.bf16.msra.mxu0 %v6069_v59  ;;  %4068 = vmatpush1.bf16.msra.mxu1 %v6069_v59  ;;  %v7160_v59 = vld [vmem:[#allocation37_spill] sm:$0xff] }
 0x267   : > { %4014 = vmatprep.subr.bf16.mxu0 %v6076_v21  ;;  %4070 = vmatprep.subr.bf16.mxu1 %v6076_v21  ;;  %v7161_v21 = vld [vmem:[#allocation38_spill] sm:$0xff] }
 0x268   : > { %3467 = vmatprep.mubr.msk.f32.mxu0 %vm850_vm0, %v7154_v48  ;;  %3481 = vmatprep.mubr.msk.f32.mxu1 %vm850_vm0, %v7155_v3 }
 0x269   : > { %3468 = vmatmul.mubr.msk.f32.gmra.mrb[60].mxu0 %vm7157_vm2, %v7099_v54  ;;  %3482 = vmatmul.mubr.msk.f32.gmra.mrb[60].mxu1 %vm7159_vm1, %v7099_v54  ;;  %vm7163_vm2 = vcmp.eq.s32.totalorder %v4878_v2, %v7162_v42  ;;  %vm7165_vm1 = vcmp.eq.s32.totalorder %v4878_v2, %v7164_v52 }
 0x26a   : > { %4016 = vmatpush1.bf16.msra.mxu0 %v6094_v46  ;;  %4072 = vmatpush1.bf16.msra.mxu1 %v6094_v46  ;;  %v7166_v46 = vld [vmem:[#allocation41_spill] sm:$0xff] }
 0x26b   : > { %4018 = vmatprep.subr.bf16.mxu0 %v6103_v5  ;;  %4074 = vmatprep.subr.bf16.mxu1 %v6103_v5  ;;  %v7167_v5 = vld [vmem:[#allocation42_spill] sm:$0xff] }
 0x26c   : > { %3469 = vmatprep.mubr.msk.f32.mxu0 %vm850_vm0, %v7160_v59  ;;  %3483 = vmatprep.mubr.msk.f32.mxu1 %vm850_vm0, %v7161_v21 }
 0x26d   : > { %3470 = vmatmul.mubr.msk.f32.gmra.mrb[62].mxu0 %vm7163_vm2, %v7099_v54  ;;  %3484 = vmatmul.mubr.msk.f32.gmra.mrb[62].mxu1 %vm7165_vm1, %v7099_v54  ;;  %vm7169_vm2 = vcmp.eq.s32.totalorder %v4878_v2, %v7168_v7  ;;  %vm7171_vm1 = vcmp.eq.s32.totalorder %v4878_v2, %v7170_v8 }
 0x26e   : > { %4020 = vmatpush1.bf16.msra.mxu0 %v6105_v32  ;;  %4076 = vmatpush1.bf16.msra.mxu1 %v6105_v32  ;;  %v7172_v32 = vld [vmem:[#allocation44_spill] sm:$0xff] }
 0x26f   : > { %4022 = vmatprep.subr.bf16.mxu0 %v6128_v61  ;;  %4078 = vmatprep.subr.bf16.mxu1 %v6128_v61  ;;  %v7173_v61 = vld [vmem:[#allocation45_spill] sm:$0xff] }
 0x270   : > { %3471 = vmatprep.mubr.msk.f32.mxu0 %vm850_vm0, %v7166_v46  ;;  %3485 = vmatprep.mubr.msk.f32.mxu1 %vm850_vm0, %v7167_v5 }
 0x271   : > { %3472 = vmatmul.mubr.msk.f32.gmra.mrb[64].mxu0 %vm7169_vm2, %v7099_v54  ;;  %3486 = vmatmul.mubr.msk.f32.gmra.mrb[64].mxu1 %vm7171_vm1, %v7099_v54  ;;  %vm7175_vm2 = vcmp.eq.s32.totalorder %v4878_v2, %v7174_v30  ;;  %vm7177_vm1 = vcmp.eq.s32.totalorder %v4878_v2, %v7176_v6 }
 0x272   : > { %4024 = vmatpush1.bf16.msra.mxu0 %v6135_v45  ;;  %4080 = vmatpush1.bf16.msra.mxu1 %v6135_v45  ;;  %v7178_v45 = vld [vmem:[#allocation46_spill] sm:$0xff] }
 0x273   : > { %4026 = vmatprep.subr.bf16.mxu0 %v6142_v13  ;;  %4082 = vmatprep.subr.bf16.mxu1 %v6142_v13  ;;  %v7179_v13 = vld [vmem:[#allocation47_spill] sm:$0xff] }
 0x274   : > { %3473 = vmatprep.mubr.msk.f32.mxu0 %vm850_vm0, %v7172_v32  ;;  %3487 = vmatprep.mubr.msk.f32.mxu1 %vm850_vm0, %v7173_v61 }
 0x275   : > { %3474 = vmatmul.mubr.msk.f32.gmra.mrb[66].mxu0 %vm7175_vm2, %v7099_v54  ;;  %3488 = vmatmul.mubr.msk.f32.gmra.mrb[66].mxu1 %vm7177_vm1, %v7099_v54  ;;  %vm7181_vm2 = vcmp.eq.s32.totalorder %v4878_v2, %v7180_v62  ;;  %vm7183_vm1 = vcmp.eq.s32.totalorder %v4878_v2, %v7182_v63 }
 0x276   : > { %4028 = vmatpush1.bf16.msra.mxu0 %v6160_v0  ;;  %4084 = vmatpush1.bf16.msra.mxu1 %v6160_v0  ;;  %v7184_v0 = vld [vmem:[#allocation48_spill] sm:$0xff] }
 0x277   : > { %4030 = vmatprep.subr.bf16.mxu0 %v6174_v40  ;;  %4086 = vmatprep.subr.bf16.mxu1 %v6174_v40  ;;  %v7185_v40 = vld [vmem:[#allocation49_spill] sm:$0xff] }
 0x278   : > { %3475 = vmatprep.mubr.msk.f32.mxu0 %vm850_vm0, %v7178_v45  ;;  %3489 = vmatprep.mubr.msk.f32.mxu1 %vm850_vm0, %v7179_v13 }
 0x279   : > { %3476 = vmatmul.mubr.msk.f32.gmra.mrb[68].mxu0 %vm7181_vm2, %v7099_v54  ;;  %3490 = vmatmul.mubr.msk.f32.gmra.mrb[68].mxu1 %vm7183_vm1, %v7099_v54  ;;  %vm7188_vm2 = vcmp.eq.s32.totalorder %v4878_v2, %v5310_v17  ;;  %vm7189_vm1 = vcmp.eq.s32.totalorder %v4878_v2, %v5321_v18 }
 0x27a   : > { %4032 = vmatpush1.bf16.msra.mxu0 %v6176_v58  ;;  %4088 = vmatpush1.bf16.msra.mxu1 %v6176_v58  ;;  %v7186_v58 = vld [vmem:[#allocation63_spill] sm:$0xff] }
 0x27b   : > { %4034 = vmatprep.subr.bf16.mxu0 %v6190_v25  ;;  %4090 = vmatprep.subr.bf16.mxu1 %v6190_v25  ;;  %v7190_v25 = vld [vmem:[#allocation50_spill] sm:$0xff] }
 0x27c   : > { %3491 = vmatprep.mubr.msk.f32.mxu0 %vm850_vm0, %v7184_v0  ;;  %3505 = vmatprep.mubr.msk.f32.mxu1 %vm850_vm0, %v7185_v40 }
 0x27e   : > { %4036 = vmatpush1.bf16.msra.mxu0 %v6201_v9  ;;  %4092 = vmatpush1.bf16.msra.mxu1 %v6201_v9  ;;  %v7191_v9 = vld [vmem:[#allocation51_spill] sm:$0xff] }
 0x27f   : > { %4038 = vmatprep.subr.bf16.mxu0 %v6207_v36  ;;  %4094 = vmatprep.subr.bf16.mxu1 %v6207_v36  ;;  %v7213_v36 = vld [vmem:[#allocation54_spill] sm:$0xff] }
 0x282   : > { %4040 = vmatpush1.bf16.msra.mxu0 %v6224_v53  ;;  %4096 = vmatpush1.bf16.msra.mxu1 %v6224_v53  ;;  %v7215_v53 = vld [vmem:[#allocation55_spill] sm:$0xff] }
 0x283   : > { %4042 = vmatprep.subr.bf16.mxu0 %v6231_v19  ;;  %4098 = vmatprep.subr.bf16.mxu1 %v6231_v19  ;;  %v7217_v19 = vld [vmem:[#allocation61_spill] sm:$0xff] }
 0x286   : > { %4044 = vmatpush1.bf16.msra.mxu0 %v6236_v35  ;;  %4100 = vmatpush1.bf16.msra.mxu1 %v6236_v35  ;;  %v7218_v35 = vld [vmem:[#allocation62_spill] sm:$0xff] }
 0x287   : > { %4046 = vmatprep.subr.bf16.mxu0 %v6246_v26  ;;  %4102 = vmatprep.subr.bf16.mxu1 %v6246_v26 }
 0x28a   : > { %4048 = vmatpush1.bf16.msra.mxu0 %v6253_v47  ;;  %4104 = vmatpush1.bf16.msra.mxu1 %v6253_v47 }
 0x28b   : > { %4050 = vmatprep.subr.bf16.mxu0 %v6257_v24  ;;  %4106 = vmatprep.subr.bf16.mxu1 %v6257_v24  ;;  %v7221_v24 = vld [vmem:[#allocation57_spill] sm:$0xff] }
 0x28e   : > { %4052 = vmatpush1.bf16.msra.mxu0 %v6267_v29  ;;  %4108 = vmatpush1.bf16.msra.mxu1 %v6267_v29  ;;  %v7187_v29 = vld [vmem:[#allocation64_spill] sm:$0xff] }
 0x28f   : > { %4054 = vmatprep.subr.bf16.mxu0 %v6273_v4  ;;  %4110 = vmatprep.subr.bf16.mxu1 %v6273_v4  ;;  %v7223_v4 = vld [vmem:[#allocation58_spill] sm:$0xff] }
 0x292   : > { %4056 = vmatpush1.bf16.msra.mxu0 %v6279_v34  ;;  %4112 = vmatpush1.bf16.msra.mxu1 %v6279_v34 }
 0x293   : > { %4058 = vmatprep.subr.bf16.mxu0 %v6283_v55  ;;  %4114 = vmatprep.subr.bf16.mxu1 %v6283_v55 }
 0x296   : > { %4060 = vmatpush1.bf16.msra.mxu0 %v6287_v1  ;;  %4116 = vmatpush1.bf16.msra.mxu1 %v6287_v1 }
 0x297   : > { %4119 = vmatprep.subr.msk.bf16.mxu0 %vm5621_vm13, %v7186_v58  ;;  %4134 = vmatprep.subr.msk.bf16.mxu1 %vm5621_vm13, %v7187_v29 }
 0x299   : > { %3492 = vmatmul.mubr.msk.f32.vlgmr.msra.gmra.mrb[70].mxu0 %vm7188_vm2, %v7099_v54  ;;  %3506 = vmatmul.mubr.msk.f32.vlgmr.msra.gmra.mrb[70].mxu1 %vm7189_vm1, %v7099_v54  ;;  %vm7193_vm2 = vcmp.eq.s32.totalorder %v4878_v2, %v5405_v14  ;;  %v7197_v14 = vld [vmem:[#allocation66_spill] sm:$0xff]  ;;  %vm7201_vm1 = vcmp.eq.s32.totalorder %v4878_v2, %v5441_v33 }
 0x29a   : > { %3493 = vmatprep.mubr.msk.f32.mxu0 %vm850_vm0, %v7190_v25  ;;  %3507 = vmatprep.mubr.msk.f32.mxu1 %vm850_vm0, %v7191_v9  ;;  %v7206_v33 = vld [vmem:[#allocation70_spill] sm:$0xff] }
 0x29d   : > { %3494 = vmatmul.mubr.msk.f32.gmra.mrb[72].mxu0 %vm7192_vm14, %v7099_v54  ;;  %3508 = vmatmul.mubr.msk.f32.gmra.mrb[72].mxu1 %vm7193_vm2, %v7099_v54  ;;  %vm7198_vm14 = vcmp.eq.s32.totalorder %v4878_v2, %v5416_v27  ;;  %v7202_v27 = vld [vmem:[#allocation56_spill] sm:$0xff] }
 0x29e   : > { %3495 = vmatprep.mubr.msk.f32.mxu0 %vm850_vm0, %v5460_v43  ;;  %3509 = vmatprep.mubr.msk.f32.mxu1 %vm850_vm0, %v5463_v50  ;;  %v7207_v50 = vld [vmem:[#allocation52_spill] sm:$0xff] }
 0x29f   : > { %4121 = vmatpush1.bf16.xpose.msk.msra.mxu0 %vm5645_vm9, %v7084_v51  ;;  %4136 = vmatpush1.bf16.xpose.msk.msra.mxu1 %vm5658_vm5, %v7084_v51  ;;  %vm7199_vm9 = vcmp.eq.s32.totalorder %v4878_v2, %v5419_v31  ;;  %vm7200_vm5 = vcmp.eq.s32.totalorder %v4878_v2, %v5438_v16  ;;  %v7205_v16 = vld [vmem:[#allocation69_spill] sm:$0xff]  ;;  %vm7208_vm2 = vcmp.eq.s32.totalorder %v4878_v2, %v7207_v50 }
 0x2a0   : > { %4124 = vmatprep.subr.msk.bf16.mxu0 %vm5621_vm13, %v7196_v56  ;;  %4139 = vmatprep.subr.msk.bf16.mxu1 %vm5621_vm13, %v7197_v14 }
 0x2a1   : > { %3496 = vmatmul.mubr.msk.f32.gmra.mrb[74].mxu0 %vm7198_vm14, %v7099_v54  ;;  %3510 = vmatmul.mubr.msk.f32.gmra.mrb[74].mxu1 %vm7199_vm9, %v7099_v54  ;;  %vm7216_vm14 = vcmp.eq.s32.totalorder %v4878_v2, %v7215_v53  ;;  %vm7222_vm9 = vcmp.eq.s32.totalorder %v4878_v2, %v7221_v24 }
 0x2a2   : > { %3497 = vmatprep.mubr.msk.f32.mxu0 %vm850_vm0, %v5492_v22  ;;  %3511 = vmatprep.mubr.msk.f32.mxu1 %vm850_vm0, %v5495_v23  ;;  %v7209_v22 = vld [vmem:[#allocation53_spill] sm:$0xff]  ;;  %v7211_v23 = vld [vmem:[#allocation59_spill] sm:$0xff] }
 0x2a5   : > { %3498 = vmatmul.mubr.msk.f32.gmra.mrb[76].mxu0 %vm7200_vm5, %v7099_v54  ;;  %3512 = vmatmul.mubr.msk.f32.gmra.mrb[76].mxu1 %vm7201_vm1, %v7099_v54  ;;  %vm7224_vm5 = vcmp.eq.s32.totalorder %v4878_v2, %v7223_v4  ;;  %vm1854_vm1 = vcmask 457728  }
 0x2a6   : > { %3499 = vmatprep.mubr.msk.f32.mxu0 %vm850_vm0, %v5524_v28  ;;  %3513 = vmatprep.mubr.msk.f32.mxu1 %vm850_vm0, %v7202_v27  ;;  %v7212_v28 = vld [vmem:[#allocation60_spill] sm:$0xff]  ;;  %v6573_v27 = vld [vmem:[#allocation10] sm:$0xff] }
 0x2a7   : > { %4126 = vmatpush1.bf16.xpose.msk.msra.mxu0 %vm5685_vm8, %v7084_v51  ;;  %4141 = vmatpush1.bf16.xpose.msk.msra.mxu1 %vm5698_vm7, %v7084_v51  ;;  %vm7210_vm8 = vcmp.eq.s32.totalorder %v4878_v2, %v7209_v22  ;;  %vm7214_vm7 = vcmp.eq.s32.totalorder %v4878_v2, %v7213_v36  ;;  %v6575_v22 = vld [vmem:[#allocation10 + $0x8] sm:$0xff] }
 0x2a8   : > { %4129 = vmatprep.subr.msk.bf16.mxu0 %vm5621_vm13, %v7205_v16  ;;  %4144 = vmatprep.subr.msk.bf16.mxu1 %vm5621_vm13, %v7206_v33 }
 0x2a9   : > { %3500 = vmatmul.mubr.msk.f32.gmra.mrb[78].mxu0 %vm7208_vm2, %v7099_v54  ;;  %3514 = vmatmul.mubr.msk.f32.gmra.mrb[78].mxu1 %vm7210_vm8, %v7099_v54 }
 0x2aa   : > { %3501 = vmatprep.mubr.msk.f32.mxu0 %vm850_vm0, %v7211_v23  ;;  %3515 = vmatprep.mubr.msk.f32.mxu1 %vm850_vm0, %v7212_v28 }
 0x2ad   : > { %3502 = vmatmul.mubr.msk.f32.gmra.mrb[80].mxu0 %vm7214_vm7, %v7099_v54  ;;  %3516 = vmatmul.mubr.msk.f32.gmra.mrb[80].mxu1 %vm7216_vm14, %v7099_v54 }
 0x2ae   : > { %3503 = vmatprep.mubr.msk.f32.mxu0 %vm850_vm0, %v7217_v19  ;;  %3517 = vmatprep.mubr.msk.f32.mxu1 %vm850_vm0, %v7218_v35 }
 0x2af   : > { %4131 = vmatpush1.bf16.xpose.msk.msra.mxu0 %vm5717_vm15, %v7084_v51  ;;  %4146 = vmatpush1.bf16.xpose.msk.msra.mxu1 %vm5730_vm4, %v7084_v51  ;;  %vm7225_vm4 = vcmp.eq.s32.totalorder %v4878_v2, %v7180_v62  ;;  %vm7226_vm15 = vcmp.eq.s32.totalorder %v4878_v2, %v7182_v63 }
 0x2b0   : > { %3531 = vmatprep.subr.msk.mxu0 %vm850_vm0, %v7178_v45  ;;  %3552 = vmatprep.subr.msk.mxu1 %vm850_vm0, %v7179_v13 }
 0x2b1   : > { %3504 = vmatmul.mubr.msk.f32.gmra.mrb[82].mxu0 %vm7222_vm9, %v7099_v54  ;;  %3518 = vmatmul.mubr.msk.f32.gmra.mrb[82].mxu1 %vm7224_vm5, %v7099_v54 }
 0x2b7   : > { %3532 = vmatpush1.xpose.msk.msra.mxu0 %vm7225_vm4, %v7099_v54  ;;  %3553 = vmatpush1.xpose.msk.msra.mxu1 %vm7226_vm15, %v7099_v54 }
 0x2b8   : > { %4149 = vmatprep.subr.msk.bf16.mxu0 %vm5621_vm13, %v7227_v49  ;;  %4164 = vmatprep.subr.msk.bf16.mxu1 %vm5621_vm13, %v7228_v10 }
 0x2e0   : > { %v1492_v34 = vpop.f32.mrb[28].mxu0  ;;  %v1592_v37 = vpop.f32.mrb[28].mxu1 }
 0x2e1   : > { %v1626_v44 = vmax.f32 %v1492_v34, %v1592_v37  ;;  %v1494_v55 = vpop.f32.mrb[29].mxu0  ;;  %v1594_v1 = vpop.f32.mrb[29].mxu1  ;;  %v6579_v34 = vld [vmem:[#allocation10 + $0x10] sm:$0xff] }
 0x2e4   : > { %v1497_v12 = vpop.f32.mrb[30].mxu0  ;;  %v1597_v39 = vpop.f32.mrb[30].mxu1 }
 0x2e5   : > { %v1627_v20 = vmax.f32 %v1497_v12, %v1597_v39  ;;  %v1499_v57 = vpop.f32.mrb[31].mxu0  ;;  %v1599_v15 = vpop.f32.mrb[31].mxu1 }
 0x2e8   : > { %v1502_v11 = vpop.f32.mrb[32].mxu0  ;;  %v1602_v48 = vpop.f32.mrb[32].mxu1 }
 0x2e9   : > { %v1628_v3 = vmax.f32 %v1502_v11, %v1602_v48  ;;  %v1504_v60 = vpop.f32.mrb[33].mxu0  ;;  %v1604_v38 = vpop.f32.mrb[33].mxu1  ;;  %v6584_v48 = vld [vmem:[#allocation10 + $0x18] sm:$0xff] }
 0x2ec   : > { %v1507_v59 = vpop.f32.mrb[34].mxu0  ;;  %v1607_v21 = vpop.f32.mrb[34].mxu1 }
 0x2ed   : > { %v1629_v42 = vmax.f32 %v1507_v59, %v1607_v21  ;;  %v1509_v52 = vpop.f32.mrb[35].mxu0  ;;  %v1609_v46 = vpop.f32.mrb[35].mxu1 }
 0x2f0   : > { %v1512_v5 = vpop.f32.mrb[36].mxu0  ;;  %v1612_v7 = vpop.f32.mrb[36].mxu1 }
 0x2f1   : > { %v1630_v8 = vmax.f32 %v1512_v5, %v1612_v7  ;;  %v1514_v32 = vpop.f32.mrb[37].mxu0  ;;  %v1614_v61 = vpop.f32.mrb[37].mxu1 }
 0x2f2   : > { %v6588_v32 = vld [vmem:[#allocation10 + $0x20] sm:$0xff] }
 0x2f4   : > { %v1517_v30 = vpop.f32.mrb[38].mxu0  ;;  %v1617_v6 = vpop.f32.mrb[38].mxu1 }
 0x2f5   : > { %v1631_v45 = vmax.f32 %v1517_v30, %v1617_v6  ;;  %v1519_v13 = vpop.f32.mrb[39].mxu0  ;;  %v1619_v62 = vpop.f32.mrb[39].mxu1 }
 0x2f8   : > { %v6567_v63 = vpop.f32.mrb[40].mxu0  ;;  %v6569_v0 = vpop.f32.mrb[40].mxu1 }
 0x2f9   : > { %v1632_v40 = vmax.f32 %v6567_v63, %v6569_v0  ;;  %v1524_v58 = vpop.f32.mrb[41].mxu0  ;;  %v1624_v29 = vpop.f32.mrb[41].mxu1 }
 0x2fc   : > { %v1699_v25 = vpop.f32.mrb[42].mxu0  ;;  %v1806_v9 = vpop.f32.mrb[42].mxu1 }
 0x2fd   : > { %v1733_v17 = vmax.f32 %v1626_v44, %v1699_v25  ;;  %v1701_v18 = vpop.f32.mrb[43].mxu0  ;;  %v1808_v56 = vpop.f32.mrb[43].mxu1 }
 0x2ff   : > { %v1840_v14 = vmax.f32 %v1733_v17, %v1806_v9  ;;  %v6592_v9 = vld [vmem:[#allocation10 + $0x28] sm:$0xff] }
 0x300   : > { %v1704_v31 = vpop.f32.mrb[44].mxu0  ;;  %v1811_v43 = vpop.f32.mrb[44].mxu1 }
 0x301   : > { %v1734_v16 = vmax.f32 %v1627_v20, %v1704_v31  ;;  %v1706_v33 = vpop.f32.mrb[45].mxu0  ;;  %v1813_v50 = vpop.f32.mrb[45].mxu1  ;;  %v1847_v23 = vmul.f32 %v1840_v14, %v6573_v27 }
 0x302   : > { %v6599_v50 = vld [vmem:[#allocation10 + $0x30] sm:$0xff] }
 0x303   : > { %v1841_v28 = vmax.f32 %v1734_v16, %v1811_v43  ;;  %v1855_v37 = vsel %vm1854_vm1, %v1847_v23, 0.0 }
 0x304   : > { %v1709_v36 = vpop.f32.mrb[46].mxu0  ;;  %v1816_v53 = vpop.f32.mrb[46].mxu1 }
 0x305   : > { %v1848_v26 = vmul.f32 %v1841_v28, %v6575_v22  ;;  %v1735_v47 = vmax.f32 %v1628_v3, %v1709_v36  ;;  %v1711_v49 = vpop.f32.mrb[47].mxu0  ;;  %v1818_v10 = vpop.f32.mrb[47].mxu1 }
 0x307   : > { %v1856_v44 = vsel %vm1854_vm1, %v1848_v26, 0.0  ;;  %v1842_v55 = vmax.f32 %v1735_v47, %v1816_v53 }
 0x308   : > { %v1857_v1 = vadd.f32 %v1856_v44, %v1855_v37  ;;  %v1714_v12 = vpop.f32.mrb[48].mxu0  ;;  %v1821_v39 = vpop.f32.mrb[48].mxu1 }
 0x309   : > { %v1849_v20 = vmul.f32 %v1842_v55, %v6579_v34  ;;  %v1736_v57 = vmax.f32 %v1629_v42, %v1714_v12  ;;  %v1716_v15 = vpop.f32.mrb[49].mxu0  ;;  %v1823_v11 = vpop.f32.mrb[49].mxu1 }
 0x30b   : > { %v1858_v3 = vsel %vm1854_vm1, %v1849_v20, 0.0  ;;  %v1843_v60 = vmax.f32 %v1736_v57, %v1821_v39 }
 0x30c   : > { %v1859_v38 = vadd.f32 %v1858_v3, %v1857_v1  ;;  %v1719_v59 = vpop.f32.mrb[50].mxu0  ;;  %v1826_v21 = vpop.f32.mrb[50].mxu1 }
 0x30d   : > { %v1850_v52 = vmul.f32 %v1843_v60, %v6584_v48  ;;  %v1737_v46 = vmax.f32 %v1630_v8, %v1719_v59  ;;  %v1721_v5 = vpop.f32.mrb[51].mxu0  ;;  %v1828_v7 = vpop.f32.mrb[51].mxu1 }
 0x30f   : > { %v1860_v61 = vsel %vm1854_vm1, %v1850_v52, 0.0  ;;  %v1844_v42 = vmax.f32 %v1737_v46, %v1826_v21 }
 0x310   : > { %v1861_v30 = vadd.f32 %v1860_v61, %v1859_v38  ;;  %v1724_v6 = vpop.f32.mrb[52].mxu0  ;;  %v1831_v13 = vpop.f32.mrb[52].mxu1 }
 0x311   : > { %v1851_v62 = vmul.f32 %v1844_v42, %v6588_v32  ;;  %v1738_v58 = vmax.f32 %v1631_v45, %v1724_v6  ;;  %v1726_v29 = vpop.f32.mrb[53].mxu0  ;;  %v1833_v25 = vpop.f32.mrb[53].mxu1 }
 0x313   : > { %v1862_v17 = vsel %vm1854_vm1, %v1851_v62, 0.0  ;;  %v1845_v8 = vmax.f32 %v1738_v58, %v1831_v13 }
 0x314   : > { %v1729_v18 = vpop.f32.mrb[54].mxu0  ;;  %v1836_v56 = vpop.f32.mrb[54].mxu1  ;;  %v1863_v14 = vadd.f32 %v1862_v17, %v1861_v30 }
 0x315   : > { %v1852_v31 = vmul.f32 %v1845_v8, %v6592_v9  ;;  %v1739_v43 = vmax.f32 %v1632_v40, %v1729_v18  ;;  %v1731_v16 = vpop.f32.mrb[55].mxu0  ;;  %v1838_v33 = vpop.f32.mrb[55].mxu1 }
 0x317   : > { %v1846_v45 = vmax.f32 %v1739_v43, %v1836_v56  ;;  %v1864_v23 = vsel %vm1854_vm1, %v1852_v31, 0.0 }
 0x318   : > { %v1865_v28 = vadd.f32 %v1864_v23, %v1863_v14 }
 0x319   : > { %v1853_v36 = vmul.f32 %v1846_v45, %v6599_v50 }
 0x31b   : > { %v1866_v53 = vsel %vm1854_vm1, %v1853_v36, 0.0 }
 0x31c   : > { %v1867_v26 = vadd.f32 %v1866_v53, %v1865_v28 }
 0x31e   : > { %1868 = vadd.xlane.f32.xlu0 %v1867_v26 }
 0x334   : > { %v2169_v47 = vpop.f32.mrb[56].mxu0  ;;  %v2276_v49 = vpop.f32.mrb[56].mxu1 }
 0x335   : > { %v2317_v10 = vmax.f32 %v2169_v47, %v2276_v49  ;;  %v2171_v37 = vpop.f32.mrb[57].mxu0  ;;  %v2278_v63 = vpop.f32.mrb[57].mxu1 }
 0x336   : > { %v2318_v0 = vmax.f32 %v2171_v37, %v2278_v63 }
 0x338   : > { %v2175_v40 = vpop.f32.mrb[58].mxu0  ;;  %v2282_v44 = vpop.f32.mrb[58].mxu1 }
 0x339   : > { %v2319_v55 = vmax.f32 %v2175_v40, %v2282_v44  ;;  %v2177_v1 = vpop.f32.mrb[59].mxu0  ;;  %v2284_v12 = vpop.f32.mrb[59].mxu1 }
 0x33a   : > { %v2320_v39 = vmax.f32 %v2177_v1, %v2284_v12  ;;  %v7235_v12 = vld [vmem:[#allocation82_spill] sm:$0xff] }
 0x33c   : > { %v2181_v20 = vpop.f32.mrb[60].mxu0  ;;  %v2288_v57 = vpop.f32.mrb[60].mxu1 }
 0x33d   : > { %v2321_v15 = vmax.f32 %v2181_v20, %v2288_v57  ;;  %v2183_v11 = vpop.f32.mrb[61].mxu0  ;;  %v2290_v3 = vpop.f32.mrb[61].mxu1 }
 0x33e   : > { %v2322_v60 = vmax.f32 %v2183_v11, %v2290_v3 }
 0x340   : > { %v6604_v38 = vpop.f32.mrb[62].mxu0  ;;  %v2294_v59 = vpop.f32.mrb[62].mxu1 }
 0x341   : > { %v2323_v21 = vmax.f32 %v6604_v38, %v2294_v59  ;;  %v6607_v52 = vpop.f32.mrb[63].mxu0  ;;  %v2296_v46 = vpop.f32.mrb[63].mxu1  ;;  %v7231_v38 = vld [vmem:[#allocation78_spill] sm:$0xff]  ;;  %v7232_v59 = vld [vmem:[#allocation79_spill] sm:$0xff] }
 0x342   : > { %v2324_v5 = vmax.f32 %v6607_v52, %v2296_v46 }
 0x344   : > { %v6610_v7 = vpop.f32.mrb[64].mxu0  ;;  %v6612_v61 = vpop.f32.mrb[64].mxu1 }
 0x345   : > { %v2325_v42 = vmax.f32 %v6610_v7, %v6612_v61  ;;  %v6616_v30 = vpop.f32.mrb[65].mxu0  ;;  %v6618_v6 = vpop.f32.mrb[65].mxu1 }
 0x346   : > { %v2326_v13 = vmax.f32 %v6616_v30, %v6618_v6 }
 0x348   : > { %v6622_v62 = vpop.f32.mrb[66].mxu0  ;;  %v6624_v58 = vpop.f32.mrb[66].mxu1 }
 0x349   : > { %v2327_v29 = vmax.f32 %v6622_v62, %v6624_v58  ;;  %v6628_v25 = vpop.f32.mrb[67].mxu0  ;;  %v6630_v17 = vpop.f32.mrb[67].mxu1  ;;  %v7238_v58 = vld [vmem:[#allocation86_spill] sm:$0xff] }
 0x34a   : > { %v2328_v8 = vmax.f32 %v6628_v25, %v6630_v17 }
 0x34c   : > { %v6634_v18 = vpop.f32.mrb[68].mxu0  ;;  %v6636_v56 = vpop.f32.mrb[68].mxu1 }
 0x34d   : > { %v2329_v14 = vmax.f32 %v6634_v18, %v6636_v56  ;;  %v6640_v31 = vpop.f32.mrb[69].mxu0  ;;  %v6642_v43 = vpop.f32.mrb[69].mxu1 }
 0x34e   : > { %v2330_v16 = vmax.f32 %v6640_v31, %v6642_v43 }
 0x36c   : > { %v2397_v33 = vpop.f32.mrb[70].mxu0  ;;  %v2518_v45 = vpop.f32.mrb[70].mxu1 }
 0x36d   : > { %v2438_v23 = vmax.f32 %v2317_v10, %v2397_v33  ;;  %v2399_v28 = vpop.f32.mrb[71].mxu0  ;;  %v2520_v36 = vpop.f32.mrb[71].mxu1 }
 0x36e   : > { %v2439_v53 = vmax.f32 %v2318_v0, %v2399_v28 }
 0x36f   : > { %v6646_v26 = vmax.f32 %v2438_v23, %v2518_v45 }
 0x370   : > { %v6648_v47 = vmax.f32 %v2439_v53, %v2520_v36  ;;  %v2403_v49 = vpop.f32.mrb[72].mxu0  ;;  %v2524_v37 = vpop.f32.mrb[72].mxu1 }
 0x371   : > { %v2440_v63 = vmax.f32 %v2319_v55, %v2403_v49  ;;  %v2405_v40 = vpop.f32.mrb[73].mxu0  ;;  %v2526_v44 = vpop.f32.mrb[73].mxu1 }
 0x372   : > { %v2441_v1 = vmax.f32 %v2320_v39, %v2405_v40  ;;  %3533 = vmatprep.mubr.msk.f32.mxu0 %vm850_vm0, %v6648_v47  ;;  %3554 = vmatprep.mubr.msk.f32.mxu1 %vm850_vm0, %v6648_v47 }
 0x373   : > { %v6654_v10 = vmax.f32 %v2440_v63, %v2524_v37  ;;  %2659 = vmatmul.mubr.f32.vlgmr.msra.gmra.mrb[84].mxu0 %v6646_v26  ;;  %2759 = vmatmul.mubr.f32.vlgmr.msra.gmra.mrb[84].mxu1 %v6646_v26 }
 0x374   : > { %v6658_v0 = vmax.f32 %v2441_v1, %v2526_v44  ;;  %4151 = vmatpush1.bf16.xpose.msk.msra.mxu0 %vm5821_vm12, %v7084_v51  ;;  %v2409_v55 = vpop.f32.mrb[74].mxu0  ;;  %4166 = vmatpush1.bf16.xpose.msk.msra.mxu1 %vm5839_vm11, %v7084_v51  ;;  %v2530_v20 = vpop.f32.mrb[74].mxu1 }
 0x375   : > { %v2442_v57 = vmax.f32 %v2321_v15, %v2409_v55  ;;  %v2411_v11 = vpop.f32.mrb[75].mxu0  ;;  %v2532_v3 = vpop.f32.mrb[75].mxu1  ;;  %4154 = vmatprep.subr.msk.bf16.mxu0 %vm5621_vm13, %v7231_v38  ;;  %4169 = vmatprep.subr.msk.bf16.mxu1 %vm5621_vm13, %v7232_v59  ;;  %v7236_v55 = vld [vmem:[#allocation83_spill] sm:$0xff] }
 0x376   : > { %v2443_v52 = vmax.f32 %v2322_v60, %v2411_v11  ;;  %3534 = vmatprep.mubr.msk.f32.mxu0 %vm850_vm0, %v6658_v0  ;;  %3555 = vmatprep.mubr.msk.f32.mxu1 %vm850_vm0, %v6658_v0 }
 0x377   : > { %v6676_v46 = vmax.f32 %v2442_v57, %v2530_v20  ;;  %2664 = vmatmul.mubr.f32.gmra.mrb[86].mxu0 %v6654_v10  ;;  %2764 = vmatmul.mubr.f32.gmra.mrb[86].mxu1 %v6654_v10 }
 0x378   : > { %v6680_v15 = vmax.f32 %v2443_v52, %v2532_v3  ;;  %v2415_v33 = vpop.f32.mrb[76].mxu0  ;;  %v2536_v45 = vpop.f32.mrb[76].mxu1 }
 0x379   : > { %v2444_v23 = vmax.f32 %v2323_v21, %v2415_v33  ;;  %v2417_v28 = vpop.f32.mrb[77].mxu0  ;;  %v2538_v36 = vpop.f32.mrb[77].mxu1 }
 0x37a   : > { %v2445_v60 = vmax.f32 %v2324_v5, %v2417_v28  ;;  %3535 = vmatprep.mubr.msk.f32.mxu0 %vm850_vm0, %v6680_v15  ;;  %3556 = vmatprep.mubr.msk.f32.mxu1 %vm850_vm0, %v6680_v15 }
 0x37b   : > { %v6686_v53 = vmax.f32 %v2444_v23, %v2536_v45  ;;  %2669 = vmatmul.mubr.f32.gmra.mrb[88].mxu0 %v6676_v46  ;;  %2769 = vmatmul.mubr.f32.gmra.mrb[88].mxu1 %v6676_v46 }
 0x37c   : > { %v6690_v49 = vmax.f32 %v2445_v60, %v2538_v36  ;;  %4156 = vmatpush1.bf16.xpose.msk.msra.mxu0 %vm5881_vm3, %v7084_v51  ;;  %v2421_v21 = vpop.f32.mrb[78].mxu0  ;;  %4171 = vmatpush1.bf16.xpose.msk.msra.mxu1 %vm5902_vm10, %v7084_v51  ;;  %v2542_v63 = vpop.f32.mrb[78].mxu1  ;;  %vm7239_vm3 = vnez %v7238_v58  ;;  %vm7240_vm10 = vmmov %vm7222_vm9 }
 0x37d   : > { %v2446_v40 = vmax.f32 %v2325_v42, %v2421_v21  ;;  %v2423_v44 = vpop.f32.mrb[79].mxu0  ;;  %v2544_v1 = vpop.f32.mrb[79].mxu1  ;;  %4159 = vmatprep.subr.msk.bf16.mxu0 %vm5621_vm13, %v7235_v12  ;;  %4174 = vmatprep.subr.msk.bf16.mxu1 %vm5621_vm13, %v7236_v55  ;;  %vm7241_vm13 = vmmov %vm7224_vm5 }
 0x37e   : > { %v2447_v39 = vmax.f32 %v2326_v13, %v2423_v44  ;;  %3536 = vmatprep.mubr.msk.f32.mxu0 %vm850_vm0, %v6690_v49  ;;  %3557 = vmatprep.mubr.msk.f32.mxu1 %vm850_vm0, %v6690_v49 }
 0x37f   : > { %v2567_v7 = vmax.f32 %v2446_v40, %v2542_v63  ;;  %2674 = vmatmul.mubr.f32.gmra.mrb[90].mxu0 %v6686_v53  ;;  %2774 = vmatmul.mubr.f32.gmra.mrb[90].mxu1 %v6686_v53 }
 0x380   : > { %v2568_v61 = vmax.f32 %v2447_v39, %v2544_v1  ;;  %v2427_v42 = vpop.f32.mrb[80].mxu0  ;;  %v2548_v20 = vpop.f32.mrb[80].mxu1 }
 0x381   : > { %v2448_v41 = vmax.f32 %v2327_v29, %v2427_v42  ;;  %v2429_v30 = vpop.f32.mrb[81].mxu0  ;;  %v2550_v6 = vpop.f32.mrb[81].mxu1 }
 0x382   : > { %v2449_v13 = vmax.f32 %v2328_v8, %v2429_v30  ;;  %3537 = vmatprep.mubr.msk.f32.mxu0 %vm850_vm0, %v2568_v61  ;;  %3558 = vmatprep.mubr.msk.f32.mxu1 %vm850_vm0, %v2568_v61 }
 0x383   : > { %v2569_v57 = vmax.f32 %v2448_v41, %v2548_v20  ;;  %2679 = vmatmul.mubr.f32.gmra.mrb[92].mxu0 %v2567_v7  ;;  %2779 = vmatmul.mubr.f32.gmra.mrb[92].mxu1 %v2567_v7 }
 0x384   : > { %v2570_v11 = vmax.f32 %v2449_v13, %v2550_v6  ;;  %4161 = vmatpush1.bf16.xpose.msk.msra.mxu0 %vm5957_vm6, %v7084_v51  ;;  %v2433_v62 = vpop.f32.mrb[82].mxu0  ;;  %4176 = vmatpush1.bf16.xpose.msk.msra.mxu1 %vm7239_vm3, %v7084_v51  ;;  %v2554_v29 = vpop.f32.mrb[82].mxu1 }
 0x385   : > { %v2450_v25 = vmax.f32 %v2329_v14, %v2433_v62  ;;  %v2435_v17 = vpop.f32.mrb[83].mxu0  ;;  %v2556_v8 = vpop.f32.mrb[83].mxu1  ;;  %3573 = vmatprep.subr.msk.mxu0 %vm850_vm0, %v7217_v19  ;;  %3594 = vmatprep.subr.msk.mxu1 %vm850_vm0, %v7218_v35 }
 0x386   : > { %v2451_v38 = vmax.f32 %v2330_v16, %v2435_v17  ;;  %3538 = vmatprep.mubr.msk.f32.mxu0 %vm850_vm0, %v2570_v11  ;;  %3559 = vmatprep.mubr.msk.f32.mxu1 %vm850_vm0, %v2570_v11 }
 0x387   : > { %v2571_v51 = vmax.f32 %v2450_v25, %v2554_v29  ;;  %2684 = vmatmul.mubr.f32.gmra.mrb[94].mxu0 %v2569_v57  ;;  %2784 = vmatmul.mubr.f32.gmra.mrb[94].mxu1 %v2569_v57 }
 0x388   : > { %v2572_v18 = vmax.f32 %v2451_v38, %v2556_v8 }
 0x38a   : > { %3539 = vmatprep.mubr.msk.f32.mxu0 %vm850_vm0, %v2572_v18  ;;  %3560 = vmatprep.mubr.msk.f32.mxu1 %vm850_vm0, %v2572_v18 }
 0x38b   : > { %2689 = vmatmul.mubr.f32.gmra.mrb[96].mxu0 %v2571_v51  ;;  %2789 = vmatmul.mubr.f32.gmra.mrb[96].mxu1 %v2571_v51 }
 0x38c   : > { %3574 = vmatpush1.xpose.msk.msra.mxu0 %vm7240_vm10, %v7099_v54  ;;  %3575 = vmatprep.mubr.msk.f32.mxu0 %vm850_vm0, %v6648_v47 }
 0x38d   : > { %3595 = vmatpush1.xpose.msk.msra.mxu1 %vm7241_vm13, %v7099_v54  ;;  %3596 = vmatprep.mubr.msk.f32.mxu1 %vm850_vm0, %v6648_v47 }
 0x38f   : > { %2866 = vmatmul.mubr.f32.vlgmr.msra.gmra.mrb[98].mxu0 %v6646_v26 }
 0x390   : > { %2973 = vmatmul.mubr.f32.vlgmr.msra.gmra.mrb[98].mxu1 %v6646_v26  ;;  %3576 = vmatprep.mubr.msk.f32.mxu0 %vm850_vm0, %v6658_v0 }
 0x391   : > { %3597 = vmatprep.mubr.msk.f32.mxu1 %vm850_vm0, %v6658_v0 }
 0x393   : > { %2871 = vmatmul.mubr.f32.gmra.mrb[100].mxu0 %v6654_v10 }
 0x394   : > { %2978 = vmatmul.mubr.f32.gmra.mrb[100].mxu1 %v6654_v10  ;;  %3577 = vmatprep.mubr.msk.f32.mxu0 %vm850_vm0, %v6680_v15 }
 0x395   : > { %3598 = vmatprep.mubr.msk.f32.mxu1 %vm850_vm0, %v6680_v15 }
 0x397   : > { %2876 = vmatmul.mubr.f32.gmra.mrb[102].mxu0 %v6676_v46 }
 0x398   : > { %2983 = vmatmul.mubr.f32.gmra.mrb[102].mxu1 %v6676_v46  ;;  %3578 = vmatprep.mubr.msk.f32.mxu0 %vm850_vm0, %v6690_v49 }
 0x399   : > { %3599 = vmatprep.mubr.msk.f32.mxu1 %vm850_vm0, %v6690_v49 }
 0x39b   : > { %2881 = vmatmul.mubr.f32.gmra.mrb[104].mxu0 %v6686_v53 }
 0x39c   : > { %2988 = vmatmul.mubr.f32.gmra.mrb[104].mxu1 %v6686_v53  ;;  %3579 = vmatprep.mubr.msk.f32.mxu0 %vm850_vm0, %v2568_v61 }
 0x39d   : > { %3600 = vmatprep.mubr.msk.f32.mxu1 %vm850_vm0, %v2568_v61 }
 0x39f   : > { %2886 = vmatmul.mubr.f32.gmra.mrb[106].mxu0 %v2567_v7 }
 0x3a0   : > { %2993 = vmatmul.mubr.f32.gmra.mrb[106].mxu1 %v2567_v7  ;;  %3580 = vmatprep.mubr.msk.f32.mxu0 %vm850_vm0, %v2570_v11 }
 0x3a1   : > { %3601 = vmatprep.mubr.msk.f32.mxu1 %vm850_vm0, %v2570_v11 }
 0x3a3   : > { %2891 = vmatmul.mubr.f32.gmra.mrb[108].mxu0 %v2569_v57 }
 0x3a4   : > { %2998 = vmatmul.mubr.f32.gmra.mrb[108].mxu1 %v2569_v57  ;;  %3581 = vmatprep.mubr.msk.f32.mxu0 %vm850_vm0, %v2572_v18 }
 0x3a5   : > { %3602 = vmatprep.mubr.msk.f32.mxu1 %vm850_vm0, %v2572_v18 }
 0x3a7   : > { %2896 = vmatmul.mubr.f32.gmra.mrb[110].mxu0 %v2571_v51 }
 0x3a8   : > { %3003 = vmatmul.mubr.f32.gmra.mrb[110].mxu1 %v2571_v51 }
 0x3ab   : > { %v1869_v2 = vpop.xlane.xlu0 %1868 }
 0x3ac   : > { %v1870_v54 = vrot.slane %v1869_v2, 4 }
 0x3ae   : > { %v1871_v19 = vadd.f32 %v1870_v54, %v1869_v2 }
 0x3b0   : > { %v1872_v35 = vrot.slane %v1871_v19, 2 }
 0x3b2   : > { %v1873_v24 = vadd.f32 %v1872_v35, %v1871_v19 }
 0x3b4   : > { %v1874_v4 = vrot.slane %v1873_v24, 1 }
 0x3b6   : > { %v1875_v56 = vadd.f32 %v1874_v4, %v1873_v24 }
 0x3b8   : > { %4186 = vpush %v1875_v56 }
 0x3e9   : > { %s4187_s17 = spop %4186 }
 0x3ea   : > { %v1877_v14 = vstv %s4187_s17 }
 0x3eb   : > { %1878 = vst [vmem:[%s6785_s26] sm:$0xff] %v1877_v14 }
 0x446   : > { %v2660_v31 = vpop.f32.mrb[84].mxu0  ;;  %v2760_v43 = vpop.f32.mrb[84].mxu1 }
 0x447   : > { %v2794_v16 = vmax.f32 %v2660_v31, %v2760_v43  ;;  %v2662_v26 = vpop.f32.mrb[85].mxu0  ;;  %v2762_v47 = vpop.f32.mrb[85].mxu1 }
 0x44a   : > { %v2665_v10 = vpop.f32.mrb[86].mxu0  ;;  %v2765_v0 = vpop.f32.mrb[86].mxu1 }
 0x44b   : > { %v2795_v59 = vmax.f32 %v2665_v10, %v2765_v0  ;;  %v2667_v52 = vpop.f32.mrb[87].mxu0  ;;  %v2767_v46 = vpop.f32.mrb[87].mxu1 }
 0x44e   : > { %v2670_v15 = vpop.f32.mrb[88].mxu0  ;;  %v2770_v33 = vpop.f32.mrb[88].mxu1 }
 0x44f   : > { %v2796_v45 = vmax.f32 %v2670_v15, %v2770_v33  ;;  %v2672_v23 = vpop.f32.mrb[89].mxu0  ;;  %v2772_v28 = vpop.f32.mrb[89].mxu1 }
 0x452   : > { %v2675_v36 = vpop.f32.mrb[90].mxu0  ;;  %v2775_v60 = vpop.f32.mrb[90].mxu1 }
 0x453   : > { %v2797_v53 = vmax.f32 %v2675_v36, %v2775_v60  ;;  %v2677_v49 = vpop.f32.mrb[91].mxu0  ;;  %v2777_v37 = vpop.f32.mrb[91].mxu1 }
 0x456   : > { %v2680_v21 = vpop.f32.mrb[92].mxu0  ;;  %v2780_v5 = vpop.f32.mrb[92].mxu1 }
 0x457   : > { %v2798_v63 = vmax.f32 %v2680_v21, %v2780_v5  ;;  %v2682_v40 = vpop.f32.mrb[93].mxu0  ;;  %v2782_v44 = vpop.f32.mrb[93].mxu1 }
 0x45a   : > { %v2685_v1 = vpop.f32.mrb[94].mxu0  ;;  %v2785_v12 = vpop.f32.mrb[94].mxu1 }
 0x45b   : > { %v2799_v55 = vmax.f32 %v2685_v1, %v2785_v12  ;;  %v2687_v39 = vpop.f32.mrb[95].mxu0  ;;  %v2787_v7 = vpop.f32.mrb[95].mxu1 }
 0x45e   : > { %v2690_v61 = vpop.f32.mrb[96].mxu0  ;;  %v2790_v42 = vpop.f32.mrb[96].mxu1 }
 0x45f   : > { %v2800_v20 = vmax.f32 %v2690_v61, %v2790_v42  ;;  %v2692_v41 = vpop.f32.mrb[97].mxu0  ;;  %v2792_v30 = vpop.f32.mrb[97].mxu1 }
 0x462   : > { %v2867_v6 = vpop.f32.mrb[98].mxu0 }
 0x463   : > { %v2901_v13 = vmax.f32 %v2794_v16, %v2867_v6  ;;  %v2974_v57 = vpop.f32.mrb[98].mxu1  ;;  %v2869_v11 = vpop.f32.mrb[99].mxu0 }
 0x464   : > { %v2976_v3 = vpop.f32.mrb[99].mxu1 }
 0x465   : > { %v3008_v62 = vmax.f32 %v2901_v13, %v2974_v57 }
 0x466   : > { %v2872_v58 = vpop.f32.mrb[100].mxu0 }
 0x467   : > { %v2902_v29 = vmax.f32 %v2795_v59, %v2872_v58  ;;  %v2979_v25 = vpop.f32.mrb[100].mxu1  ;;  %v2874_v17 = vpop.f32.mrb[101].mxu0  ;;  %v3015_v38 = vmul.f32 %v3008_v62, %v6573_v27 }
 0x468   : > { %v2981_v8 = vpop.f32.mrb[101].mxu1 }
 0x469   : > { %v3009_v51 = vmax.f32 %v2902_v29, %v2979_v25  ;;  %v3022_v4 = vsel %vm1854_vm1, %v3015_v38, 0.0 }
 0x46a   : > { %v2877_v18 = vpop.f32.mrb[102].mxu0 }
 0x46b   : > { %v3016_v2 = vmul.f32 %v3009_v51, %v6575_v22  ;;  %v2903_v54 = vmax.f32 %v2796_v45, %v2877_v18  ;;  %v2984_v19 = vpop.f32.mrb[102].mxu1  ;;  %v2879_v35 = vpop.f32.mrb[103].mxu0 }
 0x46c   : > { %v2986_v24 = vpop.f32.mrb[103].mxu1 }
 0x46d   : > { %v3023_v56 = vsel %vm1854_vm1, %v3016_v2, 0.0  ;;  %v3010_v14 = vmax.f32 %v2903_v54, %v2984_v19 }
 0x46e   : > { %v3024_v31 = vadd.f32 %v3023_v56, %v3022_v4  ;;  %v2882_v43 = vpop.f32.mrb[104].mxu0 }
 0x46f   : > { %v3017_v16 = vmul.f32 %v3010_v14, %v6579_v34  ;;  %v2904_v26 = vmax.f32 %v2797_v53, %v2882_v43  ;;  %v2989_v47 = vpop.f32.mrb[104].mxu1  ;;  %v2884_v27 = vpop.f32.mrb[105].mxu0 }
 0x470   : > { %v2991_v10 = vpop.f32.mrb[105].mxu1 }
 0x471   : > { %v3025_v0 = vsel %vm1854_vm1, %v3017_v16, 0.0  ;;  %v3011_v22 = vmax.f32 %v2904_v26, %v2989_v47 }
 0x472   : > { %v3026_v59 = vadd.f32 %v3025_v0, %v3024_v31  ;;  %v2887_v52 = vpop.f32.mrb[106].mxu0 }
 0x473   : > { %v3018_v46 = vmul.f32 %v3011_v22, %v6584_v48  ;;  %v2905_v15 = vmax.f32 %v2798_v63, %v2887_v52  ;;  %v2994_v33 = vpop.f32.mrb[106].mxu1  ;;  %v2889_v45 = vpop.f32.mrb[107].mxu0 }
 0x474   : > { %v2996_v23 = vpop.f32.mrb[107].mxu1 }
 0x475   : > { %v3027_v28 = vsel %vm1854_vm1, %v3018_v46, 0.0  ;;  %v3012_v36 = vmax.f32 %v2905_v15, %v2994_v33 }
 0x476   : > { %v3028_v60 = vadd.f32 %v3027_v28, %v3026_v59  ;;  %v2892_v34 = vpop.f32.mrb[108].mxu0 }
 0x477   : > { %v3019_v53 = vmul.f32 %v3012_v36, %v6588_v32  ;;  %v2906_v49 = vmax.f32 %v2799_v55, %v2892_v34  ;;  %v2999_v37 = vpop.f32.mrb[108].mxu1  ;;  %v2894_v21 = vpop.f32.mrb[109].mxu0 }
 0x478   : > { %v3001_v5 = vpop.f32.mrb[109].mxu1 }
 0x479   : > { %v3029_v40 = vsel %vm1854_vm1, %v3019_v53, 0.0  ;;  %v3013_v44 = vmax.f32 %v2906_v49, %v2999_v37 }
 0x47a   : > { %v2897_v48 = vpop.f32.mrb[110].mxu0  ;;  %v3030_v63 = vadd.f32 %v3029_v40, %v3028_v60 }
 0x47b   : > { %v3020_v1 = vmul.f32 %v3013_v44, %v6592_v9  ;;  %v2907_v12 = vmax.f32 %v2800_v20, %v2897_v48  ;;  %v3004_v39 = vpop.f32.mrb[110].mxu1  ;;  %v2899_v7 = vpop.f32.mrb[111].mxu0 }
 0x47c   : > { %v3006_v32 = vpop.f32.mrb[111].mxu1 }
 0x47d   : > { %v3014_v55 = vmax.f32 %v2907_v12, %v3004_v39  ;;  %v3031_v61 = vsel %vm1854_vm1, %v3020_v1, 0.0 }
 0x47e   : > { %v3032_v42 = vadd.f32 %v3031_v61, %v3030_v63 }
 0x47f   : > { %v3021_v41 = vmul.f32 %v3014_v55, %v6599_v50 }
 0x481   : > { %v3033_v30 = vsel %vm1854_vm1, %v3021_v41, 0.0 }
 0x482   : > { %v3034_v6 = vadd.f32 %v3033_v30, %v3032_v42 }
 0x484   : > { %3035 = vadd.xlane.f32.xlu0 %v3034_v6 }
 0x485   : > { %4435 = shalt.err (!%p4432_p13)
}
 0x486   : > { %s4436_s11 = scalar_lea.hbm %s6808_s15, 128  ;;  %s4440_s12 = scalar_lea.hbm %s6885_s5, 256 }
 0x487   : > { %p4437_p3 = scmp.ne.s32.totalorder %s6808_s15, %s4436_s11  ;;  %p4441_p0 = scmp.lt.u32.totalorder %s6808_s15, %s6885_s5 }
 0x488   : > { %p4442_p5 = scmp.lt.u32.totalorder %s4440_s12, %s4436_s11  ;;  %p4444_p9 = scmp.lt.u32.totalorder %s4436_s11, %s6808_s15 }
 0x489   : > { %p4438_p2 = pnand %p4437_p3, %p7242_p10 }
 0x48a   : > { %p4443_p7 = por %p4442_p5, %p4441_p0 }
 0x48b   : > { %p4439_p12 = pneg %p4438_p2 }
 0x48c   : > { %p4445_p8 = por %p4444_p9, %p4443_p7 }
 0x48e   : > { %p4446_p1 = pnand %p4445_p8, %p4439_p12 }
 0x490   : > { %4449 = shalt.err (!%p4446_p1)
}
 0x491   : > { %4202 = dma.vmem_to_hbm [thread:$0]  (%p7242_p10), %s3066_s14, 128, %s6808_s15, %s3047_s1  }
 0x492   : > { %s411_s26 = scalar_lea.vmem [#allocation12], %s3265_s8  ;;  %s6838_s1 = scalar_lea.hbm %s6886_s6, %s3605_s19 }
 0x493   : > { %s3078_s30 = sshll.u32 %s411_s26, 4  ;;  %s3052_s4 = scalar_lea.sflag [#allocation13], %s4847_s18  ;;  %s6831_s30 = int_to_ptr.vmem [resolvable:$true] %s3078_s30 }
 0x494   : > { %s4450_s7 = scalar_lea.vmem %s6831_s30, 128  ;;  %s4547_s8 = smov [#allocation12]  }
 0x495   : > { %p4451_p6 = scmp.ne.s32.totalorder %s6831_s30, %s4450_s7  ;;  %s4454_s29 = sshll.u32 %s4547_s8, 4  ;;  %s4455_s29 = int_to_ptr.vmem [resolvable:$false] %s4454_s29 }
 0x496   : > { %s4456_s28 = scalar_lea.vmem %s4455_s29, 256  ;;  %p4457_p13 = scmp.lt.s32.totalorder %s6831_s30, %s4455_s29 }
 0x497   : > { %p4452_p11 = pnand %p4451_p6, %p7242_p10  ;;  %p4458_p3 = scmp.lt.s32.totalorder %s4456_s28, %s4450_s7 }
 0x499   : > { %p4453_p4 = pneg %p4452_p11  ;;  %p4459_p2 = por %p4458_p3, %p4457_p13 }
 0x49b   : > { %p4460_p12 = pnand %p4459_p2, %p4453_p4 }
 0x511   : > { %v3036_v9 = vpop.xlane.xlu0 %3035 }
 0x512   : > { %v3037_v50 = vrot.slane %v3036_v9, 4 }
 0x514   : > { %v3038_v20 = vadd.f32 %v3037_v50, %v3036_v9 }
 0x516   : > { %v3039_v13 = vrot.slane %v3038_v20, 2 }
 0x518   : > { %v3040_v57 = vadd.f32 %v3039_v13, %v3038_v20 }
 0x51a   : > { %v3041_v11 = vrot.slane %v3040_v57, 1 }
 0x51c   : > { %v3042_v3 = vadd.f32 %v3041_v11, %v3040_v57 }
 0x51e   : > { %4188 = vpush %v3042_v3 }
 0x54f   : > { %s4189_s16 = spop %4188 }
 0x550   : > { %v3044_v62 = vstv %s4189_s16 }
 0x551   : > { %3045 = vst [vmem:[%s411_s26] sm:$0xff] %v3044_v62 }
 0x552   : > { %4463 = shalt.err (!%p4460_p12)
}
 0x553   : > { %s4464_s25 = scalar_lea.hbm %s6838_s1, 128  ;;  %s4468_s11 = scalar_lea.hbm %s6886_s6, 256 }
 0x554   : > { %p4465_p0 = scmp.ne.s32.totalorder %s6838_s1, %s4464_s25  ;;  %p4469_p9 = scmp.lt.u32.totalorder %s6838_s1, %s6886_s6 }
 0x555   : > { %p4470_p8 = scmp.lt.u32.totalorder %s4468_s11, %s4464_s25  ;;  %p4472_p6 = scmp.lt.u32.totalorder %s4464_s25, %s6838_s1 }
 0x556   : > { %p4466_p5 = pnand %p4465_p0, %p7242_p10 }
 0x557   : > { %p4471_p1 = por %p4470_p8, %p4469_p9 }
 0x558   : > { %p4467_p7 = pneg %p4466_p5 }
 0x559   : > { %p4473_p11 = por %p4472_p6, %p4471_p1 }
 0x55b   : > { %p4474_p4 = pnand %p4473_p11, %p4467_p7 }
 0x55d   : > { %4477 = shalt.err (!%p4474_p4)
}
 0x55e   : > { %4203 = dma.vmem_to_hbm [thread:$0]  (%p7242_p10), %s6831_s30, 128, %s6838_s1, %s3052_s4  }
 0x55f PF: > { %s3090_s12 = sand.u32 1, %s4520_s21   ;;  %p7243_p13 = scmp.ne.s32.totalorder %s7010_s10, 0 }
 0x560   : > { %p7244_p3 = scmp.ge.s32.totalorder %s4532_s24, 2  ;;  %s3091_s13 = scalar_lea.sflag [#allocation4], %s3090_s12 }
 0x562   : > { %p4224_p2 = pnand %p7244_p3, %p7243_p13 }
 0x564   : > { %4511 = dma.done.wait (!%p4224_p2), %s3091_s13, 128  }
 0x565   : > { %4513 = vsyncadd (!%p4224_p2), %s3091_s13, 4294967168  ;;  %s3100_s17 = scalar_lea.sflag [#allocation13], %s3090_s12 }
 0x566   : > { %4515 = dma.done.wait (!%p4224_p2), %s3100_s17, 128  }
 0x567   : > { %4517 = vsyncadd (!%p4224_p2), %s3100_s17, 4294967168  ;;  %s7245_s24 = sld [smem:[#allocation20_spill]]  ;;  %s7246_s9 = sld [smem:[#allocation21_spill]] }
 0x568   : > { %s7247_s21 = smov %s4524_s22  ;;  %s7248_s22 = smov %s4528_s23 }
 0x56d   : > { %p29_p10 = scmp.ge.s32.totalorder %s7245_s24, 4   ;;  %s7249_s23 = smov %s7246_s9 }
 0x56f   :  { %31 = sbr.rel (!%p29_p10) target bundleno = 14 (0xe), region = 143 }
 0x576   :  { %3105 = vsyncpa [#allocation3], 1 }
 0x577   :  { %3107 = vsyncpa [#allocation3 + $0x1], 1 }
 0x578   :  { %3108 = vsyncpa [#allocation6], 1 }
 0x579   :  { %3110 = vsyncpa [#allocation6 + $0x1], 1 }
 0x57a   :  { %3111 = vsyncpa [#allocation9], 1 }
 0x57b   :  { %3113 = vsyncpa [#allocation9 + $0x1], 1 }
 0x57c   :  { %3114 = vsyncpa [#allocation4], 1 }
 0x57d   :  { %3116 = vsyncpa [#allocation4 + $0x1], 1 }
 0x57e   :  { %3117 = vsyncpa [#allocation13], 1 }
 0x57f   :  { %3119 = vsyncpa [#allocation13 + $0x1], 1 }

</bundles_post_ra>
